<compile_context>
chip_gen: v7x
topology: tpu7x:2x2x1
jax: 0.10.0
libtpu: 0.0.40
codegen_flags: <defaults>
</compile_context>

<pallas_src>
import functools
import numpy as np
import jax
import jax.numpy as jnp
from jax.experimental import pallas as pl
from jax.experimental.pallas import tpu as pltpu  # noqa: F401  (kept for explicit TPU backend use)

# ----------------------------- small config ---------------------------------
BATCH = 2
IN_CHANNELS = 4
SPATIAL = 16
PATCH = 4
HIDDEN = 64
DEPTH = 2
NUM_HEADS = 4
MLP_RATIO = 4.0
LEARN_SIGMA = False

OUT_CHANNELS = IN_CHANNELS * 2 if LEARN_SIGMA else IN_CHANNELS
NUM_PATCHES = (SPATIAL // PATCH) ** 2          # 16 tokens per sample
PATCH_DIM = IN_CHANNELS * PATCH * PATCH        # 64
MLP_HIDDEN = int(HIDDEN * MLP_RATIO)           # 256
HEAD_DIM = HIDDEN // NUM_HEADS                 # 16
FINAL_DIM = PATCH * PATCH * OUT_CHANNELS       # 64
FREQ_DIM = 256
NMOD = 6 * DEPTH + 2                           # all adaLN modulation rows (blocks + final)


# ----------------------------- fused Pallas kernel --------------------------
def dit_fused_kernel(tok_ref, posb_ref, mods_ref, mask_ref,
                     pe_w, w_qkv, b_qkv, w_proj, b_proj,
                     w_fc1, b_fc1, w_fc2, b_fc2,
                     fin_w, fin_b, o_ref,
                     *, depth, num_heads, head_dim, hidden):
    f32 = jnp.float32

    def ln(v, eps=1e-6):
        # LayerNorm(elementwise_affine=False, eps=1e-6)
        mu = jnp.mean(v, axis=-1, keepdims=True)
        var = jnp.mean((v - mu) * (v - mu), axis=-1, keepdims=True)
        return (v - mu) * jax.lax.rsqrt(var + eps)

    def gelu_tanh(v):
        # PyTorch GELU(approximate='tanh')
        return 0.5 * v * (1.0 + jnp.tanh(0.7978845608028654 * (v + 0.044715 * v * v * v)))

    # ---- patch embed; positional embedding + patch bias pre-folded into posb ----
    x = jnp.dot(tok_ref[...], pe_w[...], preferred_element_type=f32) + posb_ref[...]  # (BT, H)

    mask = mask_ref[...]                       # (BT, BT) block-diagonal additive mask

    for l in range(depth):
        shift_msa = mods_ref[6 * l + 0]        # (BT, H) -- pre-broadcast per-token
        scale_msa = mods_ref[6 * l + 1]
        gate_msa = mods_ref[6 * l + 2]
        shift_mlp = mods_ref[6 * l + 3]
        scale_mlp = mods_ref[6 * l + 4]
        gate_mlp = mods_ref[6 * l + 5]

        # --- attention branch: single wide QKV matmul, per-head slices, single proj ---
        h1 = ln(x) * (1.0 + scale_msa) + shift_msa                               # (BT, H)
        qkv = jnp.dot(h1, w_qkv[l], preferred_element_type=f32) + b_qkv[l]       # (BT, 3H)

        head_outs = []
        for h in range(num_heads):
            q_h = qkv[:, h * head_dim:(h + 1) * head_dim]                        # (BT, hd)
            k_h = qkv[:, hidden + h * head_dim:hidden + (h + 1) * head_dim]
            v_h = qkv[:, 2 * hidden + h * head_dim:2 * hidden + (h + 1) * head_dim]
            # 1/sqrt(head_dim) already folded into the Q weights/bias at pack time.
            s = jnp.einsum("qd,kd->qk", q_h, k_h, preferred_element_type=f32) + mask
            s = s - jnp.max(s, axis=-1, keepdims=True)
            p = jnp.exp(s)
            p = p * pl.reciprocal(jnp.sum(p, axis=-1, keepdims=True), approx=True)
            head_outs.append(jnp.dot(p, v_h, preferred_element_type=f32))        # (BT, hd)
        o = jnp.concatenate(head_outs, axis=-1)                                  # (BT, H)
        attn = jnp.dot(o, w_proj[l], preferred_element_type=f32) + b_proj[l]     # (BT, H)
        x = x + gate_msa * attn

        # --- MLP branch ---
        h2 = ln(x) * (1.0 + scale_mlp) + shift_mlp
        mid = jnp.dot(h2, w_fc1[l], preferred_element_type=f32) + b_fc1[l]       # (BT, MLP)
        mlp = jnp.dot(gelu_tanh(mid), w_fc2[l], preferred_element_type=f32) + b_fc2[l]
        x = x + gate_mlp * mlp

    # ---- final layer ----
    shift_f = mods_ref[6 * depth + 0]
    scale_f = mods_ref[6 * depth + 1]
    hf = ln(x) * (1.0 + scale_f) + shift_f
    y = jnp.dot(hf, fin_w[...], preferred_element_type=f32) + fin_b[...]          # (BT, FINAL)
    o_ref[...] = y.astype(o_ref.dtype)


# ----------------------------- pallas_call wrapper ---------------------------
_WEIGHT_ORDER = ("pe_w", "blk_w_qkv", "blk_b_qkv", "blk_w_proj", "blk_b_proj",
                 "blk_w_fc1", "blk_b_fc1", "blk_w_fc2", "blk_b_fc2",
                 "fin_w", "fin_b")


def run_dit_fused(patches, c, kp):
    """patches: (B, T, PATCH_DIM) f32, c: (B, HIDDEN) f32 -> (B, T, FINAL_DIM) f32."""
    B, T, PD = patches.shape
    BT = B * T
    tok = patches.reshape(BT, PD).astype(jnp.float32)

    # adaLN hoisted out of the kernel: one wide matmul for all blocks + final layer,
    # then per-sample rows broadcast over that sample's tokens (row b*T+t <- sample b).
    mods = jax.nn.silu(c) @ kp["ada_w_all"] + kp["ada_b_all"]          # (B, NMOD*H)
    mods = mods.reshape(B, NMOD, HIDDEN).transpose(1, 0, 2)            # (NMOD, B, H)
    mods = jnp.repeat(mods, T, axis=1).astype(jnp.float32)             # (NMOD, BT, H)

    # Block-diagonal additive mask: with the batch folded into the token rows,
    # attention must not mix samples.
    sample_ids = jnp.repeat(jnp.arange(B, dtype=jnp.int32), T)
    mask = jnp.where(sample_ids[:, None] == sample_ids[None, :],
                     0.0, -1e30).astype(jnp.float32)                   # (BT, BT)

    # pos embedding (+ folded patch-embed bias), tiled over the batch tokens
    posb = jnp.tile(kp["pos_pb"], (B, 1)).astype(jnp.float32)          # (BT, H)

    kern = functools.partial(dit_fused_kernel, depth=DEPTH, num_heads=NUM_HEADS,
                             head_dim=HEAD_DIM, hidden=HIDDEN)
    weights = [kp[name] for name in _WEIGHT_ORDER]

    # Single invocation (no grid): everything (activations + ~0.5 MB of weights)
    # lives in VMEM for the whole forward pass; no per-sample serial grid steps.
    out = pl.pallas_call(
        kern,
        out_shape=jax.ShapeDtypeStruct((BT, FINAL_DIM), jnp.float32),
    )(tok, posb, mods, mask, *weights)

    return out.reshape(B, T, FINAL_DIM)


# ----------------------------- plain-JAX glue --------------------------------
def patchify(x, p):
    # x: (N, C, H, W) -> (N, T, C*p*p), per-patch feature order (C, p, p)
    N, C, H, W = x.shape
    h, w = H // p, W // p
    x = x.reshape(N, C, h, p, w, p)
    x = jnp.transpose(x, (0, 2, 4, 1, 3, 5))       # N, h, w, C, p, p
    return x.reshape(N, h * w, C * p * p)


def unpatchify(x, p, c):
    # x: (N, T, p*p*c) -> (N, c, H, W), matching torch 'nhwpqc->nchpwq'
    N, T, _ = x.shape
    h = w = int(T ** 0.5)
    x = x.reshape(N, h, w, p, p, c)
    x = jnp.einsum("nhwpqc->nchpwq", x)
    return x.reshape(N, c, h * p, w * p)


def get_1d_sincos_pos_embed(embed_dim, pos):
    omega = np.arange(embed_dim // 2, dtype=np.float64) / (embed_dim / 2.0)
    omega = 1.0 / 10000 ** omega
    out = np.einsum("m,d->md", pos.reshape(-1), omega)
    return np.concatenate([np.sin(out), np.cos(out)], axis=1)


def get_2d_sincos_pos_embed(embed_dim, grid_size):
    grid_h = np.arange(grid_size, dtype=np.float64)
    grid_w = np.arange(grid_size, dtype=np.float64)
    grid = np.meshgrid(grid_w, grid_h)              # w first (matches reference impl)
    grid = np.stack(grid, axis=0).reshape(2, -1)
    emb_h = get_1d_sincos_pos_embed(embed_dim // 2, grid[0])
    emb_w = get_1d_sincos_pos_embed(embed_dim // 2, grid[1])
    return np.concatenate([emb_h, emb_w], axis=1).astype(np.float32)


def timestep_frequency_embedding(t, dim, max_period=10000.0):
    half = dim // 2
    freqs = jnp.exp(-jnp.log(max_period) * jnp.arange(half, dtype=jnp.float32) / half)
    args = t.astype(jnp.float32)[:, None] * freqs[None, :]
    return jnp.concatenate([jnp.cos(args), jnp.sin(args)], axis=-1)


# ----------------------------- parameter init & packing ----------------------
def xavier_uniform(key, shape):
    fan_in, fan_out = shape[0], shape[1]
    limit = (6.0 / (fan_in + fan_out)) ** 0.5
    return jax.random.uniform(key, shape, jnp.float32, -limit, limit)


def init_params(key):
    keys = iter(jax.random.split(key, 64))
    params = {}

    # Patch embed (conv with kernel=stride=patch -> equivalent linear)
    params["patch_w"] = xavier_uniform(next(keys), (PATCH_DIM, HIDDEN))
    params["patch_b"] = 0.02 * jax.random.normal(next(keys), (1, HIDDEN), jnp.float32)

    # Fixed 2D sincos positional embedding
    params["pos"] = jnp.asarray(get_2d_sincos_pos_embed(HIDDEN, int(NUM_PATCHES ** 0.5)))

    # Timestep embedder (standard DiT TimestepEmbedder: freq emb -> MLP)
    params["t_w1"] = xavier_uniform(next(keys), (FREQ_DIM, HIDDEN))
    params["t_b1"] = 0.02 * jax.random.normal(next(keys), (HIDDEN,), jnp.float32)
    params["t_w2"] = xavier_uniform(next(keys), (HIDDEN, HIDDEN))
    params["t_b2"] = 0.02 * jax.random.normal(next(keys), (HIDDEN,), jnp.float32)

    # DiT blocks (NOTE: reference zero-inits adaLN + final linear; we use
    # nonzero deterministic init so the kernel does real work)
    params["blocks"] = []
    for _ in range(DEPTH):
        blk = {
            "w_ada": xavier_uniform(next(keys), (HIDDEN, 6 * HIDDEN)),
            "b_ada": 0.02 * jax.random.normal(next(keys), (1, 6 * HIDDEN), jnp.float32),
            "w_qkv": xavier_uniform(next(keys), (HIDDEN, 3 * HIDDEN)),
            "b_qkv": 0.02 * jax.random.normal(next(keys), (1, 3 * HIDDEN), jnp.float32),
            "w_proj": xavier_uniform(next(keys), (HIDDEN, HIDDEN)),
            "b_proj": 0.02 * jax.random.normal(next(keys), (1, HIDDEN), jnp.float32),
            "w_fc1": xavier_uniform(next(keys), (HIDDEN, MLP_HIDDEN)),
            "b_fc1": 0.02 * jax.random.normal(next(keys), (1, MLP_HIDDEN), jnp.float32),
            "w_fc2": xavier_uniform(next(keys), (MLP_HIDDEN, HIDDEN)),
            "b_fc2": 0.02 * jax.random.normal(next(keys), (1, HIDDEN), jnp.float32),
        }
        params["blocks"].append(blk)

    params["final"] = {
        "w_ada": xavier_uniform(next(keys), (HIDDEN, 2 * HIDDEN)),
        "b_ada": 0.02 * jax.random.normal(next(keys), (1, 2 * HIDDEN), jnp.float32),
        "w_lin": xavier_uniform(next(keys), (HIDDEN, FINAL_DIM)),
        "b_lin": 0.02 * jax.random.normal(next(keys), (1, FINAL_DIM), jnp.float32),
    }
    return params


def pack_params(p):
    """Cast/fold weights into kernel-friendly layouts. Done once, outside jit."""
    f32 = jnp.float32
    blks = p["blocks"]

    # fold 1/sqrt(head_dim) into the Q columns of the qkv projection (+ its bias)
    qscale = HEAD_DIM ** -0.5
    col_scale = jnp.concatenate([jnp.full((HIDDEN,), qscale, f32),
                                 jnp.ones((2 * HIDDEN,), f32)])[None, :]     # (1, 3H)

    kp = {
        # timestep-embedder MLP (runs in plain JAX)
        "t_w1": p["t_w1"], "t_b1": p["t_b1"], "t_w2": p["t_w2"], "t_b2": p["t_b2"],
        # patch embed; bias folded into the positional embedding
        "pe_w": p["patch_w"].astype(f32),
        "pos_pb": (p["pos"] + p["patch_b"]).astype(f32),                    # (T, H)
        # all adaLN linears (every block + final) concatenated -> single host matmul
        "ada_w_all": jnp.concatenate([b["w_ada"] for b in blks]
                                     + [p["final"]["w_ada"]], axis=1).astype(f32),
        "ada_b_all": jnp.concatenate([b["b_ada"] for b in blks]
                                     + [p["final"]["b_ada"]], axis=1).astype(f32),
        # DiT blocks, stacked over depth (kept f32: kernel is latency-bound, not BW-bound)
        "blk_w_qkv": jnp.stack([b["w_qkv"] * col_scale for b in blks]).astype(f32),
        "blk_b_qkv": jnp.stack([b["b_qkv"] * col_scale for b in blks]).astype(f32),
        "blk_w_proj": jnp.stack([b["w_proj"] for b in blks]).astype(f32),
        "blk_b_proj": jnp.stack([b["b_proj"] for b in blks]).astype(f32),
        "blk_w_fc1": jnp.stack([b["w_fc1"] for b in blks]).astype(f32),
        "blk_b_fc1": jnp.stack([b["b_fc1"] for b in blks]).astype(f32),
        "blk_w_fc2": jnp.stack([b["w_fc2"] for b in blks]).astype(f32),
        "blk_b_fc2": jnp.stack([b["b_fc2"] for b in blks]).astype(f32),
        # final layer
        "fin_w": p["final"]["w_lin"].astype(f32),
        "fin_b": p["final"]["b_lin"].astype(f32),
    }
    return kp


# ----------------------------- forward ---------------------------------------
def dit_forward(kparams, x, context):
    # TODO(synk): the reference's config-driven `_context_transformers` /
    # `_projections` are abstract; replaced by a standard DiT TimestepEmbedder
    # producing context['timestep_embedding'] of shape (N, hidden).
    t = context["timestep"]
    t_freq = timestep_frequency_embedding(t, FREQ_DIM)
    c = (jax.nn.silu(t_freq @ kparams["t_w1"] + kparams["t_b1"])
         @ kparams["t_w2"] + kparams["t_b2"])                      # (N, HIDDEN)

    patches = patchify(x, PATCH)                                   # (N, T, C*p*p)

    # One fused Pallas kernel: patch embed + pos, DEPTH DiT blocks, final layer.
    out_tokens = run_dit_fused(patches, c, kparams)                # (N, T, p*p*out_c)

    return unpatchify(out_tokens, PATCH, OUT_CHANNELS)             # (N, out_c, H, W)


# ----------------------------- main ------------------------------------------
if __name__ == "__main__":
    key = jax.random.PRNGKey(0)
    k_param, k_x, k_t = jax.random.split(key, 3)

    params = init_params(k_param)
    kparams = pack_params(params)

    x = jax.random.normal(k_x, (BATCH, IN_CHANNELS, SPATIAL, SPATIAL), jnp.float32)
    timesteps = jax.random.uniform(k_t, (BATCH,), jnp.float32, 0.0, 1000.0)
    context = {"timestep": timesteps}

    out = jax.jit(dit_forward)(kparams, x, context)
    out = jax.block_until_ready(out)

    assert out.shape == (BATCH, OUT_CHANNELS, SPATIAL, SPATIAL), out.shape
    assert out.dtype == jnp.float32
    assert bool(jnp.all(jnp.isfinite(out)))
    print("KERNEL_OK")
</pallas_src>

<mosaic_0001>
module attributes {stable_mosaic.version = 11 : i64} {
  func.func @dit_fused_kernel(%arg0: memref<32x64xf32, #tpu.memory_space<vmem>>, %arg1: memref<32x64xf32, #tpu.memory_space<vmem>>, %arg2: memref<14x32x64xf32, #tpu.memory_space<vmem>>, %arg3: memref<32x32xf32, #tpu.memory_space<vmem>>, %arg4: memref<64x64xf32, #tpu.memory_space<vmem>>, %arg5: memref<2x64x192xf32, #tpu.memory_space<vmem>>, %arg6: memref<2x1x192xf32, #tpu.memory_space<vmem>>, %arg7: memref<2x64x64xf32, #tpu.memory_space<vmem>>, %arg8: memref<2x1x64xf32, #tpu.memory_space<vmem>>, %arg9: memref<2x64x256xf32, #tpu.memory_space<vmem>>, %arg10: memref<2x1x256xf32, #tpu.memory_space<vmem>>, %arg11: memref<2x256x64xf32, #tpu.memory_space<vmem>>, %arg12: memref<2x1x64xf32, #tpu.memory_space<vmem>>, %arg13: memref<64x64xf32, #tpu.memory_space<vmem>>, %arg14: memref<1x64xf32, #tpu.memory_space<vmem>>, %arg15: memref<32x64xf32, #tpu.memory_space<vmem>>) attributes {dimension_semantics = [], scalar_prefetch = 0 : i64, scratch_operands = 0 : i64, tpu.core_type = #tpu.core_type<tc>} {
    %c0 = arith.constant 0 : index
    %c0_0 = arith.constant 0 : index
    %0 = vector.load %arg0[%c0, %c0_0] : memref<32x64xf32, #tpu.memory_space<vmem>>, vector<32x64xf32>
    %c0_1 = arith.constant 0 : index
    %c0_2 = arith.constant 0 : index
    %1 = vector.load %arg4[%c0_1, %c0_2] : memref<64x64xf32, #tpu.memory_space<vmem>>, vector<64x64xf32>
    %cst = arith.constant dense<0.000000e+00> : vector<32x64xf32>
    %2 = tpu.matmul %0, %1, %cst {dimension_numbers = #tpu.dot_dimension_numbers<[1], [0], [0], [1], [0, 0, 1, 1], [], []>} : vector<32x64xf32>, vector<64x64xf32>, vector<32x64xf32> -> vector<32x64xf32>
    %c0_3 = arith.constant 0 : index
    %c0_4 = arith.constant 0 : index
    %3 = vector.load %arg1[%c0_3, %c0_4] : memref<32x64xf32, #tpu.memory_space<vmem>>, vector<32x64xf32>
    %4 = arith.addf %2, %3 : vector<32x64xf32>
    %c0_5 = arith.constant 0 : index
    %c0_6 = arith.constant 0 : index
    %5 = vector.load %arg3[%c0_5, %c0_6] : memref<32x32xf32, #tpu.memory_space<vmem>>, vector<32x32xf32>
    %c0_7 = arith.constant 0 : index
    %c0_8 = arith.constant 0 : index
    %c0_9 = arith.constant 0 : index
    %6 = vector.load %arg2[%c0_7, %c0_8, %c0_9] : memref<14x32x64xf32, #tpu.memory_space<vmem>>, vector<1x32x64xf32>
    %7 = vector.shape_cast %6 : vector<1x32x64xf32> to vector<32x64xf32>
    %c1 = arith.constant 1 : index
    %c0_10 = arith.constant 0 : index
    %c0_11 = arith.constant 0 : index
    %8 = vector.load %arg2[%c1, %c0_10, %c0_11] : memref<14x32x64xf32, #tpu.memory_space<vmem>>, vector<1x32x64xf32>
    %9 = vector.shape_cast %8 : vector<1x32x64xf32> to vector<32x64xf32>
    %c2 = arith.constant 2 : index
    %c0_12 = arith.constant 0 : index
    %c0_13 = arith.constant 0 : index
    %10 = vector.load %arg2[%c2, %c0_12, %c0_13] : memref<14x32x64xf32, #tpu.memory_space<vmem>>, vector<1x32x64xf32>
    %11 = vector.shape_cast %10 : vector<1x32x64xf32> to vector<32x64xf32>
    %c3 = arith.constant 3 : index
    %c0_14 = arith.constant 0 : index
    %c0_15 = arith.constant 0 : index
    %12 = vector.load %arg2[%c3, %c0_14, %c0_15] : memref<14x32x64xf32, #tpu.memory_space<vmem>>, vector<1x32x64xf32>
    %13 = vector.shape_cast %12 : vector<1x32x64xf32> to vector<32x64xf32>
    %c4 = arith.constant 4 : index
    %c0_16 = arith.constant 0 : index
    %c0_17 = arith.constant 0 : index
    %14 = vector.load %arg2[%c4, %c0_16, %c0_17] : memref<14x32x64xf32, #tpu.memory_space<vmem>>, vector<1x32x64xf32>
    %15 = vector.shape_cast %14 : vector<1x32x64xf32> to vector<32x64xf32>
    %c5 = arith.constant 5 : index
    %c0_18 = arith.constant 0 : index
    %c0_19 = arith.constant 0 : index
    %16 = vector.load %arg2[%c5, %c0_18, %c0_19] : memref<14x32x64xf32, #tpu.memory_space<vmem>>, vector<1x32x64xf32>
    %17 = vector.shape_cast %16 : vector<1x32x64xf32> to vector<32x64xf32>
    %cst_20 = arith.constant dense<0.000000e+00> : vector<32xf32>
    %18 = vector.multi_reduction <add>, %4, %cst_20 [1] : vector<32x64xf32> to vector<32xf32>
    %19 = vector.shape_cast %18 : vector<32xf32> to vector<32x1xf32>
    %cst_21 = arith.constant 6.400000e+01 : f32
    %20 = vector.broadcast %cst_21 : f32 to vector<32x1xf32>
    %21 = arith.divf %19, %20 : vector<32x1xf32>
    %22 = vector.broadcast %21 : vector<32x1xf32> to vector<32x64xf32>
    %23 = arith.subf %4, %22 : vector<32x64xf32>
    %24 = vector.broadcast %21 : vector<32x1xf32> to vector<32x64xf32>
    %25 = arith.subf %4, %24 : vector<32x64xf32>
    %26 = arith.mulf %23, %25 : vector<32x64xf32>
    %cst_22 = arith.constant dense<0.000000e+00> : vector<32xf32>
    %27 = vector.multi_reduction <add>, %26, %cst_22 [1] : vector<32x64xf32> to vector<32xf32>
    %28 = vector.shape_cast %27 : vector<32xf32> to vector<32x1xf32>
    %cst_23 = arith.constant 6.400000e+01 : f32
    %29 = vector.broadcast %cst_23 : f32 to vector<32x1xf32>
    %30 = arith.divf %28, %29 : vector<32x1xf32>
    %31 = vector.broadcast %21 : vector<32x1xf32> to vector<32x64xf32>
    %32 = arith.subf %4, %31 : vector<32x64xf32>
    %cst_24 = arith.constant 9.99999997E-7 : f32
    %33 = vector.broadcast %cst_24 : f32 to vector<32x1xf32>
    %34 = arith.addf %30, %33 : vector<32x1xf32>
    %35 = math.rsqrt %34 : vector<32x1xf32>
    %36 = vector.broadcast %35 : vector<32x1xf32> to vector<32x64xf32>
    %37 = arith.mulf %32, %36 : vector<32x64xf32>
    %cst_25 = arith.constant 1.000000e+00 : f32
    %38 = vector.broadcast %cst_25 : f32 to vector<32x64xf32>
    %39 = arith.addf %38, %9 : vector<32x64xf32>
    %40 = arith.mulf %37, %39 : vector<32x64xf32>
    %41 = arith.addf %40, %7 : vector<32x64xf32>
    %c0_26 = arith.constant 0 : index
    %c0_27 = arith.constant 0 : index
    %c0_28 = arith.constant 0 : index
    %42 = vector.load %arg5[%c0_26, %c0_27, %c0_28] : memref<2x64x192xf32, #tpu.memory_space<vmem>>, vector<1x64x192xf32>
    %43 = vector.shape_cast %42 : vector<1x64x192xf32> to vector<64x192xf32>
    %cst_29 = arith.constant dense<0.000000e+00> : vector<32x192xf32>
    %44 = tpu.matmul %41, %43, %cst_29 {dimension_numbers = #tpu.dot_dimension_numbers<[1], [0], [0], [1], [0, 0, 1, 1], [], []>} : vector<32x64xf32>, vector<64x192xf32>, vector<32x192xf32> -> vector<32x192xf32>
    %c0_30 = arith.constant 0 : index
    %c0_31 = arith.constant 0 : index
    %c0_32 = arith.constant 0 : index
    %45 = vector.load %arg6[%c0_30, %c0_31, %c0_32] : memref<2x1x192xf32, #tpu.memory_space<vmem>>, vector<1x1x192xf32>
    %46 = vector.shape_cast %45 : vector<1x1x192xf32> to vector<1x192xf32>
    %47 = vector.broadcast %46 : vector<1x192xf32> to vector<32x192xf32>
    %48 = arith.addf %44, %47 : vector<32x192xf32>
    %49 = vector.extract_strided_slice %48 {offsets = [0, 0], sizes = [32, 16], strides = [1, 1]} : vector<32x192xf32> to vector<32x16xf32>
    %50 = vector.extract_strided_slice %48 {offsets = [0, 64], sizes = [32, 16], strides = [1, 1]} : vector<32x192xf32> to vector<32x16xf32>
    %51 = vector.extract_strided_slice %48 {offsets = [0, 128], sizes = [32, 16], strides = [1, 1]} : vector<32x192xf32> to vector<32x16xf32>
    "tpu.trace_start"() <{level = 10 : i32, message = "qd,kd->qk"}> : () -> ()
    %cst_33 = arith.constant dense<0.000000e+00> : vector<32x32xf32>
    %52 = tpu.matmul %49, %50, %cst_33 {dimension_numbers = #tpu.dot_dimension_numbers<[1], [1], [0], [0], [0, 0, 1, 0], [], []>} : vector<32x16xf32>, vector<32x16xf32>, vector<32x32xf32> -> vector<32x32xf32>
    "tpu.trace_stop"() : () -> ()
    %53 = arith.addf %52, %5 : vector<32x32xf32>
    %cst_34 = arith.constant dense<0xFF800000> : vector<32xf32>
    %54 = vector.multi_reduction <maximumf>, %53, %cst_34 [1] : vector<32x32xf32> to vector<32xf32>
    %55 = vector.shape_cast %54 : vector<32xf32> to vector<32x1xf32>
    %56 = vector.broadcast %55 : vector<32x1xf32> to vector<32x32xf32>
    %57 = arith.subf %53, %56 : vector<32x32xf32>
    %58 = math.exp %57 : vector<32x32xf32>
    %cst_35 = arith.constant dense<0.000000e+00> : vector<32xf32>
    %59 = vector.multi_reduction <add>, %58, %cst_35 [1] : vector<32x32xf32> to vector<32xf32>
    %60 = vector.shape_cast %59 : vector<32xf32> to vector<32x1xf32>
    %61 = tpu.reciprocal %60 {approx = true} : vector<32x1xf32> -> vector<32x1xf32>
    %62 = vector.broadcast %61 : vector<32x1xf32> to vector<32x32xf32>
    %63 = arith.mulf %58, %62 : vector<32x32xf32>
    %cst_36 = arith.constant dense<0.000000e+00> : vector<32x16xf32>
    %64 = tpu.matmul %63, %51, %cst_36 {dimension_numbers = #tpu.dot_dimension_numbers<[1], [0], [0], [1], [0, 0, 1, 1], [], []>} : vector<32x32xf32>, vector<32x16xf32>, vector<32x16xf32> -> vector<32x16xf32>
    %65 = vector.extract_strided_slice %48 {offsets = [0, 16], sizes = [32, 16], strides = [1, 1]} : vector<32x192xf32> to vector<32x16xf32>
    %66 = vector.extract_strided_slice %48 {offsets = [0, 80], sizes = [32, 16], strides = [1, 1]} : vector<32x192xf32> to vector<32x16xf32>
    %67 = vector.extract_strided_slice %48 {offsets = [0, 144], sizes = [32, 16], strides = [1, 1]} : vector<32x192xf32> to vector<32x16xf32>
    "tpu.trace_start"() <{level = 10 : i32, message = "qd,kd->qk"}> : () -> ()
    %cst_37 = arith.constant dense<0.000000e+00> : vector<32x32xf32>
    %68 = tpu.matmul %65, %66, %cst_37 {dimension_numbers = #tpu.dot_dimension_numbers<[1], [1], [0], [0], [0, 0, 1, 0], [], []>} : vector<32x16xf32>, vector<32x16xf32>, vector<32x32xf32> -> vector<32x32xf32>
    "tpu.trace_stop"() : () -> ()
    %69 = arith.addf %68, %5 : vector<32x32xf32>
    %cst_38 = arith.constant dense<0xFF800000> : vector<32xf32>
    %70 = vector.multi_reduction <maximumf>, %69, %cst_38 [1] : vector<32x32xf32> to vector<32xf32>
    %71 = vector.shape_cast %70 : vector<32xf32> to vector<32x1xf32>
    %72 = vector.broadcast %71 : vector<32x1xf32> to vector<32x32xf32>
    %73 = arith.subf %69, %72 : vector<32x32xf32>
    %74 = math.exp %73 : vector<32x32xf32>
    %cst_39 = arith.constant dense<0.000000e+00> : vector<32xf32>
    %75 = vector.multi_reduction <add>, %74, %cst_39 [1] : vector<32x32xf32> to vector<32xf32>
    %76 = vector.shape_cast %75 : vector<32xf32> to vector<32x1xf32>
    %77 = tpu.reciprocal %76 {approx = true} : vector<32x1xf32> -> vector<32x1xf32>
    %78 = vector.broadcast %77 : vector<32x1xf32> to vector<32x32xf32>
    %79 = arith.mulf %74, %78 : vector<32x32xf32>
    %cst_40 = arith.constant dense<0.000000e+00> : vector<32x16xf32>
    %80 = tpu.matmul %79, %67, %cst_40 {dimension_numbers = #tpu.dot_dimension_numbers<[1], [0], [0], [1], [0, 0, 1, 1], [], []>} : vector<32x32xf32>, vector<32x16xf32>, vector<32x16xf32> -> vector<32x16xf32>
    %81 = vector.extract_strided_slice %48 {offsets = [0, 32], sizes = [32, 16], strides = [1, 1]} : vector<32x192xf32> to vector<32x16xf32>
    %82 = vector.extract_strided_slice %48 {offsets = [0, 96], sizes = [32, 16], strides = [1, 1]} : vector<32x192xf32> to vector<32x16xf32>
    %83 = vector.extract_strided_slice %48 {offsets = [0, 160], sizes = [32, 16], strides = [1, 1]} : vector<32x192xf32> to vector<32x16xf32>
    "tpu.trace_start"() <{level = 10 : i32, message = "qd,kd->qk"}> : () -> ()
    %cst_41 = arith.constant dense<0.000000e+00> : vector<32x32xf32>
    %84 = tpu.matmul %81, %82, %cst_41 {dimension_numbers = #tpu.dot_dimension_numbers<[1], [1], [0], [0], [0, 0, 1, 0], [], []>} : vector<32x16xf32>, vector<32x16xf32>, vector<32x32xf32> -> vector<32x32xf32>
    "tpu.trace_stop"() : () -> ()
    %85 = arith.addf %84, %5 : vector<32x32xf32>
    %cst_42 = arith.constant dense<0xFF800000> : vector<32xf32>
    %86 = vector.multi_reduction <maximumf>, %85, %cst_42 [1] : vector<32x32xf32> to vector<32xf32>
    %87 = vector.shape_cast %86 : vector<32xf32> to vector<32x1xf32>
    %88 = vector.broadcast %87 : vector<32x1xf32> to vector<32x32xf32>
    %89 = arith.subf %85, %88 : vector<32x32xf32>
    %90 = math.exp %89 : vector<32x32xf32>
    %cst_43 = arith.constant dense<0.000000e+00> : vector<32xf32>
    %91 = vector.multi_reduction <add>, %90, %cst_43 [1] : vector<32x32xf32> to vector<32xf32>
    %92 = vector.shape_cast %91 : vector<32xf32> to vector<32x1xf32>
    %93 = tpu.reciprocal %92 {approx = true} : vector<32x1xf32> -> vector<32x1xf32>
    %94 = vector.broadcast %93 : vector<32x1xf32> to vector<32x32xf32>
    %95 = arith.mulf %90, %94 : vector<32x32xf32>
    %cst_44 = arith.constant dense<0.000000e+00> : vector<32x16xf32>
    %96 = tpu.matmul %95, %83, %cst_44 {dimension_numbers = #tpu.dot_dimension_numbers<[1], [0], [0], [1], [0, 0, 1, 1], [], []>} : vector<32x32xf32>, vector<32x16xf32>, vector<32x16xf32> -> vector<32x16xf32>
    %97 = vector.extract_strided_slice %48 {offsets = [0, 48], sizes = [32, 16], strides = [1, 1]} : vector<32x192xf32> to vector<32x16xf32>
    %98 = vector.extract_strided_slice %48 {offsets = [0, 112], sizes = [32, 16], strides = [1, 1]} : vector<32x192xf32> to vector<32x16xf32>
    %99 = vector.extract_strided_slice %48 {offsets = [0, 176], sizes = [32, 16], strides = [1, 1]} : vector<32x192xf32> to vector<32x16xf32>
    "tpu.trace_start"() <{level = 10 : i32, message = "qd,kd->qk"}> : () -> ()
    %cst_45 = arith.constant dense<0.000000e+00> : vector<32x32xf32>
    %100 = tpu.matmul %97, %98, %cst_45 {dimension_numbers = #tpu.dot_dimension_numbers<[1], [1], [0], [0], [0, 0, 1, 0], [], []>} : vector<32x16xf32>, vector<32x16xf32>, vector<32x32xf32> -> vector<32x32xf32>
    "tpu.trace_stop"() : () -> ()
    %101 = arith.addf %100, %5 : vector<32x32xf32>
    %cst_46 = arith.constant dense<0xFF800000> : vector<32xf32>
    %102 = vector.multi_reduction <maximumf>, %101, %cst_46 [1] : vector<32x32xf32> to vector<32xf32>
    %103 = vector.shape_cast %102 : vector<32xf32> to vector<32x1xf32>
    %104 = vector.broadcast %103 : vector<32x1xf32> to vector<32x32xf32>
    %105 = arith.subf %101, %104 : vector<32x32xf32>
    %106 = math.exp %105 : vector<32x32xf32>
    %cst_47 = arith.constant dense<0.000000e+00> : vector<32xf32>
    %107 = vector.multi_reduction <add>, %106, %cst_47 [1] : vector<32x32xf32> to vector<32xf32>
    %108 = vector.shape_cast %107 : vector<32xf32> to vector<32x1xf32>
    %109 = tpu.reciprocal %108 {approx = true} : vector<32x1xf32> -> vector<32x1xf32>
    %110 = vector.broadcast %109 : vector<32x1xf32> to vector<32x32xf32>
    %111 = arith.mulf %106, %110 : vector<32x32xf32>
    %cst_48 = arith.constant dense<0.000000e+00> : vector<32x16xf32>
    %112 = tpu.matmul %111, %99, %cst_48 {dimension_numbers = #tpu.dot_dimension_numbers<[1], [0], [0], [1], [0, 0, 1, 1], [], []>} : vector<32x32xf32>, vector<32x16xf32>, vector<32x16xf32> -> vector<32x16xf32>
    %113 = tpu.concatenate %64, %80, %96, %112 in 1 : vector<32x16xf32>, vector<32x16xf32>, vector<32x16xf32>, vector<32x16xf32> -> vector<32x64xf32>
    %c0_49 = arith.constant 0 : index
    %c0_50 = arith.constant 0 : index
    %c0_51 = arith.constant 0 : index
    %114 = vector.load %arg7[%c0_49, %c0_50, %c0_51] : memref<2x64x64xf32, #tpu.memory_space<vmem>>, vector<1x64x64xf32>
    %115 = vector.shape_cast %114 : vector<1x64x64xf32> to vector<64x64xf32>
    %cst_52 = arith.constant dense<0.000000e+00> : vector<32x64xf32>
    %116 = tpu.matmul %113, %115, %cst_52 {dimension_numbers = #tpu.dot_dimension_numbers<[1], [0], [0], [1], [0, 0, 1, 1], [], []>} : vector<32x64xf32>, vector<64x64xf32>, vector<32x64xf32> -> vector<32x64xf32>
    %c0_53 = arith.constant 0 : index
    %c0_54 = arith.constant 0 : index
    %c0_55 = arith.constant 0 : index
    %117 = vector.load %arg8[%c0_53, %c0_54, %c0_55] : memref<2x1x64xf32, #tpu.memory_space<vmem>>, vector<1x1x64xf32>
    %118 = vector.shape_cast %117 : vector<1x1x64xf32> to vector<1x64xf32>
    %119 = vector.broadcast %118 : vector<1x64xf32> to vector<32x64xf32>
    %120 = arith.addf %116, %119 : vector<32x64xf32>
    %121 = arith.mulf %11, %120 : vector<32x64xf32>
    %122 = arith.addf %4, %121 : vector<32x64xf32>
    %cst_56 = arith.constant dense<0.000000e+00> : vector<32xf32>
    %123 = vector.multi_reduction <add>, %122, %cst_56 [1] : vector<32x64xf32> to vector<32xf32>
    %124 = vector.shape_cast %123 : vector<32xf32> to vector<32x1xf32>
    %cst_57 = arith.constant 6.400000e+01 : f32
    %125 = vector.broadcast %cst_57 : f32 to vector<32x1xf32>
    %126 = arith.divf %124, %125 : vector<32x1xf32>
    %127 = vector.broadcast %126 : vector<32x1xf32> to vector<32x64xf32>
    %128 = arith.subf %122, %127 : vector<32x64xf32>
    %129 = vector.broadcast %126 : vector<32x1xf32> to vector<32x64xf32>
    %130 = arith.subf %122, %129 : vector<32x64xf32>
    %131 = arith.mulf %128, %130 : vector<32x64xf32>
    %cst_58 = arith.constant dense<0.000000e+00> : vector<32xf32>
    %132 = vector.multi_reduction <add>, %131, %cst_58 [1] : vector<32x64xf32> to vector<32xf32>
    %133 = vector.shape_cast %132 : vector<32xf32> to vector<32x1xf32>
    %cst_59 = arith.constant 6.400000e+01 : f32
    %134 = vector.broadcast %cst_59 : f32 to vector<32x1xf32>
    %135 = arith.divf %133, %134 : vector<32x1xf32>
    %136 = vector.broadcast %126 : vector<32x1xf32> to vector<32x64xf32>
    %137 = arith.subf %122, %136 : vector<32x64xf32>
    %cst_60 = arith.constant 9.99999997E-7 : f32
    %138 = vector.broadcast %cst_60 : f32 to vector<32x1xf32>
    %139 = arith.addf %135, %138 : vector<32x1xf32>
    %140 = math.rsqrt %139 : vector<32x1xf32>
    %141 = vector.broadcast %140 : vector<32x1xf32> to vector<32x64xf32>
    %142 = arith.mulf %137, %141 : vector<32x64xf32>
    %cst_61 = arith.constant 1.000000e+00 : f32
    %143 = vector.broadcast %cst_61 : f32 to vector<32x64xf32>
    %144 = arith.addf %143, %15 : vector<32x64xf32>
    %145 = arith.mulf %142, %144 : vector<32x64xf32>
    %146 = arith.addf %145, %13 : vector<32x64xf32>
    %c0_62 = arith.constant 0 : index
    %c0_63 = arith.constant 0 : index
    %c0_64 = arith.constant 0 : index
    %147 = vector.load %arg9[%c0_62, %c0_63, %c0_64] : memref<2x64x256xf32, #tpu.memory_space<vmem>>, vector<1x64x256xf32>
    %148 = vector.shape_cast %147 : vector<1x64x256xf32> to vector<64x256xf32>
    %cst_65 = arith.constant dense<0.000000e+00> : vector<32x256xf32>
    %149 = tpu.matmul %146, %148, %cst_65 {dimension_numbers = #tpu.dot_dimension_numbers<[1], [0], [0], [1], [0, 0, 1, 1], [], []>} : vector<32x64xf32>, vector<64x256xf32>, vector<32x256xf32> -> vector<32x256xf32>
    %c0_66 = arith.constant 0 : index
    %c0_67 = arith.constant 0 : index
    %c0_68 = arith.constant 0 : index
    %150 = vector.load %arg10[%c0_66, %c0_67, %c0_68] : memref<2x1x256xf32, #tpu.memory_space<vmem>>, vector<1x1x256xf32>
    %151 = vector.shape_cast %150 : vector<1x1x256xf32> to vector<1x256xf32>
    %152 = vector.broadcast %151 : vector<1x256xf32> to vector<32x256xf32>
    %153 = arith.addf %149, %152 : vector<32x256xf32>
    %cst_69 = arith.constant 5.000000e-01 : f32
    %154 = vector.broadcast %cst_69 : f32 to vector<32x256xf32>
    %155 = arith.mulf %154, %153 : vector<32x256xf32>
    %cst_70 = arith.constant 4.471500e-02 : f32
    %156 = vector.broadcast %cst_70 : f32 to vector<32x256xf32>
    %157 = arith.mulf %156, %153 : vector<32x256xf32>
    %158 = arith.mulf %157, %153 : vector<32x256xf32>
    %159 = arith.mulf %158, %153 : vector<32x256xf32>
    %160 = arith.addf %153, %159 : vector<32x256xf32>
    %cst_71 = arith.constant 0.797884583 : f32
    %161 = vector.broadcast %cst_71 : f32 to vector<32x256xf32>
    %162 = arith.mulf %161, %160 : vector<32x256xf32>
    %163 = math.tanh %162 : vector<32x256xf32>
    %cst_72 = arith.constant 1.000000e+00 : f32
    %164 = vector.broadcast %cst_72 : f32 to vector<32x256xf32>
    %165 = arith.addf %164, %163 : vector<32x256xf32>
    %166 = arith.mulf %155, %165 : vector<32x256xf32>
    %c0_73 = arith.constant 0 : index
    %c0_74 = arith.constant 0 : index
    %c0_75 = arith.constant 0 : index
    %167 = vector.load %arg11[%c0_73, %c0_74, %c0_75] : memref<2x256x64xf32, #tpu.memory_space<vmem>>, vector<1x256x64xf32>
    %168 = vector.shape_cast %167 : vector<1x256x64xf32> to vector<256x64xf32>
    %cst_76 = arith.constant dense<0.000000e+00> : vector<32x64xf32>
    %169 = tpu.matmul %166, %168, %cst_76 {dimension_numbers = #tpu.dot_dimension_numbers<[1], [0], [0], [1], [0, 0, 1, 1], [], []>} : vector<32x256xf32>, vector<256x64xf32>, vector<32x64xf32> -> vector<32x64xf32>
    %c0_77 = arith.constant 0 : index
    %c0_78 = arith.constant 0 : index
    %c0_79 = arith.constant 0 : index
    %170 = vector.load %arg12[%c0_77, %c0_78, %c0_79] : memref<2x1x64xf32, #tpu.memory_space<vmem>>, vector<1x1x64xf32>
    %171 = vector.shape_cast %170 : vector<1x1x64xf32> to vector<1x64xf32>
    %172 = vector.broadcast %171 : vector<1x64xf32> to vector<32x64xf32>
    %173 = arith.addf %169, %172 : vector<32x64xf32>
    %174 = arith.mulf %17, %173 : vector<32x64xf32>
    %175 = arith.addf %122, %174 : vector<32x64xf32>
    %c6 = arith.constant 6 : index
    %c0_80 = arith.constant 0 : index
    %c0_81 = arith.constant 0 : index
    %176 = vector.load %arg2[%c6, %c0_80, %c0_81] : memref<14x32x64xf32, #tpu.memory_space<vmem>>, vector<1x32x64xf32>
    %177 = vector.shape_cast %176 : vector<1x32x64xf32> to vector<32x64xf32>
    %c7 = arith.constant 7 : index
    %c0_82 = arith.constant 0 : index
    %c0_83 = arith.constant 0 : index
    %178 = vector.load %arg2[%c7, %c0_82, %c0_83] : memref<14x32x64xf32, #tpu.memory_space<vmem>>, vector<1x32x64xf32>
    %179 = vector.shape_cast %178 : vector<1x32x64xf32> to vector<32x64xf32>
    %c8 = arith.constant 8 : index
    %c0_84 = arith.constant 0 : index
    %c0_85 = arith.constant 0 : index
    %180 = vector.load %arg2[%c8, %c0_84, %c0_85] : memref<14x32x64xf32, #tpu.memory_space<vmem>>, vector<1x32x64xf32>
    %181 = vector.shape_cast %180 : vector<1x32x64xf32> to vector<32x64xf32>
    %c9 = arith.constant 9 : index
    %c0_86 = arith.constant 0 : index
    %c0_87 = arith.constant 0 : index
    %182 = vector.load %arg2[%c9, %c0_86, %c0_87] : memref<14x32x64xf32, #tpu.memory_space<vmem>>, vector<1x32x64xf32>
    %183 = vector.shape_cast %182 : vector<1x32x64xf32> to vector<32x64xf32>
    %c10 = arith.constant 10 : index
    %c0_88 = arith.constant 0 : index
    %c0_89 = arith.constant 0 : index
    %184 = vector.load %arg2[%c10, %c0_88, %c0_89] : memref<14x32x64xf32, #tpu.memory_space<vmem>>, vector<1x32x64xf32>
    %185 = vector.shape_cast %184 : vector<1x32x64xf32> to vector<32x64xf32>
    %c11 = arith.constant 11 : index
    %c0_90 = arith.constant 0 : index
    %c0_91 = arith.constant 0 : index
    %186 = vector.load %arg2[%c11, %c0_90, %c0_91] : memref<14x32x64xf32, #tpu.memory_space<vmem>>, vector<1x32x64xf32>
    %187 = vector.shape_cast %186 : vector<1x32x64xf32> to vector<32x64xf32>
    %cst_92 = arith.constant dense<0.000000e+00> : vector<32xf32>
    %188 = vector.multi_reduction <add>, %175, %cst_92 [1] : vector<32x64xf32> to vector<32xf32>
    %189 = vector.shape_cast %188 : vector<32xf32> to vector<32x1xf32>
    %cst_93 = arith.constant 6.400000e+01 : f32
    %190 = vector.broadcast %cst_93 : f32 to vector<32x1xf32>
    %191 = arith.divf %189, %190 : vector<32x1xf32>
    %192 = vector.broadcast %191 : vector<32x1xf32> to vector<32x64xf32>
    %193 = arith.subf %175, %192 : vector<32x64xf32>
    %194 = vector.broadcast %191 : vector<32x1xf32> to vector<32x64xf32>
    %195 = arith.subf %175, %194 : vector<32x64xf32>
    %196 = arith.mulf %193, %195 : vector<32x64xf32>
    %cst_94 = arith.constant dense<0.000000e+00> : vector<32xf32>
    %197 = vector.multi_reduction <add>, %196, %cst_94 [1] : vector<32x64xf32> to vector<32xf32>
    %198 = vector.shape_cast %197 : vector<32xf32> to vector<32x1xf32>
    %cst_95 = arith.constant 6.400000e+01 : f32
    %199 = vector.broadcast %cst_95 : f32 to vector<32x1xf32>
    %200 = arith.divf %198, %199 : vector<32x1xf32>
    %201 = vector.broadcast %191 : vector<32x1xf32> to vector<32x64xf32>
    %202 = arith.subf %175, %201 : vector<32x64xf32>
    %cst_96 = arith.constant 9.99999997E-7 : f32
    %203 = vector.broadcast %cst_96 : f32 to vector<32x1xf32>
    %204 = arith.addf %200, %203 : vector<32x1xf32>
    %205 = math.rsqrt %204 : vector<32x1xf32>
    %206 = vector.broadcast %205 : vector<32x1xf32> to vector<32x64xf32>
    %207 = arith.mulf %202, %206 : vector<32x64xf32>
    %cst_97 = arith.constant 1.000000e+00 : f32
    %208 = vector.broadcast %cst_97 : f32 to vector<32x64xf32>
    %209 = arith.addf %208, %179 : vector<32x64xf32>
    %210 = arith.mulf %207, %209 : vector<32x64xf32>
    %211 = arith.addf %210, %177 : vector<32x64xf32>
    %c1_98 = arith.constant 1 : index
    %c0_99 = arith.constant 0 : index
    %c0_100 = arith.constant 0 : index
    %212 = vector.load %arg5[%c1_98, %c0_99, %c0_100] : memref<2x64x192xf32, #tpu.memory_space<vmem>>, vector<1x64x192xf32>
    %213 = vector.shape_cast %212 : vector<1x64x192xf32> to vector<64x192xf32>
    %cst_101 = arith.constant dense<0.000000e+00> : vector<32x192xf32>
    %214 = tpu.matmul %211, %213, %cst_101 {dimension_numbers = #tpu.dot_dimension_numbers<[1], [0], [0], [1], [0, 0, 1, 1], [], []>} : vector<32x64xf32>, vector<64x192xf32>, vector<32x192xf32> -> vector<32x192xf32>
    %c1_102 = arith.constant 1 : index
    %c0_103 = arith.constant 0 : index
    %c0_104 = arith.constant 0 : index
    %215 = vector.load %arg6[%c1_102, %c0_103, %c0_104] : memref<2x1x192xf32, #tpu.memory_space<vmem>>, vector<1x1x192xf32>
    %216 = vector.shape_cast %215 : vector<1x1x192xf32> to vector<1x192xf32>
    %217 = vector.broadcast %216 : vector<1x192xf32> to vector<32x192xf32>
    %218 = arith.addf %214, %217 : vector<32x192xf32>
    %219 = vector.extract_strided_slice %218 {offsets = [0, 0], sizes = [32, 16], strides = [1, 1]} : vector<32x192xf32> to vector<32x16xf32>
    %220 = vector.extract_strided_slice %218 {offsets = [0, 64], sizes = [32, 16], strides = [1, 1]} : vector<32x192xf32> to vector<32x16xf32>
    %221 = vector.extract_strided_slice %218 {offsets = [0, 128], sizes = [32, 16], strides = [1, 1]} : vector<32x192xf32> to vector<32x16xf32>
    "tpu.trace_start"() <{level = 10 : i32, message = "qd,kd->qk"}> : () -> ()
    %cst_105 = arith.constant dense<0.000000e+00> : vector<32x32xf32>
    %222 = tpu.matmul %219, %220, %cst_105 {dimension_numbers = #tpu.dot_dimension_numbers<[1], [1], [0], [0], [0, 0, 1, 0], [], []>} : vector<32x16xf32>, vector<32x16xf32>, vector<32x32xf32> -> vector<32x32xf32>
    "tpu.trace_stop"() : () -> ()
    %223 = arith.addf %222, %5 : vector<32x32xf32>
    %cst_106 = arith.constant dense<0xFF800000> : vector<32xf32>
    %224 = vector.multi_reduction <maximumf>, %223, %cst_106 [1] : vector<32x32xf32> to vector<32xf32>
    %225 = vector.shape_cast %224 : vector<32xf32> to vector<32x1xf32>
    %226 = vector.broadcast %225 : vector<32x1xf32> to vector<32x32xf32>
    %227 = arith.subf %223, %226 : vector<32x32xf32>
    %228 = math.exp %227 : vector<32x32xf32>
    %cst_107 = arith.constant dense<0.000000e+00> : vector<32xf32>
    %229 = vector.multi_reduction <add>, %228, %cst_107 [1] : vector<32x32xf32> to vector<32xf32>
    %230 = vector.shape_cast %229 : vector<32xf32> to vector<32x1xf32>
    %231 = tpu.reciprocal %230 {approx = true} : vector<32x1xf32> -> vector<32x1xf32>
    %232 = vector.broadcast %231 : vector<32x1xf32> to vector<32x32xf32>
    %233 = arith.mulf %228, %232 : vector<32x32xf32>
    %cst_108 = arith.constant dense<0.000000e+00> : vector<32x16xf32>
    %234 = tpu.matmul %233, %221, %cst_108 {dimension_numbers = #tpu.dot_dimension_numbers<[1], [0], [0], [1], [0, 0, 1, 1], [], []>} : vector<32x32xf32>, vector<32x16xf32>, vector<32x16xf32> -> vector<32x16xf32>
    %235 = vector.extract_strided_slice %218 {offsets = [0, 16], sizes = [32, 16], strides = [1, 1]} : vector<32x192xf32> to vector<32x16xf32>
    %236 = vector.extract_strided_slice %218 {offsets = [0, 80], sizes = [32, 16], strides = [1, 1]} : vector<32x192xf32> to vector<32x16xf32>
    %237 = vector.extract_strided_slice %218 {offsets = [0, 144], sizes = [32, 16], strides = [1, 1]} : vector<32x192xf32> to vector<32x16xf32>
    "tpu.trace_start"() <{level = 10 : i32, message = "qd,kd->qk"}> : () -> ()
    %cst_109 = arith.constant dense<0.000000e+00> : vector<32x32xf32>
    %238 = tpu.matmul %235, %236, %cst_109 {dimension_numbers = #tpu.dot_dimension_numbers<[1], [1], [0], [0], [0, 0, 1, 0], [], []>} : vector<32x16xf32>, vector<32x16xf32>, vector<32x32xf32> -> vector<32x32xf32>
    "tpu.trace_stop"() : () -> ()
    %239 = arith.addf %238, %5 : vector<32x32xf32>
    %cst_110 = arith.constant dense<0xFF800000> : vector<32xf32>
    %240 = vector.multi_reduction <maximumf>, %239, %cst_110 [1] : vector<32x32xf32> to vector<32xf32>
    %241 = vector.shape_cast %240 : vector<32xf32> to vector<32x1xf32>
    %242 = vector.broadcast %241 : vector<32x1xf32> to vector<32x32xf32>
    %243 = arith.subf %239, %242 : vector<32x32xf32>
    %244 = math.exp %243 : vector<32x32xf32>
    %cst_111 = arith.constant dense<0.000000e+00> : vector<32xf32>
    %245 = vector.multi_reduction <add>, %244, %cst_111 [1] : vector<32x32xf32> to vector<32xf32>
    %246 = vector.shape_cast %245 : vector<32xf32> to vector<32x1xf32>
    %247 = tpu.reciprocal %246 {approx = true} : vector<32x1xf32> -> vector<32x1xf32>
    %248 = vector.broadcast %247 : vector<32x1xf32> to vector<32x32xf32>
    %249 = arith.mulf %244, %248 : vector<32x32xf32>
    %cst_112 = arith.constant dense<0.000000e+00> : vector<32x16xf32>
    %250 = tpu.matmul %249, %237, %cst_112 {dimension_numbers = #tpu.dot_dimension_numbers<[1], [0], [0], [1], [0, 0, 1, 1], [], []>} : vector<32x32xf32>, vector<32x16xf32>, vector<32x16xf32> -> vector<32x16xf32>
    %251 = vector.extract_strided_slice %218 {offsets = [0, 32], sizes = [32, 16], strides = [1, 1]} : vector<32x192xf32> to vector<32x16xf32>
    %252 = vector.extract_strided_slice %218 {offsets = [0, 96], sizes = [32, 16], strides = [1, 1]} : vector<32x192xf32> to vector<32x16xf32>
    %253 = vector.extract_strided_slice %218 {offsets = [0, 160], sizes = [32, 16], strides = [1, 1]} : vector<32x192xf32> to vector<32x16xf32>
    "tpu.trace_start"() <{level = 10 : i32, message = "qd,kd->qk"}> : () -> ()
    %cst_113 = arith.constant dense<0.000000e+00> : vector<32x32xf32>
    %254 = tpu.matmul %251, %252, %cst_113 {dimension_numbers = #tpu.dot_dimension_numbers<[1], [1], [0], [0], [0, 0, 1, 0], [], []>} : vector<32x16xf32>, vector<32x16xf32>, vector<32x32xf32> -> vector<32x32xf32>
    "tpu.trace_stop"() : () -> ()
    %255 = arith.addf %254, %5 : vector<32x32xf32>
    %cst_114 = arith.constant dense<0xFF800000> : vector<32xf32>
    %256 = vector.multi_reduction <maximumf>, %255, %cst_114 [1] : vector<32x32xf32> to vector<32xf32>
    %257 = vector.shape_cast %256 : vector<32xf32> to vector<32x1xf32>
    %258 = vector.broadcast %257 : vector<32x1xf32> to vector<32x32xf32>
    %259 = arith.subf %255, %258 : vector<32x32xf32>
    %260 = math.exp %259 : vector<32x32xf32>
    %cst_115 = arith.constant dense<0.000000e+00> : vector<32xf32>
    %261 = vector.multi_reduction <add>, %260, %cst_115 [1] : vector<32x32xf32> to vector<32xf32>
    %262 = vector.shape_cast %261 : vector<32xf32> to vector<32x1xf32>
    %263 = tpu.reciprocal %262 {approx = true} : vector<32x1xf32> -> vector<32x1xf32>
    %264 = vector.broadcast %263 : vector<32x1xf32> to vector<32x32xf32>
    %265 = arith.mulf %260, %264 : vector<32x32xf32>
    %cst_116 = arith.constant dense<0.000000e+00> : vector<32x16xf32>
    %266 = tpu.matmul %265, %253, %cst_116 {dimension_numbers = #tpu.dot_dimension_numbers<[1], [0], [0], [1], [0, 0, 1, 1], [], []>} : vector<32x32xf32>, vector<32x16xf32>, vector<32x16xf32> -> vector<32x16xf32>
    %267 = vector.extract_strided_slice %218 {offsets = [0, 48], sizes = [32, 16], strides = [1, 1]} : vector<32x192xf32> to vector<32x16xf32>
    %268 = vector.extract_strided_slice %218 {offsets = [0, 112], sizes = [32, 16], strides = [1, 1]} : vector<32x192xf32> to vector<32x16xf32>
    %269 = vector.extract_strided_slice %218 {offsets = [0, 176], sizes = [32, 16], strides = [1, 1]} : vector<32x192xf32> to vector<32x16xf32>
    "tpu.trace_start"() <{level = 10 : i32, message = "qd,kd->qk"}> : () -> ()
    %cst_117 = arith.constant dense<0.000000e+00> : vector<32x32xf32>
    %270 = tpu.matmul %267, %268, %cst_117 {dimension_numbers = #tpu.dot_dimension_numbers<[1], [1], [0], [0], [0, 0, 1, 0], [], []>} : vector<32x16xf32>, vector<32x16xf32>, vector<32x32xf32> -> vector<32x32xf32>
    "tpu.trace_stop"() : () -> ()
    %271 = arith.addf %270, %5 : vector<32x32xf32>
    %cst_118 = arith.constant dense<0xFF800000> : vector<32xf32>
    %272 = vector.multi_reduction <maximumf>, %271, %cst_118 [1] : vector<32x32xf32> to vector<32xf32>
    %273 = vector.shape_cast %272 : vector<32xf32> to vector<32x1xf32>
    %274 = vector.broadcast %273 : vector<32x1xf32> to vector<32x32xf32>
    %275 = arith.subf %271, %274 : vector<32x32xf32>
    %276 = math.exp %275 : vector<32x32xf32>
    %cst_119 = arith.constant dense<0.000000e+00> : vector<32xf32>
    %277 = vector.multi_reduction <add>, %276, %cst_119 [1] : vector<32x32xf32> to vector<32xf32>
    %278 = vector.shape_cast %277 : vector<32xf32> to vector<32x1xf32>
    %279 = tpu.reciprocal %278 {approx = true} : vector<32x1xf32> -> vector<32x1xf32>
    %280 = vector.broadcast %279 : vector<32x1xf32> to vector<32x32xf32>
    %281 = arith.mulf %276, %280 : vector<32x32xf32>
    %cst_120 = arith.constant dense<0.000000e+00> : vector<32x16xf32>
    %282 = tpu.matmul %281, %269, %cst_120 {dimension_numbers = #tpu.dot_dimension_numbers<[1], [0], [0], [1], [0, 0, 1, 1], [], []>} : vector<32x32xf32>, vector<32x16xf32>, vector<32x16xf32> -> vector<32x16xf32>
    %283 = tpu.concatenate %234, %250, %266, %282 in 1 : vector<32x16xf32>, vector<32x16xf32>, vector<32x16xf32>, vector<32x16xf32> -> vector<32x64xf32>
    %c1_121 = arith.constant 1 : index
    %c0_122 = arith.constant 0 : index
    %c0_123 = arith.constant 0 : index
    %284 = vector.load %arg7[%c1_121, %c0_122, %c0_123] : memref<2x64x64xf32, #tpu.memory_space<vmem>>, vector<1x64x64xf32>
    %285 = vector.shape_cast %284 : vector<1x64x64xf32> to vector<64x64xf32>
    %cst_124 = arith.constant dense<0.000000e+00> : vector<32x64xf32>
    %286 = tpu.matmul %283, %285, %cst_124 {dimension_numbers = #tpu.dot_dimension_numbers<[1], [0], [0], [1], [0, 0, 1, 1], [], []>} : vector<32x64xf32>, vector<64x64xf32>, vector<32x64xf32> -> vector<32x64xf32>
    %c1_125 = arith.constant 1 : index
    %c0_126 = arith.constant 0 : index
    %c0_127 = arith.constant 0 : index
    %287 = vector.load %arg8[%c1_125, %c0_126, %c0_127] : memref<2x1x64xf32, #tpu.memory_space<vmem>>, vector<1x1x64xf32>
    %288 = vector.shape_cast %287 : vector<1x1x64xf32> to vector<1x64xf32>
    %289 = vector.broadcast %288 : vector<1x64xf32> to vector<32x64xf32>
    %290 = arith.addf %286, %289 : vector<32x64xf32>
    %291 = arith.mulf %181, %290 : vector<32x64xf32>
    %292 = arith.addf %175, %291 : vector<32x64xf32>
    %cst_128 = arith.constant dense<0.000000e+00> : vector<32xf32>
    %293 = vector.multi_reduction <add>, %292, %cst_128 [1] : vector<32x64xf32> to vector<32xf32>
    %294 = vector.shape_cast %293 : vector<32xf32> to vector<32x1xf32>
    %cst_129 = arith.constant 6.400000e+01 : f32
    %295 = vector.broadcast %cst_129 : f32 to vector<32x1xf32>
    %296 = arith.divf %294, %295 : vector<32x1xf32>
    %297 = vector.broadcast %296 : vector<32x1xf32> to vector<32x64xf32>
    %298 = arith.subf %292, %297 : vector<32x64xf32>
    %299 = vector.broadcast %296 : vector<32x1xf32> to vector<32x64xf32>
    %300 = arith.subf %292, %299 : vector<32x64xf32>
    %301 = arith.mulf %298, %300 : vector<32x64xf32>
    %cst_130 = arith.constant dense<0.000000e+00> : vector<32xf32>
    %302 = vector.multi_reduction <add>, %301, %cst_130 [1] : vector<32x64xf32> to vector<32xf32>
    %303 = vector.shape_cast %302 : vector<32xf32> to vector<32x1xf32>
    %cst_131 = arith.constant 6.400000e+01 : f32
    %304 = vector.broadcast %cst_131 : f32 to vector<32x1xf32>
    %305 = arith.divf %303, %304 : vector<32x1xf32>
    %306 = vector.broadcast %296 : vector<32x1xf32> to vector<32x64xf32>
    %307 = arith.subf %292, %306 : vector<32x64xf32>
    %cst_132 = arith.constant 9.99999997E-7 : f32
    %308 = vector.broadcast %cst_132 : f32 to vector<32x1xf32>
    %309 = arith.addf %305, %308 : vector<32x1xf32>
    %310 = math.rsqrt %309 : vector<32x1xf32>
    %311 = vector.broadcast %310 : vector<32x1xf32> to vector<32x64xf32>
    %312 = arith.mulf %307, %311 : vector<32x64xf32>
    %cst_133 = arith.constant 1.000000e+00 : f32
    %313 = vector.broadcast %cst_133 : f32 to vector<32x64xf32>
    %314 = arith.addf %313, %185 : vector<32x64xf32>
    %315 = arith.mulf %312, %314 : vector<32x64xf32>
    %316 = arith.addf %315, %183 : vector<32x64xf32>
    %c1_134 = arith.constant 1 : index
    %c0_135 = arith.constant 0 : index
    %c0_136 = arith.constant 0 : index
    %317 = vector.load %arg9[%c1_134, %c0_135, %c0_136] : memref<2x64x256xf32, #tpu.memory_space<vmem>>, vector<1x64x256xf32>
    %318 = vector.shape_cast %317 : vector<1x64x256xf32> to vector<64x256xf32>
    %cst_137 = arith.constant dense<0.000000e+00> : vector<32x256xf32>
    %319 = tpu.matmul %316, %318, %cst_137 {dimension_numbers = #tpu.dot_dimension_numbers<[1], [0], [0], [1], [0, 0, 1, 1], [], []>} : vector<32x64xf32>, vector<64x256xf32>, vector<32x256xf32> -> vector<32x256xf32>
    %c1_138 = arith.constant 1 : index
    %c0_139 = arith.constant 0 : index
    %c0_140 = arith.constant 0 : index
    %320 = vector.load %arg10[%c1_138, %c0_139, %c0_140] : memref<2x1x256xf32, #tpu.memory_space<vmem>>, vector<1x1x256xf32>
    %321 = vector.shape_cast %320 : vector<1x1x256xf32> to vector<1x256xf32>
    %322 = vector.broadcast %321 : vector<1x256xf32> to vector<32x256xf32>
    %323 = arith.addf %319, %322 : vector<32x256xf32>
    %cst_141 = arith.constant 5.000000e-01 : f32
    %324 = vector.broadcast %cst_141 : f32 to vector<32x256xf32>
    %325 = arith.mulf %324, %323 : vector<32x256xf32>
    %cst_142 = arith.constant 4.471500e-02 : f32
    %326 = vector.broadcast %cst_142 : f32 to vector<32x256xf32>
    %327 = arith.mulf %326, %323 : vector<32x256xf32>
    %328 = arith.mulf %327, %323 : vector<32x256xf32>
    %329 = arith.mulf %328, %323 : vector<32x256xf32>
    %330 = arith.addf %323, %329 : vector<32x256xf32>
    %cst_143 = arith.constant 0.797884583 : f32
    %331 = vector.broadcast %cst_143 : f32 to vector<32x256xf32>
    %332 = arith.mulf %331, %330 : vector<32x256xf32>
    %333 = math.tanh %332 : vector<32x256xf32>
    %cst_144 = arith.constant 1.000000e+00 : f32
    %334 = vector.broadcast %cst_144 : f32 to vector<32x256xf32>
    %335 = arith.addf %334, %333 : vector<32x256xf32>
    %336 = arith.mulf %325, %335 : vector<32x256xf32>
    %c1_145 = arith.constant 1 : index
    %c0_146 = arith.constant 0 : index
    %c0_147 = arith.constant 0 : index
    %337 = vector.load %arg11[%c1_145, %c0_146, %c0_147] : memref<2x256x64xf32, #tpu.memory_space<vmem>>, vector<1x256x64xf32>
    %338 = vector.shape_cast %337 : vector<1x256x64xf32> to vector<256x64xf32>
    %cst_148 = arith.constant dense<0.000000e+00> : vector<32x64xf32>
    %339 = tpu.matmul %336, %338, %cst_148 {dimension_numbers = #tpu.dot_dimension_numbers<[1], [0], [0], [1], [0, 0, 1, 1], [], []>} : vector<32x256xf32>, vector<256x64xf32>, vector<32x64xf32> -> vector<32x64xf32>
    %c1_149 = arith.constant 1 : index
    %c0_150 = arith.constant 0 : index
    %c0_151 = arith.constant 0 : index
    %340 = vector.load %arg12[%c1_149, %c0_150, %c0_151] : memref<2x1x64xf32, #tpu.memory_space<vmem>>, vector<1x1x64xf32>
    %341 = vector.shape_cast %340 : vector<1x1x64xf32> to vector<1x64xf32>
    %342 = vector.broadcast %341 : vector<1x64xf32> to vector<32x64xf32>
    %343 = arith.addf %339, %342 : vector<32x64xf32>
    %344 = arith.mulf %187, %343 : vector<32x64xf32>
    %345 = arith.addf %292, %344 : vector<32x64xf32>
    %c12 = arith.constant 12 : index
    %c0_152 = arith.constant 0 : index
    %c0_153 = arith.constant 0 : index
    %346 = vector.load %arg2[%c12, %c0_152, %c0_153] : memref<14x32x64xf32, #tpu.memory_space<vmem>>, vector<1x32x64xf32>
    %347 = vector.shape_cast %346 : vector<1x32x64xf32> to vector<32x64xf32>
    %c13 = arith.constant 13 : index
    %c0_154 = arith.constant 0 : index
    %c0_155 = arith.constant 0 : index
    %348 = vector.load %arg2[%c13, %c0_154, %c0_155] : memref<14x32x64xf32, #tpu.memory_space<vmem>>, vector<1x32x64xf32>
    %349 = vector.shape_cast %348 : vector<1x32x64xf32> to vector<32x64xf32>
    %cst_156 = arith.constant dense<0.000000e+00> : vector<32xf32>
    %350 = vector.multi_reduction <add>, %345, %cst_156 [1] : vector<32x64xf32> to vector<32xf32>
    %351 = vector.shape_cast %350 : vector<32xf32> to vector<32x1xf32>
    %cst_157 = arith.constant 6.400000e+01 : f32
    %352 = vector.broadcast %cst_157 : f32 to vector<32x1xf32>
    %353 = arith.divf %351, %352 : vector<32x1xf32>
    %354 = vector.broadcast %353 : vector<32x1xf32> to vector<32x64xf32>
    %355 = arith.subf %345, %354 : vector<32x64xf32>
    %356 = vector.broadcast %353 : vector<32x1xf32> to vector<32x64xf32>
    %357 = arith.subf %345, %356 : vector<32x64xf32>
    %358 = arith.mulf %355, %357 : vector<32x64xf32>
    %cst_158 = arith.constant dense<0.000000e+00> : vector<32xf32>
    %359 = vector.multi_reduction <add>, %358, %cst_158 [1] : vector<32x64xf32> to vector<32xf32>
    %360 = vector.shape_cast %359 : vector<32xf32> to vector<32x1xf32>
    %cst_159 = arith.constant 6.400000e+01 : f32
    %361 = vector.broadcast %cst_159 : f32 to vector<32x1xf32>
    %362 = arith.divf %360, %361 : vector<32x1xf32>
    %363 = vector.broadcast %353 : vector<32x1xf32> to vector<32x64xf32>
    %364 = arith.subf %345, %363 : vector<32x64xf32>
    %cst_160 = arith.constant 9.99999997E-7 : f32
    %365 = vector.broadcast %cst_160 : f32 to vector<32x1xf32>
    %366 = arith.addf %362, %365 : vector<32x1xf32>
    %367 = math.rsqrt %366 : vector<32x1xf32>
    %368 = vector.broadcast %367 : vector<32x1xf32> to vector<32x64xf32>
    %369 = arith.mulf %364, %368 : vector<32x64xf32>
    %cst_161 = arith.constant 1.000000e+00 : f32
    %370 = vector.broadcast %cst_161 : f32 to vector<32x64xf32>
    %371 = arith.addf %370, %349 : vector<32x64xf32>
    %372 = arith.mulf %369, %371 : vector<32x64xf32>
    %373 = arith.addf %372, %347 : vector<32x64xf32>
    %c0_162 = arith.constant 0 : index
    %c0_163 = arith.constant 0 : index
    %374 = vector.load %arg13[%c0_162, %c0_163] : memref<64x64xf32, #tpu.memory_space<vmem>>, vector<64x64xf32>
    %cst_164 = arith.constant dense<0.000000e+00> : vector<32x64xf32>
    %375 = tpu.matmul %373, %374, %cst_164 {dimension_numbers = #tpu.dot_dimension_numbers<[1], [0], [0], [1], [0, 0, 1, 1], [], []>} : vector<32x64xf32>, vector<64x64xf32>, vector<32x64xf32> -> vector<32x64xf32>
    %c0_165 = arith.constant 0 : index
    %c0_166 = arith.constant 0 : index
    %376 = vector.load %arg14[%c0_165, %c0_166] : memref<1x64xf32, #tpu.memory_space<vmem>>, vector<1x64xf32>
    %377 = vector.broadcast %376 : vector<1x64xf32> to vector<32x64xf32>
    %378 = arith.addf %375, %377 : vector<32x64xf32>
    %c0_167 = arith.constant 0 : index
    %c0_168 = arith.constant 0 : index
    %379 = vector.load %arg15[%c0_167, %c0_168] : memref<32x64xf32, #tpu.memory_space<vmem>>, vector<32x64xf32>
    tpu.vector_store %arg15[%c0_167, %c0_168], %378 {strides = array<i32>} : memref<32x64xf32, #tpu.memory_space<vmem>>, vector<32x64xf32>,
    return
  }
}

</mosaic_0001>

<bundles_post_ra>
// kernel: eq.8
= control target key start
LH: loop header
LB: loop body
LE: loop exit
PB: predicated region body
PF: predicated region fallthrough
CT: control target
= control target key end

     0   :  { %vm7_vm0 = vcmask 130048   ;;  %vm13_vm1 = vcmask 261248   ;;  %s39_s0 = inlined_call_operand.vmem [shape: s32[2,16], index: 0, kind: input, shape index: {}]   ;;  %s40_s1 = inlined_call_operand.vmem [shape: s32[32], index: 1, kind: output, shape index: {}]  }
   0x1   :  { %v4_v0 = vld [vmem:[%s39_s0] sm:$0x3]  ;;  %s22_s0 = smov 16  }
   0x2   :  { %5 = vst [vmem:[#allocation1] sm:$0x3] %v4_v0 }
   0x9   :  { %v10_v1 = vld [vmem:[#allocation1 + $0x1] sm:$0x1]   ;;  %v6_v2 = vld [vmem:[#allocation1] sm:$0x1]  }
   0xa   :  { %11 = vrot.lane.b32.xlu0 %v10_v1, %s22_s0  ;;  %8 = vst.msk [vmem:[#allocation0] sm:$0x1] %vm7_vm0, %v6_v2  }
  0x7c   :  { %v12_v3 = vpop.permute.xlu0 %11  }
  0x7d   :  { %14 = vst.msk [vmem:[#allocation0] sm:$0x1] %vm13_vm1, %v12_v3  }
  0x84   :  { %v18_v4 = vld [vmem:[#allocation0] sm:$0x1] }
  0x85   :  { %20 = vst [vmem:[%s40_s1] sm:$0x1] %v18_v4 }

// kernel: dit_forward.1
= control target key start
LH: loop header
LB: loop body
LE: loop exit
PB: predicated region body
PF: predicated region fallthrough
CT: control target
= control target key end

     0   :  { %vm66_vm0 = vcmask 523264   ;;  %vm403_vm1 = vcmask 130048   ;;  %s5651_s30 = smov 64   ;;  %vm505_vm3 = vcmask 261120   ;;  %s5652_s22 = smov 48   ;;  %vm1517_vm4 = vcmask 392192   ;;  %s7398_s4 = inlined_call_operand.vmem [shape: f32[64,64], index: 4, kind: input, shape index: {}]   ;;  %s7399_s0 = inlined_call_operand.vmem [shape: f32[32,64], index: 0, kind: input, shape index: {}]   ;;  %s7400_s1 = inlined_call_operand.vmem [shape: f32[32,64], index: 1, kind: input, shape index: {}]   ;;  %s7401_s5 = inlined_call_operand.vmem [shape: f32[2,64,192], index: 5, kind: input, shape index: {}]   ;;  %s7402_s2 = inlined_call_operand.vmem [shape: f32[14,32,64], index: 2, kind: input, shape index: {}]   ;;  %s7403_s6 = inlined_call_operand.vmem [shape: f32[2,1,192], index: 6, kind: input, shape index: {}]   ;;  %s7404_s3 = inlined_call_operand.vmem [shape: f32[32,32], index: 3, kind: input, shape index: {}]   ;;  %s7405_s7 = inlined_call_operand.vmem [shape: f32[2,64,64], index: 7, kind: input, shape index: {}]   ;;  %s7406_s8 = inlined_call_operand.vmem [shape: f32[2,1,64], index: 8, kind: input, shape index: {}]   ;;  %s7407_s9 = inlined_call_operand.vmem [shape: f32[2,64,256], index: 9, kind: input, shape index: {}]   ;;  %s7408_s11 = inlined_call_operand.vmem [shape: f32[2,256,64], index: 11, kind: input, shape index: {}]   ;;  %s7409_s10 = inlined_call_operand.vmem [shape: f32[2,1,256], index: 10, kind: input, shape index: {}]   ;;  %s7410_s12 = inlined_call_operand.vmem [shape: f32[2,1,64], index: 12, kind: input, shape index: {}]   ;;  %s7411_s13 = inlined_call_operand.vmem [shape: f32[64,64], index: 13, kind: input, shape index: {}]   ;;  %s7412_s14 = inlined_call_operand.vmem [shape: f32[1,64], index: 14, kind: input, shape index: {}]   ;;  %s7413_s15 = inlined_call_operand.vmem [shape: f32[32,64], index: 15, kind: output, shape index: {}]  }
   0x1   :  { %v54_v0 = vld [vmem:[%s7398_s4] sm:$0xff]  ;;  %v55_v1 = vld [vmem:[%s7398_s4 + $0x8] sm:$0xff]  ;;  %v56_v2 = vld [vmem:[%s7398_s4 + $0x10] sm:$0xff]  ;;  %s5653_s23 = smov 112   ;;  %s5654_s24 = smov 32  }
   0x2   :  { %v4946_v3 = vpack.c.bf16 %v55_v1, %v54_v0  ;;  %v57_v4 = vld [vmem:[%s7398_s4 + $0x18] sm:$0xff]  ;;  %v58_v6 = vld [vmem:[%s7398_s4 + $0x20] sm:$0xff]  ;;  %v59_v7 = vld [vmem:[%s7398_s4 + $0x28] sm:$0xff]  ;;  %s5655_s25 = smov 96   ;;  %s5657_s26 = smov 80  }
   0x3   :  { %v4950_v5 = vpack.c.bf16 %v57_v4, %v56_v2  ;;  %v50_v8 = vld [vmem:[%s7399_s0] sm:$0xff]  ;;  %v4954_v9 = vpack.c.bf16 %v59_v7, %v58_v6  ;;  %v60_v10 = vld [vmem:[%s7398_s4 + $0x30] sm:$0xff]  ;;  %v61_v11 = vld [vmem:[%s7398_s4 + $0x38] sm:$0xff]  ;;  %s5656_s4 = smov 16  }
   0x4   :  { %4947 = vmatprep.subr.bf16.mxu0 %v4946_v3  ;;  %4650 = vmatprep.mubr.msk.f32.mxu0 %vm66_vm0, %v50_v8  ;;  %v4958_v12 = vpack.c.bf16 %v61_v11, %v60_v10  ;;  %v51_v13 = vld [vmem:[%s7399_s0 + $0x8] sm:$0xff]  ;;  %v52_v14 = vld [vmem:[%s7399_s0 + $0x10] sm:$0xff]  ;;  %v53_v15 = vld [vmem:[%s7399_s0 + $0x18] sm:$0xff]  ;;  %v5650_v10 = vmov 0.0  }
   0x5   :  { %4949 = vmatpush3.bf16.msra.mxu0 %v4946_v3  ;;  %v62_v16 = vld [vmem:[%s7400_s1] sm:$0xff]  ;;  %v63_v18 = vld [vmem:[%s7400_s1 + $0x8] sm:$0xff]  ;;  %v65_v21 = vld [vmem:[%s7400_s1 + $0x18] sm:$0xff]  ;;  %366 = vmatprep.mubr.f32.mxu1 %v5650_v10 }
   0x6   :  { %4951 = vmatprep.subr.bf16.mxu0 %v4950_v5  ;;  %v64_v22 = vld [vmem:[%s7400_s1 + $0x10] sm:$0xff]  ;;  %v263_v52 = vld [vmem:[%s7401_s5 + $0x8] sm:$0xff]  ;;  %v265_v53 = vld [vmem:[%s7401_s5 + $0x18] sm:$0xff] }
   0x7   :  { %v4962_v54 = vpack.c.bf16 %v265_v53, %v263_v52  ;;  %v262_v55 = vld [vmem:[%s7401_s5] sm:$0xff]  ;;  %v264_v56 = vld [vmem:[%s7401_s5 + $0x10] sm:$0xff]  ;;  %v267_v58 = vld [vmem:[%s7401_s5 + $0x28] sm:$0xff] }
   0x8   :  { %v4964_v57 = vpack.c.bf16 %v264_v56, %v262_v55  ;;  %v269_v59 = vld [vmem:[%s7401_s5 + $0x38] sm:$0xff]  ;;  %v266_v61 = vld [vmem:[%s7401_s5 + $0x20] sm:$0xff]  ;;  %v268_v62 = vld [vmem:[%s7401_s5 + $0x30] sm:$0xff] }
   0x9   :  { %4953 = vmatpush3.bf16.msra.mxu0 %v4950_v5  ;;  %4963 = vmatprep.subr.bf16.mxu1 %v4962_v54  ;;  %v4966_v60 = vpack.c.bf16 %v269_v59, %v267_v58  ;;  %v4968_v63 = vpack.c.bf16 %v268_v62, %v266_v61  ;;  %v271_v0 = vld [vmem:[%s7401_s5 + $0x48] sm:$0xff]  ;;  %v273_v1 = vld [vmem:[%s7401_s5 + $0x58] sm:$0xff]  ;;  %v270_v3 = vld [vmem:[%s7401_s5 + $0x40] sm:$0xff] }
   0xa   :  { %4955 = vmatprep.subr.bf16.mxu0 %v4954_v9  ;;  %4965 = vmatpush1.bf16.msra.mxu1 %v4964_v57  ;;  %v4970_v2 = vpack.c.bf16 %v273_v1, %v271_v0  ;;  %v272_v4 = vld [vmem:[%s7401_s5 + $0x50] sm:$0xff]  ;;  %v275_v5 = vld [vmem:[%s7401_s5 + $0x68] sm:$0xff]  ;;  %v277_v7 = vld [vmem:[%s7401_s5 + $0x78] sm:$0xff]  ;;  %v280_v57 = vlaneseq }
   0xb   :  { %4967 = vmatprep.subr.bf16.mxu1 %v4966_v60  ;;  %v4972_v6 = vpack.c.bf16 %v272_v4, %v270_v3  ;;  %v274_v8 = vld [vmem:[%s7401_s5 + $0x60] sm:$0xff]  ;;  %v4974_v11 = vpack.c.bf16 %v277_v7, %v275_v5  ;;  %v170_v54 = vld [vmem:[%s7402_s2 + $0x10] sm:$0xff]  ;;  %v171_v56 = vld [vmem:[%s7402_s2 + $0x18] sm:$0xff] }
   0xc   :  { %v281_v58 = vshrl.u32 %v280_v57, 7  ;;  %v278_v60 = vld [vmem:[%s7403_s6] sm:$0x3]  ;;  %vm5951_vm2 = vmpackc.low %vm403_vm1, %vm403_vm1 }
   0xd   :  { %4957 = vmatpush3.bf16.msra.mxu0 %v4954_v9  ;;  %v276_v9 = vld [vmem:[%s7401_s5 + $0x70] sm:$0xff] }
   0xe   :  { %4959 = vmatprep.subr.bf16.mxu0 %v4958_v12  ;;  %4969 = vmatpush1.bf16.msra.mxu1 %v4968_v63  ;;  %v5914_v59 = vsub.s32 0, %v281_v58  ;;  %v5920_v62 = vsub.s32 1, %v281_v58 }
   0xf   :  { %4971 = vmatprep.subr.bf16.mxu1 %v4970_v2 }
  0x10   :  { %v283_v61 = vrot.slane %v278_v60, %v5914_v59  ;;  %v287_v2 = vrot.slane %v278_v60, %v5920_v62 }
  0x11   :  { %4961 = vmatpush3.bf16.msra.mxu0 %v4958_v12  ;;  %v4976_v12 = vpack.c.bf16 %v276_v9, %v274_v8 }
  0x12   :  { %4973 = vmatpush1.bf16.msra.mxu1 %v4972_v6 }
  0x13   :  { %4975 = vmatprep.subr.bf16.mxu1 %v4974_v11 }
  0x14   :  { %4651 = vmatmul.mubr.msk.f32.vlgmr.msra.gmra.mrb[0].mxu0 %vm66_vm0, %v51_v13 }
  0x15   :  { %4653 = vmatprep.mubr.msk.f32.mxu0 %vm66_vm0, %v52_v14 }
  0x16   :  { %4977 = vmatpush1.bf16.msra.mxu1 %v4976_v12 }
  0x18   :  { %4654 = vmatmul.mubr.msk.f32.gmra.mrb[2].mxu0 %vm66_vm0, %v53_v15 }
  0xe7   :  { %v4652_v17 = vpop.f32.mrb[0].mxu0 }
  0xe8   :  { %v145_v19 = vpop.f32.mrb[1].mxu0  ;;  %v5792_v23 = vadd.f32 %v4652_v17, %v63_v18 }
  0xe9   :  { %v5784_v20 = vadd.f32 %v145_v19, %v62_v16 }
  0xea   :  { %v200_v30 = vsel %vm66_vm0, %v5792_v23, 0.0 }
  0xeb   :  { %v4655_v24 = vpop.f32.mrb[2].mxu0  ;;  %v197_v25 = vsel %vm66_vm0, %v5784_v20, 0.0 }
  0xec   :  { %v155_v26 = vpop.f32.mrb[3].mxu0  ;;  %198 = vadd.xlane.f32.xlu0 %v197_v25  ;;  %v5796_v27 = vadd.f32 %v4655_v24, %v65_v21 }
  0xed   :  { %v5798_v28 = vadd.f32 %v155_v26, %v64_v22 }
  0xee   :  { %v206_v31 = vsel %vm66_vm0, %v5796_v27, 0.0 }
  0xef   :  { %v203_v29 = vsel %vm66_vm0, %v5798_v28, 0.0 }
  0xf0   :  { %204 = vadd.xlane.f32.xlu1 %v203_v29  ;;  %201 = vadd.xlane.f32.xlu0 %v200_v30  ;;  %v4113_v29 = vld [vmem:[%s7402_s2 + $0x20] sm:$0xff] }
  0xf1   :  { %v250_v30 = vadd.f32 1.0, %v4113_v29 }
  0xf4   :  { %207 = vadd.xlane.f32.xlu1 %v206_v31 }
 0x179   :  { %v199_v32 = vpop.xlane.xlu0 %198 }
 0x17a   :  { %v210_v33 = vmul.f32 0.015625, %v199_v32  ;;  %v4114_v32 = vld [vmem:[%s7402_s2 + $0x28] sm:$0xff] }
 0x17c   :  { %v5807_v34 = vsub.f32 %v5784_v20, %v210_v33 }
 0x17d   :  { %v205_v35 = vpop.xlane.xlu1 %204  ;;  %v202_v36 = vpop.xlane.xlu0 %201 }
 0x17e   :  { %v212_v37 = vmul.f32 0.015625, %v205_v35  ;;  %v211_v38 = vmul.f32 0.015625, %v202_v36  ;;  %v218_v39 = vmul.f32 %v5807_v34, %v5807_v34  ;;  %v168_v35 = vld [vmem:[%s7402_s2] sm:$0xff]  ;;  %v4115_v36 = vld [vmem:[%s7402_s2 + $0x30] sm:$0xff] }
 0x180   :  { %v5812_v40 = vsub.f32 %v5798_v28, %v212_v37  ;;  %v5815_v41 = vsub.f32 %v5792_v23, %v211_v38  ;;  %v222_v42 = vsel %vm66_vm0, %v218_v39, 0.0  ;;  %v251_v38 = vadd.f32 1.0, %v4114_v32 }
 0x181   :  { %v208_v43 = vpop.xlane.xlu1 %207  ;;  %223 = vadd.xlane.f32.xlu0 %v222_v42 }
 0x182   :  { %v213_v44 = vmul.f32 0.015625, %v208_v43  ;;  %v220_v45 = vmul.f32 %v5812_v40, %v5812_v40  ;;  %v219_v46 = vmul.f32 %v5815_v41, %v5815_v41 }
 0x184   :  { %v5823_v47 = vsub.f32 %v5796_v27, %v213_v44  ;;  %v228_v48 = vsel %vm66_vm0, %v220_v45, 0.0  ;;  %v225_v49 = vsel %vm66_vm0, %v219_v46, 0.0  ;;  %v252_v45 = vadd.f32 1.0, %v4115_v36 }
 0x185   :  { %229 = vadd.xlane.f32.xlu0 %v228_v48  ;;  %226 = vadd.xlane.f32.xlu1 %v225_v49  ;;  %v4116_v48 = vld [vmem:[%s7402_s2 + $0x38] sm:$0xff] }
 0x186   :  { %v221_v50 = vmul.f32 %v5823_v47, %v5823_v47  ;;  %v253_v53 = vadd.f32 1.0, %v4116_v48 }
 0x188   :  { %v231_v51 = vsel %vm66_vm0, %v221_v50, 0.0 }
 0x189   :  { %232 = vadd.xlane.f32.xlu1 %v231_v51 }
 0x20e   :  { %v224_v13 = vpop.xlane.xlu0 %223 }
 0x20f   :  { %v234_v14 = vmul.f32 0.015625, %v224_v13 }
 0x211   :  { %v238_v15 = vadd.f32 1e-06, %v234_v14 }
 0x212   :  { %v227_v16 = vpop.xlane.xlu1 %226  ;;  %v230_v17 = vpop.xlane.xlu0 %229 }
 0x213   :  { %5446 = vrsqrt.f32 %v238_v15  ;;  %v235_v18 = vmul.f32 0.015625, %v227_v16  ;;  %v236_v19 = vmul.f32 0.015625, %v230_v17 }
 0x215   :  { %v239_v21 = vadd.f32 1e-06, %v235_v18  ;;  %v240_v22 = vadd.f32 1e-06, %v236_v19 }
 0x216   :  { %v233_v24 = vpop.xlane.xlu1 %232 }
 0x217   :  { %5448 = vrsqrt.f32 %v239_v21  ;;  %v237_v25 = vmul.f32 0.015625, %v233_v24 }
 0x218   :  { %5450 = vrsqrt.f32 %v240_v22 }
 0x219   :  { %v241_v26 = vadd.f32 1e-06, %v237_v25 }
 0x21b   :  { %5452 = vrsqrt.f32 %v241_v26 }
 0x21d   :  { %v5447_v31 = vpop.eup %5446 }
 0x21e   :  { %v246_v33 = vmul.f32 %v5447_v31, %v5807_v34  ;;  %v169_v34 = vld [vmem:[%s7402_s2 + $0x8] sm:$0xff] }
 0x220   :  { %v254_v37 = vmul.f32 %v250_v30, %v246_v33 }
 0x221   :  { %v5449_v39 = vpop.eup %5448 }
 0x222   :  { %v5451_v42 = vpop.eup %5450  ;;  %v258_v43 = vadd.f32 %v254_v37, %v168_v35  ;;  %v247_v44 = vmul.f32 %v5449_v39, %v5815_v41  ;;  %v5972_v37 = vld [vmem:[%s7404_s3 + $0x8] sm:$0xff] }
 0x223   :  { %v248_v46 = vmul.f32 %v5451_v42, %v5812_v40 }
 0x224   :  { %4133 = vmatmul.mubr.msk.f32.vlgmr.msra.gmra.mrb[0].mxu1 %vm66_vm0, %v258_v43  ;;  %v255_v49 = vmul.f32 %v251_v38, %v247_v44  ;;  %v5977_v38 = vld [vmem:[%s7404_s3] sm:$0xff] }
 0x225   :  { %v5453_v50 = vpop.eup %5452  ;;  %372 = vmatprep.mubr.f32.mxu1 %v5650_v10  ;;  %v256_v52 = vmul.f32 %v252_v45, %v248_v46  ;;  %v5984_v45 = vld [vmem:[%s7404_s3 + $0x18] sm:$0xff]  ;;  %v5990_v46 = vld [vmem:[%s7404_s3 + $0x10] sm:$0xff] }
 0x226   :  { %v259_v51 = vadd.f32 %v255_v49, %v169_v34  ;;  %v249_v41 = vmul.f32 %v5453_v50, %v5823_v47 }
 0x227   :  { %v260_v40 = vadd.f32 %v256_v52, %v170_v54 }
 0x228   :  { %4134 = vmatmul.mubr.msk.f32.gmra.mrb[2].mxu1 %vm66_vm0, %v259_v51  ;;  %v257_v55 = vmul.f32 %v253_v53, %v249_v41 }
 0x229   :  { %378 = vmatprep.mubr.f32.mxu1 %v5650_v10 }
 0x22a   :  { %v261_v47 = vadd.f32 %v257_v55, %v171_v56 }
 0x22c   :  { %4135 = vmatmul.mubr.msk.f32.gmra.mrb[4].mxu1 %vm66_vm0, %v260_v40 }
 0x22d   :  { %384 = vmatprep.mubr.f32.mxu1 %v5650_v10 }
 0x230   :  { %4136 = vmatmul.mubr.msk.f32.gmra.mrb[6].mxu1 %vm66_vm0, %v261_v47 }
 0x2f7   :  { %v368_v63 = vpop.f32.mrb[0].mxu1 }
 0x2f8   :  { %v5922_v0 = vadd.f32 %v368_v63, %v283_v61  ;;  %v370_v1 = vpop.f32.mrb[1].mxu1 }
 0x2f9   :  { %v371_v6 = vadd.f32 %v370_v1, %v287_v2 }
 0x2fa   :  { %4664 = vmatprep.mubr.msk.f32.mxu0 %vm403_vm1, %v5922_v0 }
 0x2fb   :  { %v374_v3 = vpop.f32.mrb[2].mxu1 }
 0x2fc   :  { %v5927_v4 = vadd.f32 %v374_v3, %v283_v61  ;;  %v376_v5 = vpop.f32.mrb[3].mxu1 }
 0x2fd   :  { %v377_v7 = vadd.f32 %v376_v5, %v287_v2 }
 0x2fe   :  { %v5931_v8 = vpack.i.bf16 %v5927_v4, %v5922_v0 }
 0x2ff   :  { %v380_v9 = vpop.f32.mrb[4].mxu1  ;;  %v4990_v11 = vpack.c.bf16 %v377_v7, %v371_v6  ;;  %v5933_v12 = vpack.i.bf16 %v377_v7, %v371_v6 }
 0x300   :  { %5307 = vrot.lane.b32.xlu0 %v5931_v8, %s5651_s30  ;;  %v382_v13 = vpop.f32.mrb[5].mxu1  ;;  %v5937_v15 = vadd.f32 %v380_v9, %v283_v61 }
 0x301   :  { %v383_v18 = vadd.f32 %v382_v13, %v287_v2 }
 0x303   :  { %v386_v14 = vpop.f32.mrb[6].mxu1 }
 0x304   :  { %v5939_v16 = vadd.f32 %v386_v14, %v283_v61  ;;  %v388_v17 = vpop.f32.mrb[7].mxu1 }
 0x305   :  { %v389_v19 = vadd.f32 %v388_v17, %v287_v2 }
 0x306   :  { %v5943_v21 = vpack.i.bf16 %v5939_v16, %v5937_v15 }
 0x307   :  { %v4994_v22 = vpack.c.bf16 %v389_v19, %v383_v18  ;;  %v5945_v24 = vpack.i.bf16 %v389_v19, %v383_v18 }
 0x308   :  { %5312 = vrot.lane.b32.xlu1 %v5943_v21, %s5651_s30 }
 0x372   :  { %v5308_v25 = vpop.permute.xlu0 %5307 }
 0x373   :  { %v5310_v26 = vunpack.i.h.bf16 %v5308_v25  ;;  %v5309_v29 = vunpack.i.l.bf16 %v5308_v25 }
 0x375   :  { %v4978_v31 = vpack.c.bf16 %v5310_v26, %v5309_v29 }
 0x377   :  { %4980 = vmatprep.subr.msk.bf16.mxu0 %vm5951_vm2, %v4978_v31 }
 0x378   :  { %4983 = vmatpush3.bf16.xpose.msk.msra.mxu0 %vm5951_vm2, %v4978_v31 }
 0x37a   :  { %v5313_v32 = vpop.permute.xlu1 %5312 }
 0x37b   :  { %v5315_v33 = vunpack.i.h.bf16 %v5313_v32  ;;  %v5314_v35 = vunpack.i.l.bf16 %v5313_v32 }
 0x37d   :  { %v4984_v36 = vpack.c.bf16 %v5315_v33, %v5314_v35 }
 0x37f   :  { %4986 = vmatprep.subr.msk.bf16.mxu0 %vm5951_vm2, %v4984_v36 }
 0x380   :  { %4989 = vmatpush3.bf16.xpose.msk.msra.mxu0 %vm5951_vm2, %v4984_v36 }
 0x381   :  { %4991 = vmatprep.subr.bf16.mxu0 %v4990_v11 }
 0x387   :  { %4665 = vmatmul.mubr.msk.f32.vlgmr.msra.gmra.mrb[4].mxu0 %vm403_vm1, %v5927_v4 }
 0x388   :  { %4667 = vmatprep.mubr.msk.f32.mxu0 %vm403_vm1, %v5937_v15  ;;  %4993 = vmatpush3.bf16.msra.mxu0 %v4990_v11 }
 0x389   :  { %4995 = vmatprep.subr.bf16.mxu0 %v4994_v22 }
 0x38b   :  { %4668 = vmatmul.mubr.msk.f32.gmra.mrb[6].mxu0 %vm403_vm1, %v5939_v16 }
 0x38c   :  { %4997 = vmatpush3.bf16.msra.mxu0 %v4994_v22 }
 0x45a   :  { %v4666_v39 = vpop.f32.mrb[4].mxu0 }
 0x45b   :  { %v492_v42 = vadd.f32 %v4666_v39, %v5972_v37  ;;  %v486_v43 = vpop.f32.mrb[5].mxu0 }
 0x45c   :  { %v487_v44 = vadd.f32 %v486_v43, %v5977_v38 }
 0x45d   :  { %v509_v34 = vsel %vm505_vm3, %v492_v42, -inf }
 0x45e   :  { %510 = vmax.xlane.f32.xlu0 %v509_v34  ;;  %v4669_v48 = vpop.f32.mrb[6].mxu0  ;;  %v506_v49 = vsel %vm505_vm3, %v487_v44, -inf }
 0x45f   :  { %v502_v50 = vadd.f32 %v4669_v48, %v5984_v45  ;;  %v496_v51 = vpop.f32.mrb[7].mxu0  ;;  %507 = vmax.xlane.f32.xlu1 %v506_v49 }
 0x460   :  { %v497_v52 = vadd.f32 %v496_v51, %v5990_v46 }
 0x461   :  { %v515_v41 = vsel %vm505_vm3, %v502_v50, -inf }
 0x462   :  { %v512_v53 = vsel %vm505_vm3, %v497_v52, -inf }
 0x463   :  { %513 = vmax.xlane.f32.xlu0 %v512_v53  ;;  %516 = vmax.xlane.f32.xlu1 %v515_v41 }
 0x4eb   :  { %v511_v54 = vpop.xlane.xlu0 %510 }
 0x4ec   :  { %v519_v40 = vsub.f32 %v492_v42, %v511_v54  ;;  %v508_v55 = vpop.xlane.xlu1 %507 }
 0x4ed   :  { %v518_v56 = vsub.f32 %v487_v44, %v508_v55 }
 0x4ee   :  { %v524_v47 = vmul.f32 1.442695, %v519_v40 }
 0x4ef   :  { %v522_v57 = vmul.f32 1.442695, %v518_v56 }
 0x4f0   :  { %5454 = vpow2.f32 %v524_v47  ;;  %v514_v58 = vpop.xlane.xlu0 %513  ;;  %v517_v60 = vpop.xlane.xlu1 %516 }
 0x4f1   :  { %5456 = vpow2.f32 %v522_v57  ;;  %v520_v61 = vsub.f32 %v497_v52, %v514_v58  ;;  %v521_v63 = vsub.f32 %v502_v50, %v517_v60 }
 0x4f3   :  { %v526_v1 = vmul.f32 1.442695, %v520_v61  ;;  %v528_v2 = vmul.f32 1.442695, %v521_v63 }
 0x4f5   :  { %5458 = vpow2.f32 %v526_v1 }
 0x4f6   :  { %5460 = vpow2.f32 %v528_v2 }
 0x4fa   :  { %v5455_v3 = vpop.eup %5454 }
 0x4fb   :  { %v5457_v5 = vpop.eup %5456  ;;  %v533_v6 = vsel %vm505_vm3, %v5455_v3, 0.0 }
 0x4fc   :  { %534 = vadd.xlane.f32.xlu1 %v533_v6  ;;  %v530_v7 = vsel %vm505_vm3, %v5457_v5, 0.0 }
 0x4fd   :  { %531 = vadd.xlane.f32.xlu0 %v530_v7 }
 0x4ff   :  { %v5459_v9 = vpop.eup %5458 }
 0x500   :  { %v5461_v11 = vpop.eup %5460  ;;  %v536_v13 = vsel %vm505_vm3, %v5459_v9, 0.0 }
 0x501   :  { %537 = vadd.xlane.f32.xlu0 %v536_v13  ;;  %v539_v14 = vsel %vm505_vm3, %v5461_v11, 0.0 }
 0x502   :  { %540 = vadd.xlane.f32.xlu1 %v539_v14 }
 0x513   :  { %5322 = vrot.lane.b32.xlu1 %v5943_v21, %s5652_s22 }
 0x517   :  { %647 = vrot.lane.b32.xlu1 %v5922_v0, %s5653_s23  ;;  %5317 = vrot.lane.b32.xlu0 %v5931_v8, %s5652_s22 }
 0x51b   :  { %649 = vrot.lane.b32.xlu1 %v5927_v4, %s5653_s23  ;;  %651 = vrot.lane.b32.xlu0 %v5937_v15, %s5653_s23 }
 0x51f   :  { %653 = vrot.lane.b32.xlu1 %v5939_v16, %s5653_s23 }
 0x589   :  { %v535_v17 = vpop.xlane.xlu1 %534 }
 0x58a   :  { %5462 = vrcp.f32 %v535_v17  ;;  %v532_v18 = vpop.xlane.xlu0 %531 }
 0x58b   :  { %5464 = vrcp.f32 %v532_v18 }
 0x58e   :  { %v538_v19 = vpop.xlane.xlu0 %537 }
 0x58f   :  { %5466 = vrcp.f32 %v538_v19  ;;  %v541_v22 = vpop.xlane.xlu1 %540 }
 0x590   :  { %5468 = vrcp.f32 %v541_v22 }
 0x592   :  { %v5318_v25 = vpop.permute.xlu0 %5317 }
 0x593   :  { %v5320_v26 = vunpack.i.h.bf16 %v5318_v25  ;;  %v5319_v29 = vunpack.i.l.bf16 %v5318_v25  ;;  %v5323_v31 = vpop.permute.xlu1 %5322 }
 0x594   :  { %v5463_v32 = vpop.eup %5462  ;;  %v5325_v36 = vunpack.i.h.bf16 %v5323_v31  ;;  %v5324_v39 = vunpack.i.l.bf16 %v5323_v31 }
 0x595   :  { %v5465_v33 = vpop.eup %5464  ;;  %v4998_v35 = vpack.c.bf16 %v5320_v26, %v5319_v29  ;;  %v547_v43 = vmul.f32 %v5463_v32, %v5455_v3 }
 0x596   :  { %v546_v42 = vmul.f32 %v5465_v33, %v5457_v5  ;;  %v5004_v34 = vpack.c.bf16 %v5325_v36, %v5324_v39  ;;  %v652_v41 = vpop.permute.xlu0 %651 }
 0x597   :  { %5000 = vmatprep.subr.msk.bf16.mxu0 %vm5951_vm2, %v4998_v35  ;;  %v648_v51 = vpop.permute.xlu1 %647 }
 0x598   :  { %4678 = vmatprep.mubr.msk.f32.mxu0 %vm505_vm3, %v546_v42 }
 0x599   :  { %v5467_v44 = vpop.eup %5466  ;;  %4679 = vmatmul.mubr.msk.f32.vlgmr.msra.gmra.mrb[8].mxu0 %vm505_vm3, %v547_v43 }
 0x59a   :  { %v5469_v48 = vpop.eup %5468  ;;  %5003 = vmatpush3.bf16.xpose.msk.msra.mxu0 %vm5951_vm2, %v4998_v35  ;;  %v548_v49 = vmul.f32 %v5467_v44, %v5459_v9 }
 0x59b   :  { %5006 = vmatprep.subr.msk.bf16.mxu0 %vm5951_vm2, %v5004_v34  ;;  %v549_v50 = vmul.f32 %v5469_v48, %v5461_v11  ;;  %v650_v52 = vpop.permute.xlu1 %649 }
 0x59c   :  { %4681 = vmatprep.mubr.msk.f32.mxu0 %vm505_vm3, %v548_v49 }
 0x59d   :  { %4682 = vmatmul.mubr.msk.f32.gmra.mrb[10].mxu0 %vm505_vm3, %v549_v50 }
 0x59e   :  { %4692 = vmatprep.mubr.msk.f32.mxu0 %vm403_vm1, %v648_v51 }
 0x59f   :  { %v654_v53 = vpop.permute.xlu1 %653 }
 0x5a2   :  { %5009 = vmatpush3.bf16.xpose.msk.msra.mxu0 %vm5951_vm2, %v5004_v34 }
 0x5a9   :  { %4693 = vmatmul.mubr.msk.f32.vlgmr.msra.gmra.mrb[12].mxu0 %vm403_vm1, %v650_v52 }
 0x5aa   :  { %4695 = vmatprep.mubr.msk.f32.mxu0 %vm403_vm1, %v652_v41 }
 0x5ad   :  { %4696 = vmatmul.mubr.msk.f32.gmra.mrb[14].mxu0 %vm403_vm1, %v654_v53 }
 0x66c   :  { %v6029_v54 = vpop.f32.mrb[8].mxu0 }
 0x66d   :  { %v6031_v40 = vpop.f32.mrb[9].mxu0 }
 0x670   :  { %v6033_v55 = vpop.f32.mrb[10].mxu0 }
 0x671   :  { %v6035_v56 = vpop.f32.mrb[11].mxu0 }
 0x67c   :  { %v4694_v47 = vpop.f32.mrb[12].mxu0 }
 0x67d   :  { %v751_v57 = vadd.f32 %v4694_v47, %v5972_v37  ;;  %v745_v58 = vpop.f32.mrb[13].mxu0 }
 0x67e   :  { %v746_v60 = vadd.f32 %v745_v58, %v5977_v38 }
 0x67f   :  { %v767_v61 = vsel %vm505_vm3, %v751_v57, -inf }
 0x680   :  { %768 = vmax.xlane.f32.xlu1 %v767_v61  ;;  %v4697_v63 = vpop.f32.mrb[14].mxu0  ;;  %v764_v1 = vsel %vm505_vm3, %v746_v60, -inf }
 0x681   :  { %v755_v2 = vpop.f32.mrb[15].mxu0  ;;  %765 = vmax.xlane.f32.xlu0 %v764_v1  ;;  %v761_v5 = vadd.f32 %v4697_v63, %v5984_v45 }
 0x682   :  { %v756_v3 = vadd.f32 %v755_v2, %v5990_v46 }
 0x683   :  { %v773_v7 = vsel %vm505_vm3, %v761_v5, -inf }
 0x684   :  { %v770_v6 = vsel %vm505_vm3, %v756_v3, -inf }
 0x685   :  { %771 = vmax.xlane.f32.xlu0 %v770_v6 }
 0x689   :  { %774 = vmax.xlane.f32.xlu0 %v773_v7 }
 0x70d   :  { %v769_v9 = vpop.xlane.xlu1 %768 }
 0x70e   :  { %v777_v11 = vsub.f32 %v751_v57, %v769_v9  ;;  %v766_v13 = vpop.xlane.xlu0 %765 }
 0x70f   :  { %v776_v14 = vsub.f32 %v746_v60, %v766_v13 }
 0x710   :  { %v782_v17 = vmul.f32 1.442695, %v777_v11 }
 0x711   :  { %v780_v18 = vmul.f32 1.442695, %v776_v14 }
 0x712   :  { %5470 = vpow2.f32 %v782_v17  ;;  %v772_v29 = vpop.xlane.xlu0 %771 }
 0x713   :  { %5472 = vpow2.f32 %v780_v18  ;;  %v778_v31 = vsub.f32 %v756_v3, %v772_v29 }
 0x715   :  { %v784_v32 = vmul.f32 1.442695, %v778_v31 }
 0x716   :  { %v775_v33 = vpop.xlane.xlu0 %774 }
 0x717   :  { %v779_v35 = vsub.f32 %v761_v5, %v775_v33  ;;  %5474 = vpow2.f32 %v784_v32 }
 0x719   :  { %v786_v36 = vmul.f32 1.442695, %v779_v35 }
 0x71b   :  { %5476 = vpow2.f32 %v786_v36 }
 0x71c   :  { %v5471_v19 = vpop.eup %5470 }
 0x71d   :  { %v5473_v22 = vpop.eup %5472  ;;  %v791_v25 = vsel %vm505_vm3, %v5471_v19, 0.0 }
 0x71e   :  { %792 = vadd.xlane.f32.xlu1 %v791_v25  ;;  %v788_v26 = vsel %vm505_vm3, %v5473_v22, 0.0 }
 0x71f   :  { %789 = vadd.xlane.f32.xlu0 %v788_v26 }
 0x721   :  { %v5475_v39 = vpop.eup %5474 }
 0x722   :  { %v794_v42 = vsel %vm505_vm3, %v5475_v39, 0.0 }
 0x725   :  { %v5477_v43 = vpop.eup %5476 }
 0x726   :  { %v797_v44 = vsel %vm505_vm3, %v5477_v43, 0.0 }
 0x72f   :  { %5332 = vrot.lane.b32.xlu1 %v5945_v24, %s5653_s23 }
 0x733   :  { %5337 = vrot.lane.b32.xlu1 %v5931_v8, %s5654_s24 }
 0x735   :  { %5327 = vrot.lane.b32.xlu0 %v5933_v12, %s5653_s23 }
 0x737   :  { %5342 = vrot.lane.b32.xlu1 %v5943_v21, %s5654_s24 }
 0x754   :  { %795 = vadd.xlane.f32.xlu0 %v794_v42 }
 0x75b   :  { %798 = vadd.xlane.f32.xlu1 %v797_v44 }
 0x76a   :  { %921 = vrot.lane.b32.xlu0 %v5922_v0, %s5655_s25 }
 0x76c   :  { %923 = vrot.lane.b32.xlu1 %v5927_v4, %s5655_s25 }
 0x76e   :  { %925 = vrot.lane.b32.xlu0 %v5937_v15, %s5655_s25 }
 0x770   :  { %927 = vrot.lane.b32.xlu1 %v5939_v16, %s5655_s25 }
 0x7ab   :  { %v793_v34 = vpop.xlane.xlu1 %792 }
 0x7ac   :  { %v790_v48 = vpop.xlane.xlu0 %789 }
 0x7ad   :  { %5478 = vrcp.f32 %v790_v48 }
 0x7ae   :  { %5480 = vrcp.f32 %v793_v34 }
 0x7af   :  { %v5333_v49 = vpop.permute.xlu1 %5332 }
 0x7b0   :  { %v5328_v50 = vpop.permute.xlu0 %5327  ;;  %v5335_v51 = vunpack.i.h.bf16 %v5333_v49  ;;  %v5334_v52 = vunpack.i.l.bf16 %v5333_v49 }
 0x7b1   :  { %v5330_v41 = vunpack.i.h.bf16 %v5328_v50  ;;  %v5329_v53 = vunpack.i.l.bf16 %v5328_v50 }
 0x7b2   :  { %v5014_v61 = vpack.c.bf16 %v5335_v51, %v5334_v52 }
 0x7b3   :  { %v5338_v47 = vpop.permute.xlu1 %5337  ;;  %v5010_v57 = vpack.c.bf16 %v5330_v41, %v5329_v53 }
 0x7b4   :  { %v5340_v58 = vunpack.i.h.bf16 %v5338_v47  ;;  %v5339_v60 = vunpack.i.l.bf16 %v5338_v47 }
 0x7b5   :  { %5011 = vmatprep.subr.bf16.mxu1 %v5010_v57 }
 0x7b6   :  { %5013 = vmatpush3.bf16.msra.mxu1 %v5010_v57  ;;  %v5018_v3 = vpack.c.bf16 %v5340_v58, %v5339_v60 }
 0x7b7   :  { %v5479_v63 = vpop.eup %5478  ;;  %5015 = vmatprep.subr.bf16.mxu1 %v5014_v61  ;;  %v5343_v6 = vpop.permute.xlu1 %5342 }
 0x7b8   :  { %v5481_v1 = vpop.eup %5480  ;;  %v804_v2 = vmul.f32 %v5479_v63, %v5473_v22  ;;  %v5345_v7 = vunpack.i.h.bf16 %v5343_v6  ;;  %v5344_v9 = vunpack.i.l.bf16 %v5343_v6 }
 0x7b9   :  { %v805_v5 = vmul.f32 %v5481_v1, %v5471_v19 }
 0x7ba   :  { %5017 = vmatpush3.bf16.msra.mxu1 %v5014_v61  ;;  %4706 = vmatprep.mubr.msk.f32.mxu1 %vm505_vm3, %v804_v2  ;;  %v5024_v11 = vpack.c.bf16 %v5345_v7, %v5344_v9 }
 0x7bb   :  { %5020 = vmatprep.subr.msk.bf16.mxu1 %vm5951_vm2, %v5018_v3 }
 0x7bd   :  { %4707 = vmatmul.mubr.msk.f32.vlgmr.msra.gmra.mrb[8].mxu1 %vm505_vm3, %v805_v5 }
 0x7c3   :  { %5023 = vmatpush3.bf16.xpose.msk.msra.mxu1 %vm5951_vm2, %v5018_v3 }
 0x7c4   :  { %5026 = vmatprep.subr.msk.bf16.mxu1 %vm5951_vm2, %v5024_v11 }
 0x7cb   :  { %5029 = vmatpush3.bf16.xpose.msk.msra.mxu1 %vm5951_vm2, %v5024_v11 }
 0x7e1   :  { %v796_v13 = vpop.xlane.xlu0 %795 }
 0x7e2   :  { %5482 = vrcp.f32 %v796_v13 }
 0x7e5   :  { %v922_v22 = vpop.permute.xlu0 %921 }
 0x7e8   :  { %v799_v14 = vpop.xlane.xlu1 %798 }
 0x7e9   :  { %5484 = vrcp.f32 %v799_v14  ;;  %v926_v29 = vpop.permute.xlu0 %925 }
 0x7ec   :  { %v5483_v17 = vpop.eup %5482  ;;  %v924_v26 = vpop.permute.xlu1 %923 }
 0x7ed   :  { %v806_v18 = vmul.f32 %v5483_v17, %v5475_v39 }
 0x7ef   :  { %4709 = vmatprep.mubr.msk.f32.mxu1 %vm505_vm3, %v806_v18 }
 0x7f0   :  { %v928_v31 = vpop.permute.xlu1 %927 }
 0x7f3   :  { %v5485_v19 = vpop.eup %5484 }
 0x7f4   :  { %v807_v25 = vmul.f32 %v5485_v19, %v5477_v43 }
 0x7f6   :  { %4710 = vmatmul.mubr.msk.f32.gmra.mrb[10].mxu1 %vm505_vm3, %v807_v25 }
 0x7f7   :  { %4720 = vmatprep.mubr.msk.f32.mxu1 %vm403_vm1, %v922_v22 }
 0x7fa   :  { %4721 = vmatmul.mubr.msk.f32.vlgmr.msra.gmra.mrb[12].mxu1 %vm403_vm1, %v924_v26 }
 0x7fb   :  { %4723 = vmatprep.mubr.msk.f32.mxu1 %vm403_vm1, %v926_v29 }
 0x7fe   :  { %4724 = vmatmul.mubr.msk.f32.gmra.mrb[14].mxu1 %vm403_vm1, %v928_v31 }
 0x890   :  { %v6081_v32 = vpop.f32.mrb[8].mxu1 }
 0x891   :  { %v6083_v33 = vpop.f32.mrb[9].mxu1 }
 0x8c9   :  { %v6085_v35 = vpop.f32.mrb[10].mxu1 }
 0x8ca   :  { %v6087_v36 = vpop.f32.mrb[11].mxu1 }
 0x8cd   :  { %v4722_v39 = vpop.f32.mrb[12].mxu1 }
 0x8ce   :  { %v1025_v42 = vadd.f32 %v4722_v39, %v5972_v37  ;;  %v1019_v43 = vpop.f32.mrb[13].mxu1 }
 0x8cf   :  { %v1020_v44 = vadd.f32 %v1019_v43, %v5977_v38 }
 0x8d0   :  { %v1041_v34 = vsel %vm505_vm3, %v1025_v42, -inf }
 0x8d1   :  { %1042 = vmax.xlane.f32.xlu1 %v1041_v34  ;;  %v4725_v48 = vpop.f32.mrb[14].mxu1  ;;  %v1038_v49 = vsel %vm505_vm3, %v1020_v44, -inf }
 0x8d2   :  { %v1029_v50 = vpop.f32.mrb[15].mxu1  ;;  %1039 = vmax.xlane.f32.xlu0 %v1038_v49  ;;  %v1035_v52 = vadd.f32 %v4725_v48, %v5984_v45 }
 0x8d3   :  { %v1030_v51 = vadd.f32 %v1029_v50, %v5990_v46 }
 0x8d4   :  { %v1047_v53 = vsel %vm505_vm3, %v1035_v52, -inf }
 0x8d5   :  { %v1044_v41 = vsel %vm505_vm3, %v1030_v51, -inf }
 0x8d6   :  { %1045 = vmax.xlane.f32.xlu0 %v1044_v41 }
 0x8da   :  { %1048 = vmax.xlane.f32.xlu0 %v1047_v53 }
 0x95e   :  { %v1043_v47 = vpop.xlane.xlu1 %1042 }
 0x95f   :  { %v1051_v57 = vsub.f32 %v1025_v42, %v1043_v47  ;;  %v1040_v58 = vpop.xlane.xlu0 %1039 }
 0x960   :  { %v1050_v60 = vsub.f32 %v1020_v44, %v1040_v58 }
 0x961   :  { %v1056_v61 = vmul.f32 1.442695, %v1051_v57 }
 0x962   :  { %v1054_v63 = vmul.f32 1.442695, %v1050_v60 }
 0x963   :  { %5486 = vpow2.f32 %v1056_v61  ;;  %v1046_v6 = vpop.xlane.xlu0 %1045 }
 0x964   :  { %5488 = vpow2.f32 %v1054_v63  ;;  %v1052_v7 = vsub.f32 %v1030_v51, %v1046_v6 }
 0x966   :  { %v1058_v9 = vmul.f32 1.442695, %v1052_v7 }
 0x967   :  { %v1049_v11 = vpop.xlane.xlu0 %1048 }
 0x968   :  { %v1053_v13 = vsub.f32 %v1035_v52, %v1049_v11  ;;  %5490 = vpow2.f32 %v1058_v9 }
 0x96a   :  { %v1060_v14 = vmul.f32 1.442695, %v1053_v13 }
 0x96c   :  { %5492 = vpow2.f32 %v1060_v14 }
 0x96d   :  { %v5487_v1 = vpop.eup %5486 }
 0x96e   :  { %v5489_v2 = vpop.eup %5488  ;;  %v1065_v3 = vsel %vm505_vm3, %v5487_v1, 0.0 }
 0x96f   :  { %1066 = vadd.xlane.f32.xlu1 %v1065_v3  ;;  %v1062_v5 = vsel %vm505_vm3, %v5489_v2, 0.0 }
 0x970   :  { %1063 = vadd.xlane.f32.xlu0 %v1062_v5 }
 0x972   :  { %v5491_v17 = vpop.eup %5490 }
 0x973   :  { %v1068_v18 = vsel %vm505_vm3, %v5491_v17, 0.0 }
 0x976   :  { %v5493_v19 = vpop.eup %5492 }
 0x980   :  { %5352 = vrot.lane.b32.xlu1 %v5945_v24, %s5655_s25 }
 0x984   :  { %5357 = vrot.lane.b32.xlu1 %v5931_v8, %s5656_s4  ;;  %v1071_v8 = vsel %vm505_vm3, %v5493_v19, 0.0 }
 0x986   :  { %5347 = vrot.lane.b32.xlu0 %v5933_v12, %s5655_s25 }
 0x988   :  { %5362 = vrot.lane.b32.xlu1 %v5943_v21, %s5656_s4 }
 0x9a5   :  { %1069 = vadd.xlane.f32.xlu0 %v1068_v18 }
 0x9ac   :  { %1072 = vadd.xlane.f32.xlu1 %v1071_v8 }
 0x9bb   :  { %1191 = vrot.lane.b32.xlu0 %v5922_v0, %s5657_s26 }
 0x9bd   :  { %1193 = vrot.lane.b32.xlu1 %v5927_v4, %s5657_s26 }
 0x9bf   :  { %1195 = vrot.lane.b32.xlu0 %v5937_v15, %s5657_s26 }
 0x9c1   :  { %1197 = vrot.lane.b32.xlu1 %v5939_v16, %s5657_s26 }
 0x9fc   :  { %v1067_v21 = vpop.xlane.xlu1 %1066 }
 0x9fd   :  { %v1064_v22 = vpop.xlane.xlu0 %1063 }
 0x9fe   :  { %5494 = vrcp.f32 %v1064_v22 }
 0x9ff   :  { %5496 = vrcp.f32 %v1067_v21 }
 0xa00   :  { %v5353_v25 = vpop.permute.xlu1 %5352 }
 0xa01   :  { %v5348_v26 = vpop.permute.xlu0 %5347  ;;  %v5355_v29 = vunpack.i.h.bf16 %v5353_v25  ;;  %v5354_v31 = vunpack.i.l.bf16 %v5353_v25 }
 0xa02   :  { %v5350_v39 = vunpack.i.h.bf16 %v5348_v26  ;;  %v5349_v42 = vunpack.i.l.bf16 %v5348_v26 }
 0xa03   :  { %v5034_v34 = vpack.c.bf16 %v5355_v29, %v5354_v31 }
 0xa04   :  { %v5358_v0 = vpop.permute.xlu1 %5357  ;;  %v5030_v43 = vpack.c.bf16 %v5350_v39, %v5349_v42 }
 0xa05   :  { %v5360_v44 = vunpack.i.h.bf16 %v5358_v0  ;;  %v5359_v4 = vunpack.i.l.bf16 %v5358_v0 }
 0xa06   :  { %5031 = vmatprep.subr.bf16.mxu0 %v5030_v43 }
 0xa07   :  { %5033 = vmatpush3.bf16.msra.mxu0 %v5030_v43  ;;  %v5038_v49 = vpack.c.bf16 %v5360_v44, %v5359_v4 }
 0xa08   :  { %v5495_v15 = vpop.eup %5494  ;;  %5035 = vmatprep.subr.bf16.mxu0 %v5034_v34  ;;  %v5363_v51 = vpop.permute.xlu1 %5362 }
 0xa09   :  { %v5497_v16 = vpop.eup %5496  ;;  %v1078_v48 = vmul.f32 %v5495_v15, %v5489_v2  ;;  %v5365_v52 = vunpack.i.h.bf16 %v5363_v51  ;;  %v5364_v41 = vunpack.i.l.bf16 %v5363_v51 }
 0xa0a   :  { %v1079_v50 = vmul.f32 %v5497_v16, %v5487_v1 }
 0xa0b   :  { %5037 = vmatpush3.bf16.msra.mxu0 %v5034_v34  ;;  %4734 = vmatprep.mubr.msk.f32.mxu0 %vm505_vm3, %v1078_v48  ;;  %v5044_v53 = vpack.c.bf16 %v5365_v52, %v5364_v41 }
 0xa0c   :  { %5040 = vmatprep.subr.msk.bf16.mxu0 %vm5951_vm2, %v5038_v49 }
 0xa0e   :  { %4735 = vmatmul.mubr.msk.f32.vlgmr.msra.gmra.mrb[16].mxu0 %vm505_vm3, %v1079_v50 }
 0xa14   :  { %5043 = vmatpush3.bf16.xpose.msk.msra.mxu0 %vm5951_vm2, %v5038_v49 }
 0xa15   :  { %5046 = vmatprep.subr.msk.bf16.mxu0 %vm5951_vm2, %v5044_v53 }
 0xa1c   :  { %5049 = vmatpush3.bf16.xpose.msk.msra.mxu0 %vm5951_vm2, %v5044_v53 }
 0xa32   :  { %v1070_v47 = vpop.xlane.xlu0 %1069 }
 0xa33   :  { %5498 = vrcp.f32 %v1070_v47 }
 0xa36   :  { %v1192_v63 = vpop.permute.xlu0 %1191 }
 0xa39   :  { %v1073_v57 = vpop.xlane.xlu1 %1072 }
 0xa3a   :  { %5500 = vrcp.f32 %v1073_v57  ;;  %v1196_v3 = vpop.permute.xlu0 %1195 }
 0xa3d   :  { %v5499_v58 = vpop.eup %5498  ;;  %v1194_v2 = vpop.permute.xlu1 %1193 }
 0xa3e   :  { %v1080_v60 = vmul.f32 %v5499_v58, %v5491_v17 }
 0xa40   :  { %4737 = vmatprep.mubr.msk.f32.mxu0 %vm505_vm3, %v1080_v60 }
 0xa41   :  { %v1198_v5 = vpop.permute.xlu1 %1197 }
 0xa44   :  { %v5501_v61 = vpop.eup %5500 }
 0xa45   :  { %v1081_v1 = vmul.f32 %v5501_v61, %v5493_v19 }
 0xa47   :  { %4738 = vmatmul.mubr.msk.f32.gmra.mrb[18].mxu0 %vm505_vm3, %v1081_v1 }
 0xa48   :  { %4748 = vmatprep.mubr.msk.f32.mxu0 %vm403_vm1, %v1192_v63 }
 0xa4b   :  { %4749 = vmatmul.mubr.msk.f32.vlgmr.msra.gmra.mrb[20].mxu0 %vm403_vm1, %v1194_v2 }
 0xa4c   :  { %4751 = vmatprep.mubr.msk.f32.mxu0 %vm403_vm1, %v1196_v3 }
 0xa4f   :  { %4752 = vmatmul.mubr.msk.f32.gmra.mrb[22].mxu0 %vm403_vm1, %v1198_v5 }
 0xa50   :  { %1810 = vmatprep.mubr.f32.mxu0 %v5650_v10 }
 0xae1   :  { %v4736_v6 = vpop.f32.mrb[16].mxu0 }
 0xae2   :  { %v1172_v7 = vpop.f32.mrb[17].mxu0 }
 0xb1a   :  { %v6134_v9 = vpop.f32.mrb[18].mxu0 }
 0xb1b   :  { %v6136_v11 = vpop.f32.mrb[19].mxu0 }
 0xb1e   :  { %v4750_v13 = vpop.f32.mrb[20].mxu0 }
 0xb1f   :  { %v1295_v14 = vadd.f32 %v4750_v13, %v5972_v37  ;;  %v1289_v17 = vpop.f32.mrb[21].mxu0 }
 0xb20   :  { %v1290_v18 = vadd.f32 %v1289_v17, %v5977_v38  ;;  %v1522_v17 = vld [vmem:[%s7405_s7] sm:$0xff] }
 0xb21   :  { %v1311_v19 = vsel %vm505_vm3, %v1295_v14, -inf }
 0xb22   :  { %1312 = vmax.xlane.f32.xlu1 %v1311_v19  ;;  %v4753_v8 = vpop.f32.mrb[22].mxu0  ;;  %v1308_v21 = vsel %vm505_vm3, %v1290_v18, -inf  ;;  %v1524_v19 = vld [vmem:[%s7405_s7 + $0x10] sm:$0xff] }
 0xb23   :  { %v1299_v22 = vpop.f32.mrb[23].mxu0  ;;  %1309 = vmax.xlane.f32.xlu0 %v1308_v21  ;;  %v1305_v26 = vadd.f32 %v4753_v8, %v5984_v45  ;;  %v1525_v21 = vld [vmem:[%s7405_s7 + $0x18] sm:$0xff] }
 0xb24   :  { %v1300_v25 = vadd.f32 %v1299_v22, %v5990_v46  ;;  %v5062_v22 = vpack.c.bf16 %v1525_v21, %v1524_v19 }
 0xb25   :  { %v1317_v37 = vsel %vm505_vm3, %v1305_v26, -inf }
 0xb26   :  { %v1314_v29 = vsel %vm505_vm3, %v1300_v25, -inf }
 0xb27   :  { %1315 = vmax.xlane.f32.xlu0 %v1314_v29 }
 0xb2b   :  { %1318 = vmax.xlane.f32.xlu0 %v1317_v37  ;;  %v1528_v37 = vld [vmem:[%s7405_s7 + $0x30] sm:$0xff] }
 0xbaf   :  { %v1313_v31 = vpop.xlane.xlu1 %1312 }
 0xbb0   :  { %v1321_v38 = vsub.f32 %v1295_v14, %v1313_v31  ;;  %v1310_v39 = vpop.xlane.xlu0 %1309  ;;  %v1529_v31 = vld [vmem:[%s7405_s7 + $0x38] sm:$0xff] }
 0xbb1   :  { %v1320_v42 = vsub.f32 %v1290_v18, %v1310_v39  ;;  %v1523_v18 = vld [vmem:[%s7405_s7 + $0x8] sm:$0xff] }
 0xbb2   :  { %v1326_v0 = vmul.f32 1.442695, %v1321_v38  ;;  %v5058_v8 = vpack.c.bf16 %v1523_v18, %v1522_v17  ;;  %v5070_v38 = vpack.c.bf16 %v1529_v31, %v1528_v37 }
 0xbb3   :  { %v1324_v43 = vmul.f32 1.442695, %v1320_v42 }
 0xbb4   :  { %5502 = vpow2.f32 %v1326_v0  ;;  %v1316_v44 = vpop.xlane.xlu0 %1315 }
 0xbb5   :  { %5504 = vpow2.f32 %v1324_v43  ;;  %v1322_v4 = vsub.f32 %v1300_v25, %v1316_v44  ;;  %v1526_v25 = vld [vmem:[%s7405_s7 + $0x20] sm:$0xff] }
 0xbb7   :  { %v1328_v34 = vmul.f32 1.442695, %v1322_v4 }
 0xbb8   :  { %v1319_v46 = vpop.xlane.xlu0 %1318 }
 0xbb9   :  { %5506 = vpow2.f32 %v1328_v34  ;;  %v1323_v45 = vsub.f32 %v1305_v26, %v1319_v46  ;;  %v1527_v26 = vld [vmem:[%s7405_s7 + $0x28] sm:$0xff] }
 0xbba   :  { %v5066_v29 = vpack.c.bf16 %v1527_v26, %v1526_v25 }
 0xbbb   :  { %v1330_v15 = vmul.f32 1.442695, %v1323_v45 }
 0xbbd   :  { %5508 = vpow2.f32 %v1330_v15 }
 0xbbe   :  { %v5503_v16 = vpop.eup %5502 }
 0xbbf   :  { %v5505_v48 = vpop.eup %5504  ;;  %v1335_v49 = vsel %vm505_vm3, %v5503_v16, 0.0 }
 0xbc0   :  { %1336 = vadd.xlane.f32.xlu1 %v1335_v49  ;;  %v1332_v50 = vsel %vm505_vm3, %v5505_v48, 0.0 }
 0xbc1   :  { %1333 = vadd.xlane.f32.xlu0 %v1332_v50 }
 0xbc3   :  { %v5507_v51 = vpop.eup %5506 }
 0xbc4   :  { %v1338_v52 = vsel %vm505_vm3, %v5507_v51, 0.0 }
 0xbc5   :  { %1339 = vadd.xlane.f32.xlu0 %v1338_v52 }
 0xbc7   :  { %v5509_v41 = vpop.eup %5508 }
 0xbc8   :  { %v1341_v53 = vsel %vm505_vm3, %v5509_v41, 0.0 }
 0xbc9   :  { %1342 = vadd.xlane.f32.xlu1 %v1341_v53 }
 0xbda   :  { %5372 = vrot.lane.b32.xlu1 %v5945_v24, %s5657_s26 }
 0xbdb   :  { %5367 = vrot.lane.b32.xlu0 %v5933_v12, %s5657_s26 }
 0xbde   :  { %1465 = vrot.lane.b32.xlu1 %v6083_v33, %s5656_s4 }
 0xbdf   :  { %1481 = vrot.lane.b32.xlu0 %v1172_v7, %s5654_s24 }
 0xbe2   :  { %1467 = vrot.lane.b32.xlu1 %v6081_v32, %s5656_s4 }
 0xbe3   :  { %1469 = vrot.lane.b32.xlu0 %v6087_v36, %s5656_s4 }
 0xbe6   :  { %1483 = vrot.lane.b32.xlu1 %v4736_v6, %s5654_s24 }
 0xbea   :  { %1471 = vrot.lane.b32.xlu1 %v6085_v35, %s5656_s4 }
 0xc4d   :  { %v1337_v47 = vpop.xlane.xlu1 %1336 }
 0xc4e   :  { %v1334_v24 = vpop.xlane.xlu0 %1333 }
 0xc4f   :  { %5510 = vrcp.f32 %v1334_v24 }
 0xc50   :  { %5512 = vrcp.f32 %v1337_v47 }
 0xc52   :  { %v1340_v12 = vpop.xlane.xlu0 %1339 }
 0xc53   :  { %5514 = vrcp.f32 %v1340_v12 }
 0xc56   :  { %v1343_v33 = vpop.xlane.xlu1 %1342  ;;  %v5368_v57 = vpop.permute.xlu0 %5367 }
 0xc57   :  { %v5370_v58 = vunpack.i.h.bf16 %v5368_v57  ;;  %v5369_v60 = vunpack.i.l.bf16 %v5368_v57  ;;  %5516 = vrcp.f32 %v1343_v33 }
 0xc59   :  { %v5511_v32 = vpop.eup %5510  ;;  %v5050_v61 = vpack.c.bf16 %v5370_v58, %v5369_v60 }
 0xc5a   :  { %v5373_v63 = vpop.permute.xlu1 %5372  ;;  %v1348_v36 = vmul.f32 %v5511_v32, %v5505_v48  ;;  %v5513_v3 = vpop.eup %5512 }
 0xc5b   :  { %v5375_v1 = vunpack.i.h.bf16 %v5373_v63  ;;  %v5374_v2 = vunpack.i.l.bf16 %v5373_v63  ;;  %5051 = vmatprep.subr.bf16.mxu1 %v5050_v61  ;;  %v1349_v6 = vmul.f32 %v5513_v3, %v5503_v16  ;;  %v1482_v46 = vpop.permute.xlu0 %1481 }
 0xc5c   :  { %5053 = vmatpush3.bf16.msra.mxu1 %v5050_v61  ;;  %4762 = vmatprep.mubr.msk.f32.mxu1 %vm505_vm3, %v1348_v36  ;;  %v4117_v61 = vld [vmem:[%s7402_s2 + $0x40] sm:$0xff] }
 0xc5d   :  { %v5054_v35 = vpack.c.bf16 %v5375_v1, %v5374_v2  ;;  %v5515_v5 = vpop.eup %5514 }
 0xc5e   :  { %v1350_v13 = vmul.f32 %v5515_v5, %v5507_v51  ;;  %v1466_v44 = vpop.permute.xlu1 %1465 }
 0xc5f   :  { %5055 = vmatprep.subr.bf16.mxu1 %v5054_v35  ;;  %v1470_v15 = vpop.permute.xlu0 %1469  ;;  %v1509_v16 = vsel %vm403_vm1, %v6031_v40, %v1466_v44 }
 0xc60   :  { %5057 = vmatpush3.bf16.msra.mxu1 %v5054_v35  ;;  %v1511_v53 = vsel %vm403_vm1, %v6035_v56, %v1470_v15  ;;  %v4185_v56 = vld [vmem:[%s7406_s8] ss:$0 sm:$0xff] }
 0xc61   :  { %v5517_v7 = vpop.eup %5516  ;;  %5059 = vmatprep.subr.bf16.mxu1 %v5058_v8 }
 0xc62   :  { %v1351_v14 = vmul.f32 %v5517_v7, %v5509_v41  ;;  %v1468_v4 = vpop.permute.xlu1 %1467 }
 0xc63   :  { %4763 = vmatmul.mubr.msk.f32.vlgmr.msra.gmra.mrb[16].mxu1 %vm505_vm3, %v1349_v6 }
 0xc64   :  { %4765 = vmatprep.mubr.msk.f32.mxu1 %vm505_vm3, %v1350_v13  ;;  %5061 = vmatpush3.bf16.msra.mxu1 %v5058_v8  ;;  %v4120_v13 = vld [vmem:[%s7402_s2 + $0x58] sm:$0xff] }
 0xc65   :  { %5063 = vmatprep.subr.bf16.mxu1 %v5062_v22 }
 0xc66   :  { %v1484_v34 = vpop.permute.xlu1 %1483 }
 0xc67   :  { %4766 = vmatmul.mubr.msk.f32.gmra.mrb[18].mxu1 %vm505_vm3, %v1351_v14 }
 0xc68   :  { %5065 = vmatpush3.bf16.msra.mxu1 %v5062_v22 }
 0xc69   :  { %5067 = vmatprep.subr.bf16.mxu1 %v5066_v29 }
 0xc6a   :  { %v1472_v45 = vpop.permute.xlu1 %1471 }
 0xc6c   :  { %5069 = vmatpush3.bf16.msra.mxu1 %v5066_v29 }
 0xc6d   :  { %5071 = vmatprep.subr.bf16.mxu1 %v5070_v38 }
 0xc70   :  { %5073 = vmatpush3.bf16.msra.mxu1 %v5070_v38 }
 0xd36   :  { %v4764_v39 = vpop.f32.mrb[16].mxu1 }
 0xd37   :  { %1499 = vrot.lane.b32.xlu1 %v4764_v39, %s5652_s22  ;;  %v1442_v42 = vpop.f32.mrb[17].mxu1 }
 0xd38   :  { %1497 = vrot.lane.b32.xlu0 %v1442_v42, %s5652_s22 }
 0xd3a   :  { %v4767_v0 = vpop.f32.mrb[18].mxu1 }
 0xd3b   :  { %1487 = vrot.lane.b32.xlu1 %v6134_v9, %s5654_s24  ;;  %v1452_v43 = vpop.f32.mrb[19].mxu1  ;;  %v1510_v9 = vsel %vm403_vm1, %v6029_v54, %v1468_v4  ;;  %v1512_v54 = vsel %vm403_vm1, %v6033_v55, %v1472_v45  ;;  %v4118_v55 = vld [vmem:[%s7402_s2 + $0x48] sm:$0xff] }
 0xd3c   :  { %1485 = vrot.lane.b32.xlu0 %v6136_v11, %s5654_s24  ;;  %v1513_v11 = vsel %vm505_vm3, %v1509_v16, %v1482_v46  ;;  %v1514_v50 = vsel %vm505_vm3, %v1510_v9, %v1484_v34 }
 0xd3f   :  { %1503 = vrot.lane.b32.xlu1 %v4767_v0, %s5652_s22 }
 0xd40   :  { %1501 = vrot.lane.b32.xlu0 %v1452_v43, %s5652_s22 }
 0xda9   :  { %v1500_v48 = vpop.permute.xlu1 %1499 }
 0xdaa   :  { %v1498_v49 = vpop.permute.xlu0 %1497  ;;  %v1519_v52 = vsel %vm1517_vm4, %v1514_v50, %v1500_v48 }
 0xdab   :  { %v1518_v51 = vsel %vm1517_vm4, %v1513_v11, %v1498_v49  ;;  %v1707_v11 = vld [vmem:[%s7407_s9 + $0x8] sm:$0xff]  ;;  %v1709_v49 = vld [vmem:[%s7407_s9 + $0x18] sm:$0xff] }
 0xdac   :  { %4784 = vmatprep.mubr.msk.f32.mxu1 %vm66_vm0, %v1518_v51  ;;  %v5074_v50 = vpack.c.bf16 %v1709_v49, %v1707_v11  ;;  %v1706_v51 = vld [vmem:[%s7407_s9] sm:$0xff]  ;;  %v4127_v11 = vld [vmem:[%s7402_s2 + $0x90] sm:$0xff] }
 0xdad   :  { %v1488_v41 = vpop.permute.xlu1 %1487  ;;  %4785 = vmatmul.mubr.msk.f32.vlgmr.msra.gmra.mrb[20].mxu1 %vm66_vm0, %v1519_v52  ;;  %v1708_v52 = vld [vmem:[%s7407_s9 + $0x10] sm:$0xff] }
 0xdae   :  { %v1486_v40 = vpop.permute.xlu0 %1485  ;;  %v1516_v33 = vsel %vm505_vm3, %v1512_v54, %v1488_v41  ;;  %5075 = vmatprep.subr.bf16.mxu0 %v5074_v50  ;;  %v5076_v41 = vpack.c.bf16 %v1708_v52, %v1706_v51  ;;  %v1710_v54 = vld [vmem:[%s7407_s9 + $0x20] sm:$0xff]  ;;  %v4122_v51 = vld [vmem:[%s7402_s2 + $0x68] sm:$0xff]  ;;  %v4128_v52 = vld [vmem:[%s7402_s2 + $0x98] sm:$0xff] }
 0xdaf   :  { %v1515_v47 = vsel %vm505_vm3, %v1511_v53, %v1486_v40  ;;  %v1711_v40 = vld [vmem:[%s7407_s9 + $0x28] sm:$0xff]  ;;  %v1713_v53 = vld [vmem:[%s7407_s9 + $0x38] sm:$0xff] }
 0xdb0   :  { %5077 = vmatpush1.bf16.msra.mxu0 %v5076_v41 }
 0xdb1   :  { %v1504_v24 = vpop.permute.xlu1 %1503 }
 0xdb2   :  { %v1502_v12 = vpop.permute.xlu0 %1501  ;;  %v1521_v58 = vsel %vm1517_vm4, %v1516_v33, %v1504_v24  ;;  %v5078_v24 = vpack.c.bf16 %v1713_v53, %v1711_v40  ;;  %v1715_v33 = vld [vmem:[%s7407_s9 + $0x48] sm:$0xff]  ;;  %v4123_v53 = vld [vmem:[%s7402_s2 + $0x70] sm:$0xff] }
 0xdb3   :  { %v1520_v57 = vsel %vm1517_vm4, %v1515_v47, %v1502_v12  ;;  %v1712_v47 = vld [vmem:[%s7407_s9 + $0x30] sm:$0xff] }
 0xdb4   :  { %4787 = vmatprep.mubr.msk.f32.mxu1 %vm66_vm0, %v1520_v57  ;;  %v5080_v12 = vpack.c.bf16 %v1712_v47, %v1710_v54  ;;  %5079 = vmatprep.subr.bf16.mxu0 %v5078_v24  ;;  %v1717_v57 = vld [vmem:[%s7407_s9 + $0x58] sm:$0xff]  ;;  %v1697_v54 = vadd.f32 1.0, %v4128_v52 }
 0xdb5   :  { %4788 = vmatmul.mubr.msk.f32.gmra.mrb[22].mxu1 %vm66_vm0, %v1521_v58  ;;  %v5082_v58 = vpack.c.bf16 %v1717_v57, %v1715_v33  ;;  %v4124_v57 = vld [vmem:[%s7402_s2 + $0x78] sm:$0xff] }
 0xdb6   :  { %5081 = vmatpush1.bf16.msra.mxu0 %v5080_v12 }
 0xdb7   :  { %5083 = vmatprep.subr.bf16.mxu0 %v5082_v58 }
 0xe80   :  { %v4786_v60 = vpop.f32.mrb[20].mxu1 }
 0xe81   :  { %v1621_v32 = vadd.f32 %v4786_v60, %v4185_v56  ;;  %v1615_v63 = vpop.f32.mrb[21].mxu1 }
 0xe82   :  { %v1616_v36 = vadd.f32 %v4185_v56, %v1615_v63 }
 0xe83   :  { %v1635_v1 = vmul.f32 %v4118_v55, %v1621_v32  ;;  %v1716_v55 = vld [vmem:[%s7407_s9 + $0x50] sm:$0xff]  ;;  %v1719_v32 = vld [vmem:[%s7407_s9 + $0x68] sm:$0xff] }
 0xe84   :  { %v1634_v2 = vmul.f32 %v4117_v61, %v1616_v36  ;;  %v1721_v61 = vld [vmem:[%s7407_s9 + $0x78] sm:$0xff]  ;;  %v1718_v36 = vld [vmem:[%s7407_s9 + $0x60] sm:$0xff] }
 0xe85   :  { %v6230_v35 = vadd.f32 %v1635_v1, %v5792_v23  ;;  %v4119_v23 = vld [vmem:[%s7402_s2 + $0x50] sm:$0xff]  ;;  %v5086_v63 = vpack.c.bf16 %v1721_v61, %v1719_v32  ;;  %v1910_v32 = vld [vmem:[%s7408_s11 + $0x18] sm:$0xff] }
 0xe86   :  { %v6233_v3 = vadd.f32 %v1634_v2, %v5784_v20  ;;  %v1720_v1 = vld [vmem:[%s7407_s9 + $0x70] sm:$0xff] }
 0xe87   :  { %v1645_v5 = vsel %vm66_vm0, %v6230_v35, 0.0  ;;  %v5088_v2 = vpack.c.bf16 %v1720_v1, %v1718_v36  ;;  %v1928_v36 = vld [vmem:[%s7408_s11 + $0xa8] sm:$0xff] }
 0xe88   :  { %1646 = vadd.xlane.f32.xlu1 %v1645_v5  ;;  %v4789_v6 = vpop.f32.mrb[22].mxu1  ;;  %v1642_v7 = vsel %vm66_vm0, %v6233_v3, 0.0  ;;  %v1923_v5 = vld [vmem:[%s7408_s11 + $0x80] sm:$0xff] }
 0xe89   :  { %v1631_v14 = vadd.f32 %v4789_v6, %v4185_v56  ;;  %v1625_v17 = vpop.f32.mrb[23].mxu1  ;;  %1643 = vadd.xlane.f32.xlu0 %v1642_v7  ;;  %v1924_v6 = vld [vmem:[%s7408_s11 + $0x88] sm:$0xff]  ;;  %v1907_v7 = vld [vmem:[%s7408_s11] sm:$0xff] }
 0xe8a   :  { %v1626_v20 = vadd.f32 %v4185_v56, %v1625_v17  ;;  %v1714_v56 = vld [vmem:[%s7407_s9 + $0x40] sm:$0xff] }
 0xe8b   :  { %v1637_v18 = vmul.f32 %v4120_v13, %v1631_v14  ;;  %v5084_v60 = vpack.c.bf16 %v1716_v55, %v1714_v56  ;;  %v5090_v13 = vpack.c.bf16 %v1924_v6, %v1923_v5  ;;  %v1908_v14 = vld [vmem:[%s7408_s11 + $0x8] sm:$0xff]  ;;  %v1925_v56 = vld [vmem:[%s7408_s11 + $0x90] sm:$0xff] }
 0xe8c   :  { %v1636_v19 = vmul.f32 %v4119_v23, %v1626_v20  ;;  %v5092_v23 = vpack.c.bf16 %v1908_v14, %v1907_v7  ;;  %v1912_v5 = vld [vmem:[%s7408_s11 + $0x28] sm:$0xff]  ;;  %v1929_v7 = vld [vmem:[%s7408_s11 + $0xb0] sm:$0xff] }
 0xe8d   :  { %v6249_v21 = vadd.f32 %v1637_v18, %v5796_v27  ;;  %5085 = vmatpush1.bf16.msra.mxu0 %v5084_v60  ;;  %5091 = vmatprep.subr.bf16.mxu1 %v5090_v13  ;;  %v1909_v60 = vld [vmem:[%s7408_s11 + $0x10] sm:$0xff]  ;;  %v1930_v13 = vld [vmem:[%s7408_s11 + $0xb8] sm:$0xff] }
 0xe8e   :  { %v6246_v8 = vadd.f32 %v1636_v19, %v5798_v28  ;;  %5087 = vmatprep.subr.bf16.mxu0 %v5086_v63  ;;  %5093 = vmatpush3.bf16.msra.mxu1 %v5092_v23  ;;  %v5096_v61 = vpack.c.bf16 %v1910_v32, %v1909_v60  ;;  %v1927_v63 = vld [vmem:[%s7408_s11 + $0xa0] sm:$0xff]  ;;  %v5102_v14 = vpack.c.bf16 %v1930_v13, %v1929_v7  ;;  %v1913_v23 = vld [vmem:[%s7408_s11 + $0x30] sm:$0xff] }
 0xe8f   :  { %v1651_v25 = vsel %vm66_vm0, %v6249_v21, 0.0  ;;  %v5098_v1 = vpack.c.bf16 %v1928_v36, %v1927_v63 }
 0xe90   :  { %v1648_v22 = vsel %vm66_vm0, %v6246_v8, 0.0 }
 0xe91   :  { %1649 = vadd.xlane.f32.xlu0 %v1648_v22  ;;  %5089 = vmatpush1.bf16.msra.mxu0 %v5088_v2  ;;  %v1911_v2 = vld [vmem:[%s7408_s11 + $0x20] sm:$0xff] }
 0xe92   :  { %v5100_v6 = vpack.c.bf16 %v1912_v5, %v1911_v2 }
 0xe95   :  { %1652 = vadd.xlane.f32.xlu0 %v1651_v25 }
 0xf15   :  { %v1647_v26 = vpop.xlane.xlu1 %1646 }
 0xf16   :  { %v1655_v29 = vmul.f32 0.015625, %v1647_v26  ;;  %v1644_v37 = vpop.xlane.xlu0 %1643 }
 0xf17   :  { %v1654_v31 = vmul.f32 0.015625, %v1644_v37  ;;  %v4125_v37 = vld [vmem:[%s7402_s2 + $0x80] sm:$0xff] }
 0xf18   :  { %v6256_v38 = vsub.f32 %v6230_v35, %v1655_v29 }
 0xf19   :  { %v6259_v28 = vsub.f32 %v6233_v3, %v1654_v31 }
 0xf1a   :  { %v1663_v27 = vmul.f32 %v6256_v38, %v6256_v38 }
 0xf1b   :  { %v1662_v39 = vmul.f32 %v6259_v28, %v6259_v28 }
 0xf1c   :  { %v1669_v42 = vsel %vm66_vm0, %v1663_v27, 0.0 }
 0xf1d   :  { %1670 = vadd.xlane.f32.xlu1 %v1669_v42  ;;  %v1666_v0 = vsel %vm66_vm0, %v1662_v39, 0.0  ;;  %v4126_v42 = vld [vmem:[%s7402_s2 + $0x88] sm:$0xff] }
 0xf1e   :  { %1667 = vadd.xlane.f32.xlu0 %v1666_v0  ;;  %v1650_v43 = vpop.xlane.xlu0 %1649 }
 0xf1f   :  { %v1656_v44 = vmul.f32 0.015625, %v1650_v43  ;;  %v1694_v43 = vadd.f32 1.0, %v4125_v37  ;;  %v1933_v37 = vld [vmem:[%s7408_s11 + $0xd0] sm:$0xff] }
 0xf21   :  { %v6268_v4 = vsub.f32 %v6246_v8, %v1656_v44 }
 0xf22   :  { %v1653_v34 = vpop.xlane.xlu0 %1652 }
 0xf23   :  { %v1657_v46 = vmul.f32 0.015625, %v1653_v34  ;;  %v1664_v45 = vmul.f32 %v6268_v4, %v6268_v4 }
 0xf25   :  { %v6273_v15 = vsub.f32 %v6249_v21, %v1657_v46  ;;  %v1672_v16 = vsel %vm66_vm0, %v1664_v45, 0.0 }
 0xf26   :  { %1673 = vadd.xlane.f32.xlu0 %v1672_v16  ;;  %v1695_v16 = vadd.f32 1.0, %v4126_v42  ;;  %v1918_v42 = vld [vmem:[%s7408_s11 + $0x58] sm:$0xff] }
 0xf27   :  { %v1665_v48 = vmul.f32 %v6273_v15, %v6273_v15 }
 0xf29   :  { %v1675_v9 = vsel %vm66_vm0, %v1665_v48, 0.0  ;;  %v4121_v48 = vld [vmem:[%s7402_s2 + $0x60] sm:$0xff] }
 0xf2a   :  { %1676 = vadd.xlane.f32.xlu1 %v1675_v9 }
 0xfaa   :  { %v1671_v17 = vpop.xlane.xlu1 %1670 }
 0xfab   :  { %v1679_v20 = vmul.f32 0.015625, %v1671_v17  ;;  %v1668_v18 = vpop.xlane.xlu0 %1667  ;;  %v1914_v17 = vld [vmem:[%s7408_s11 + $0x38] sm:$0xff] }
 0xfac   :  { %v1678_v19 = vmul.f32 0.015625, %v1668_v18  ;;  %v1931_v18 = vld [vmem:[%s7408_s11 + $0xc0] sm:$0xff] }
 0xfad   :  { %v1683_v22 = vadd.f32 1e-06, %v1679_v20  ;;  %v5104_v20 = vpack.c.bf16 %v1914_v17, %v1913_v23 }
 0xfae   :  { %v1682_v25 = vadd.f32 1e-06, %v1678_v19  ;;  %v1932_v19 = vld [vmem:[%s7408_s11 + $0xc8] sm:$0xff] }
 0xfaf   :  { %5518 = vrsqrt.f32 %v1683_v22  ;;  %v5106_v22 = vpack.c.bf16 %v1932_v19, %v1931_v18 }
 0xfb0   :  { %5520 = vrsqrt.f32 %v1682_v25  ;;  %v1915_v25 = vld [vmem:[%s7408_s11 + $0x40] sm:$0xff] }
 0xfb3   :  { %v1674_v26 = vpop.xlane.xlu0 %1673 }
 0xfb4   :  { %v1680_v29 = vmul.f32 0.015625, %v1674_v26  ;;  %v1916_v26 = vld [vmem:[%s7408_s11 + $0x48] sm:$0xff] }
 0xfb6   :  { %v1684_v31 = vadd.f32 1e-06, %v1680_v29  ;;  %v5108_v29 = vpack.c.bf16 %v1916_v26, %v1915_v25 }
 0xfb7   :  { %v1677_v27 = vpop.xlane.xlu1 %1676 }
 0xfb8   :  { %5522 = vrsqrt.f32 %v1684_v31  ;;  %v1681_v39 = vmul.f32 0.015625, %v1677_v27  ;;  %v1934_v31 = vld [vmem:[%s7408_s11 + $0xd8] sm:$0xff] }
 0xfb9   :  { %v5519_v0 = vpop.eup %5518  ;;  %v5110_v27 = vpack.c.bf16 %v1934_v31, %v1933_v37 }
 0xfba   :  { %v5521_v44 = vpop.eup %5520  ;;  %v1685_v34 = vadd.f32 1e-06, %v1681_v39  ;;  %v1691_v45 = vmul.f32 %v5519_v0, %v6256_v38  ;;  %v1696_v38 = vadd.f32 1.0, %v4127_v11  ;;  %v1917_v39 = vld [vmem:[%s7408_s11 + $0x50] sm:$0xff] }
 0xfbb   :  { %v1690_v46 = vmul.f32 %v5521_v44, %v6259_v28  ;;  %v5112_v0 = vpack.c.bf16 %v1918_v42, %v1917_v39  ;;  %v1936_v44 = vld [vmem:[%s7408_s11 + $0xe8] sm:$0xff] }
 0xfbc   :  { %5524 = vrsqrt.f32 %v1685_v34  ;;  %v1699_v50 = vmul.f32 %v1695_v16, %v1691_v45  ;;  %v1919_v34 = vld [vmem:[%s7408_s11 + $0x60] sm:$0xff]  ;;  %v1920_v45 = vld [vmem:[%s7408_s11 + $0x68] sm:$0xff]  ;;  %v1937_v16 = vld [vmem:[%s7408_s11 + $0xf0] sm:$0xff] }
 0xfbd   :  { %v1698_v9 = vmul.f32 %v1694_v43, %v1690_v46  ;;  %v1935_v43 = vld [vmem:[%s7408_s11 + $0xe0] sm:$0xff] }
 0xfbe   :  { %v1703_v41 = vadd.f32 %v4122_v51, %v1699_v50  ;;  %v5114_v46 = vpack.c.bf16 %v1936_v44, %v1935_v43  ;;  %v1922_v50 = vld [vmem:[%s7408_s11 + $0x78] sm:$0xff] }
 0xfbf   :  { %v1702_v49 = vadd.f32 %v4121_v48, %v1698_v9  ;;  %v1938_v48 = vld [vmem:[%s7408_s11 + $0xf8] sm:$0xff]  ;;  %v5116_v9 = vpack.c.bf16 %v1920_v45, %v1919_v34 }
 0xfc0   :  { %v5118_v11 = vpack.c.bf16 %v1938_v48, %v1937_v16 }
 0xfc1   :  { %4190 = vmatmul.mubr.msk.f32.vlgmr.msra.gmra.mrb[24].mxu0 %vm66_vm0, %v1702_v49  ;;  %v1921_v49 = vld [vmem:[%s7408_s11 + $0x70] sm:$0xff] }
 0xfc2   :  { %v5523_v28 = vpop.eup %5522  ;;  %1816 = vmatprep.mubr.f32.mxu0 %v5650_v10  ;;  %v5120_v51 = vpack.c.bf16 %v1922_v50, %v1921_v49 }
 0xfc3   :  { %v1692_v40 = vmul.f32 %v5523_v28, %v6268_v4 }
 0xfc5   :  { %4191 = vmatmul.mubr.msk.f32.gmra.mrb[26].mxu0 %vm66_vm0, %v1703_v41  ;;  %v1700_v24 = vmul.f32 %v1696_v38, %v1692_v40  ;;  %v1722_v38 = vld [vmem:[%s7409_s10] sm:$0x3] }
 0xfc6   :  { %v5525_v47 = vpop.eup %5524  ;;  %1822 = vmatprep.mubr.f32.mxu0 %v5650_v10  ;;  %v1727_v28 = vrot.slane %v1722_v38, %v5914_v59  ;;  %v1731_v52 = vrot.slane %v1722_v38, %v5920_v62 }
 0xfc7   :  { %v1704_v12 = vadd.f32 %v4123_v53, %v1700_v24  ;;  %v1693_v33 = vmul.f32 %v5525_v47, %v6273_v15  ;;  %v1926_v15 = vld [vmem:[%s7408_s11 + $0x98] sm:$0xff] }
 0xfc8   :  { %v5094_v55 = vpack.c.bf16 %v1926_v15, %v1925_v56 }
 0xfc9   :  { %4192 = vmatmul.mubr.msk.f32.gmra.mrb[28].mxu0 %vm66_vm0, %v1704_v12  ;;  %v1701_v4 = vmul.f32 %v1697_v54, %v1693_v33 }
 0xfca   :  { %1828 = vmatprep.mubr.f32.mxu0 %v5650_v10  ;;  %5095 = vmatprep.subr.bf16.mxu1 %v5094_v55 }
 0xfcb   :  { %v1705_v58 = vadd.f32 %v4124_v57, %v1701_v4  ;;  %5097 = vmatpush3.bf16.msra.mxu1 %v5096_v61 }
 0xfcc   :  { %5099 = vmatprep.subr.bf16.mxu1 %v5098_v1 }
 0xfcd   :  { %4193 = vmatmul.mubr.msk.f32.gmra.mrb[30].mxu0 %vm66_vm0, %v1705_v58 }
 0xfce   :  { %2239 = vmatprep.mubr.f32.mxu0 %v5650_v10 }
 0xfcf   :  { %5101 = vmatpush3.bf16.msra.mxu1 %v5100_v6 }
 0xfd0   :  { %5103 = vmatprep.subr.bf16.mxu1 %v5102_v14 }
 0xfd3   :  { %5105 = vmatpush3.bf16.msra.mxu1 %v5104_v20 }
 0xfd4   :  { %5107 = vmatprep.subr.bf16.mxu1 %v5106_v22 }
 0xfd7   :  { %5109 = vmatpush3.bf16.msra.mxu1 %v5108_v29 }
 0xfd8   :  { %5111 = vmatprep.subr.bf16.mxu1 %v5110_v27 }
 0xfdb   :  { %5113 = vmatpush3.bf16.msra.mxu1 %v5112_v0 }
 0xfdc   :  { %5115 = vmatprep.subr.bf16.mxu1 %v5114_v46 }
 0xfdf   :  { %5117 = vmatpush3.bf16.msra.mxu1 %v5116_v9 }
 0xfe0   :  { %5119 = vmatprep.subr.bf16.mxu1 %v5118_v11 }
 0xfe3   :  { %5121 = vmatpush3.bf16.msra.mxu1 %v5120_v51 }
0x1094   :  { %v1812_v41 = vpop.f32.mrb[24].mxu0 }
0x1095   :  { %v6464_v40 = vadd.f32 %v1812_v41, %v1727_v28  ;;  %v1814_v53 = vpop.f32.mrb[25].mxu0 }
0x1096   :  { %v1815_v24 = vadd.f32 %v1814_v53, %v1731_v52 }
0x1097   :  { %v1843_v54 = vmul.f32 0.044715, %v6464_v40 }
0x1098   :  { %v1844_v47 = vmul.f32 0.044715, %v1815_v24  ;;  %v1818_v12 = vpop.f32.mrb[26].mxu0 }
0x1099   :  { %v1851_v33 = vmul.f32 %v1843_v54, %v6464_v40  ;;  %v6468_v57 = vadd.f32 %v1818_v12, %v1727_v28  ;;  %v1820_v4 = vpop.f32.mrb[27].mxu0 }
0x109a   :  { %v1852_v58 = vmul.f32 %v1844_v47, %v1815_v24  ;;  %v6470_v56 = vadd.f32 %v1820_v4, %v1731_v52  ;;  %v1836_v47 = vmul.f32 0.5, %v1815_v24 }
0x109b   :  { %v1859_v15 = vmul.f32 %v1851_v33, %v6464_v40  ;;  %v1845_v55 = vmul.f32 0.044715, %v6468_v57  ;;  %v1835_v33 = vmul.f32 0.5, %v6464_v40 }
0x109c   :  { %v1846_v60 = vmul.f32 0.044715, %v6470_v56  ;;  %v1824_v32 = vpop.f32.mrb[28].mxu0  ;;  %v1860_v61 = vmul.f32 %v1852_v58, %v1815_v24 }
0x109d   :  { %v1867_v63 = vadd.f32 %v1859_v15, %v6464_v40  ;;  %v1853_v36 = vmul.f32 %v1845_v55, %v6468_v57  ;;  %v6477_v1 = vadd.f32 %v1824_v32, %v1727_v28  ;;  %v1826_v2 = vpop.f32.mrb[29].mxu0  ;;  %v1838_v32 = vmul.f32 0.5, %v6470_v56 }
0x109e   :  { %v1854_v5 = vmul.f32 %v1846_v60, %v6470_v56  ;;  %v6480_v6 = vadd.f32 %v1826_v2, %v1731_v52  ;;  %v1868_v7 = vadd.f32 %v1860_v61, %v1815_v24 }
0x109f   :  { %v1875_v13 = vmul.f32 0.7978846, %v1867_v63  ;;  %v1847_v14 = vmul.f32 0.044715, %v6477_v1  ;;  %v1861_v23 = vmul.f32 %v1853_v36, %v6468_v57  ;;  %v1837_v63 = vmul.f32 0.5, %v6468_v57 }
0x10a0   :  { %v1848_v17 = vmul.f32 0.044715, %v6480_v6  ;;  %v1830_v20 = vpop.f32.mrb[30].mxu0  ;;  %v1876_v18 = vmul.f32 0.7978846, %v1868_v7  ;;  %v1862_v19 = vmul.f32 %v1854_v5, %v6470_v56  ;;  %v1840_v40 = vmul.f32 0.5, %v6480_v6 }
0x10a1   :  { %5526 = vtanh.f32 %v1875_v13  ;;  %v1855_v22 = vmul.f32 %v1847_v14, %v6477_v1  ;;  %v6487_v25 = vadd.f32 %v1830_v20, %v1727_v28  ;;  %v1832_v26 = vpop.f32.mrb[31].mxu0  ;;  %v1869_v29 = vadd.f32 %v1861_v23, %v6468_v57 }
0x10a2   :  { %v1856_v37 = vmul.f32 %v1848_v17, %v6480_v6  ;;  %v1833_v31 = vadd.f32 %v1832_v26, %v1731_v52  ;;  %5528 = vtanh.f32 %v1876_v18  ;;  %v1870_v27 = vadd.f32 %v1862_v19, %v6470_v56 }
0x10a3   :  { %v1849_v39 = vmul.f32 0.044715, %v6487_v25  ;;  %v1877_v42 = vmul.f32 0.7978846, %v1869_v29  ;;  %v1863_v0 = vmul.f32 %v1855_v22, %v6477_v1  ;;  %v1839_v14 = vmul.f32 0.5, %v6477_v1 }
0x10a4   :  { %v1850_v43 = vmul.f32 0.044715, %v1833_v31  ;;  %v1878_v44 = vmul.f32 0.7978846, %v1870_v27  ;;  %v1864_v34 = vmul.f32 %v1856_v37, %v6480_v6  ;;  %v1842_v19 = vmul.f32 0.5, %v1833_v31 }
0x10a5   :  { %v1857_v46 = vmul.f32 %v1849_v39, %v6487_v25  ;;  %5530 = vtanh.f32 %v1877_v42  ;;  %v1871_v45 = vadd.f32 %v1863_v0, %v6477_v1  ;;  %v1841_v22 = vmul.f32 0.5, %v6487_v25  ;;  %v4194_v1 = vld [vmem:[%s7410_s12] ss:$0 sm:$0xff] }
0x10a6   :  { %v1858_v16 = vmul.f32 %v1850_v43, %v1833_v31  ;;  %5532 = vtanh.f32 %v1878_v44  ;;  %v1872_v48 = vadd.f32 %v1864_v34, %v6480_v6  ;;  %v4129_v39 = vld [vmem:[%s7402_s2 + $0xa0] sm:$0xff]  ;;  %v4130_v44 = vld [vmem:[%s7402_s2 + $0xa8] sm:$0xff] }
0x10a7   :  { %v1879_v9 = vmul.f32 0.7978846, %v1871_v45  ;;  %v1865_v11 = vmul.f32 %v1857_v46, %v6487_v25 }
0x10a8   :  { %v1880_v49 = vmul.f32 0.7978846, %v1872_v48  ;;  %v1866_v50 = vmul.f32 %v1858_v16, %v1833_v31 }
0x10a9   :  { %5534 = vtanh.f32 %v1879_v9  ;;  %v1873_v51 = vadd.f32 %v1865_v11, %v6487_v25 }
0x10aa   :  { %5536 = vtanh.f32 %v1880_v49  ;;  %v1874_v38 = vadd.f32 %v1866_v50, %v1833_v31  ;;  %v4131_v49 = vld [vmem:[%s7402_s2 + $0xb0] sm:$0xff] }
0x10ab   :  { %v5527_v28 = vpop.eup %5526  ;;  %v1881_v52 = vmul.f32 0.7978846, %v1873_v51 }
0x10ac   :  { %v5529_v41 = vpop.eup %5528  ;;  %v1891_v53 = vadd.f32 1.0, %v5527_v28  ;;  %v1882_v54 = vmul.f32 0.7978846, %v1874_v38 }
0x10ad   :  { %v1892_v12 = vadd.f32 1.0, %v5529_v41  ;;  %5538 = vtanh.f32 %v1881_v52 }
0x10ae   :  { %5540 = vtanh.f32 %v1882_v54  ;;  %v1899_v55 = vmul.f32 %v1891_v53, %v1835_v33  ;;  %v4132_v53 = vld [vmem:[%s7402_s2 + $0xb8] sm:$0xff] }
0x10af   :  { %v5531_v4 = vpop.eup %5530  ;;  %v1900_v58 = vmul.f32 %v1892_v12, %v1836_v47 }
0x10b0   :  { %v5533_v15 = vpop.eup %5532  ;;  %v1893_v60 = vadd.f32 1.0, %v5531_v4 }
0x10b1   :  { %2010 = vmatprep.mubr.f32.mxu1 %v1900_v58  ;;  %v1894_v61 = vadd.f32 1.0, %v5533_v15 }
0x10b2   :  { %2011 = vmatmul.mubr.f32.vlgmr.msra.gmra.mrb[24].mxu1 %v1899_v55  ;;  %v1901_v5 = vmul.f32 %v1893_v60, %v1837_v63 }
0x10b3   :  { %v5535_v36 = vpop.eup %5534  ;;  %v1902_v2 = vmul.f32 %v1894_v61, %v1838_v32 }
0x10b4   :  { %v5537_v24 = vpop.eup %5536  ;;  %v1895_v7 = vadd.f32 1.0, %v5535_v36 }
0x10b5   :  { %2015 = vmatprep.mubr.f32.mxu1 %v1902_v2  ;;  %v1896_v13 = vadd.f32 1.0, %v5537_v24 }
0x10b6   :  { %2016 = vmatmul.mubr.f32.gmra.mrb[26].mxu1 %v1901_v5  ;;  %v1903_v56 = vmul.f32 %v1895_v7, %v1839_v14 }
0x10b7   :  { %v5539_v23 = vpop.eup %5538  ;;  %v1904_v17 = vmul.f32 %v1896_v13, %v1840_v40 }
0x10b8   :  { %v5541_v20 = vpop.eup %5540  ;;  %v1897_v18 = vadd.f32 1.0, %v5539_v23 }
0x10b9   :  { %2020 = vmatprep.mubr.f32.mxu1 %v1904_v17  ;;  %v1898_v57 = vadd.f32 1.0, %v5541_v20 }
0x10ba   :  { %2021 = vmatmul.mubr.f32.gmra.mrb[28].mxu1 %v1903_v56  ;;  %v1905_v29 = vmul.f32 %v1897_v18, %v1841_v22  ;;  %v4220_v56 = vld [vmem:[%s7401_s5 + $0x88] sm:$0xff]  ;;  %v4222_v18 = vld [vmem:[%s7401_s5 + $0x98] sm:$0xff]  ;;  %v4221_v22 = vld [vmem:[%s7401_s5 + $0x90] sm:$0xff] }
0x10bb   :  { %v1906_v26 = vmul.f32 %v1898_v57, %v1842_v19  ;;  %v5122_v19 = vpack.c.bf16 %v4222_v18, %v4220_v56  ;;  %v4219_v57 = vld [vmem:[%s7401_s5 + $0x80] sm:$0xff] }
0x10bd   :  { %2025 = vmatprep.mubr.f32.mxu1 %v1906_v26  ;;  %v5124_v26 = vpack.c.bf16 %v4221_v22, %v4219_v57  ;;  %5123 = vmatprep.subr.bf16.mxu0 %v5122_v19 }
0x10be   :  { %2026 = vmatmul.mubr.f32.gmra.mrb[30].mxu1 %v1905_v29  ;;  %v4224_v29 = vld [vmem:[%s7401_s5 + $0xa8] sm:$0xff] }
0x10bf   :  { %5125 = vmatpush1.bf16.msra.mxu0 %v5124_v26 }
0x1185   :  { %v4490_v6 = vpop.f32.mrb[24].mxu1 }
0x1186   :  { %v4491_v37 = vpop.f32.mrb[25].mxu1 }
0x1187   :  { %v4492_v27 = vadd.f32 %v4491_v37, %v4490_v6  ;;  %v4226_v6 = vld [vmem:[%s7401_s5 + $0xb8] sm:$0xff]  ;;  %v4223_v37 = vld [vmem:[%s7401_s5 + $0xa0] sm:$0xff] }
0x1189   :  { %v2013_v31 = vadd.f32 %v4492_v27, %v4194_v1  ;;  %v4493_v42 = vpop.f32.mrb[26].mxu1  ;;  %v4225_v27 = vld [vmem:[%s7401_s5 + $0xb0] sm:$0xff] }
0x118a   :  { %v4494_v0 = vpop.f32.mrb[27].mxu1 }
0x118b   :  { %v2031_v43 = vmul.f32 %v4129_v39, %v2013_v31  ;;  %v4495_v25 = vadd.f32 %v4494_v0, %v4493_v42  ;;  %v5128_v39 = vpack.c.bf16 %v4225_v27, %v4223_v37  ;;  %v4228_v31 = vld [vmem:[%s7401_s5 + $0xc8] sm:$0xff]  ;;  %v4230_v42 = vld [vmem:[%s7401_s5 + $0xd8] sm:$0xff]  ;;  %v4235_v37 = vld [vmem:[%s7403_s6 + $0x2] sm:$0x3] }
0x118c   :  { %v5130_v0 = vpack.c.bf16 %v4230_v42, %v4228_v31  ;;  %v2156_v27 = vrot.slane %v4235_v37, %v5914_v59  ;;  %v2160_v42 = vrot.slane %v4235_v37, %v5920_v62 }
0x118d   :  { %v2018_v34 = vadd.f32 %v4495_v25, %v4194_v1  ;;  %v4496_v46 = vpop.f32.mrb[28].mxu1  ;;  %v6516_v45 = vadd.f32 %v2031_v43, %v6233_v3  ;;  %v4227_v43 = vld [vmem:[%s7401_s5 + $0xc0] sm:$0xff]  ;;  %v4229_v25 = vld [vmem:[%s7401_s5 + $0xd0] sm:$0xff] }
0x118e   :  { %v4497_v16 = vpop.f32.mrb[29].mxu1 }
0x118f   :  { %v2032_v48 = vmul.f32 %v4130_v44, %v2018_v34  ;;  %v4498_v9 = vadd.f32 %v4497_v16, %v4496_v46  ;;  %v2069_v11 = vsel %vm66_vm0, %v6516_v45, 0.0  ;;  %v5132_v44 = vpack.c.bf16 %v4229_v25, %v4227_v43  ;;  %v4232_v34 = vld [vmem:[%s7401_s5 + $0xe8] sm:$0xff]  ;;  %v4234_v46 = vld [vmem:[%s7401_s5 + $0xf8] sm:$0xff] }
0x1190   :  { %2070 = vadd.xlane.f32.xlu0 %v2069_v11  ;;  %v5134_v16 = vpack.c.bf16 %v4234_v46, %v4232_v34 }
0x1191   :  { %v2023_v50 = vadd.f32 %v4498_v9, %v4194_v1  ;;  %v4499_v51 = vpop.f32.mrb[30].mxu1  ;;  %v6524_v38 = vadd.f32 %v2032_v48, %v6230_v35  ;;  %v4231_v48 = vld [vmem:[%s7401_s5 + $0xe0] sm:$0xff]  ;;  %v4233_v9 = vld [vmem:[%s7401_s5 + $0xf0] sm:$0xff] }
0x1192   :  { %v4500_v28 = vpop.f32.mrb[31].mxu1  ;;  %v5136_v11 = vpack.c.bf16 %v4233_v9, %v4231_v48 }
0x1193   :  { %v2033_v52 = vmul.f32 %v4131_v49, %v2023_v50  ;;  %v4501_v3 = vadd.f32 %v4500_v28, %v4499_v51  ;;  %v2072_v41 = vsel %vm66_vm0, %v6524_v38, 0.0 }
0x1194   :  { %2073 = vadd.xlane.f32.xlu1 %v2072_v41 }
0x1195   :  { %v2028_v54 = vadd.f32 %v4501_v3, %v4194_v1  ;;  %v6532_v47 = vadd.f32 %v2033_v52, %v6246_v8  ;;  %v5126_v1 = vpack.c.bf16 %v4226_v6, %v4224_v29  ;;  %v4198_v6 = vld [vmem:[%s7402_s2 + $0xd8] sm:$0xff] }
0x1197   :  { %v2034_v12 = vmul.f32 %v4132_v53, %v2028_v54  ;;  %v2075_v35 = vsel %vm66_vm0, %v6532_v47, 0.0  ;;  %5127 = vmatprep.subr.bf16.mxu0 %v5126_v1  ;;  %v4199_v54 = vld [vmem:[%s7402_s2 + $0xe0] sm:$0xff] }
0x1198   :  { %2076 = vadd.xlane.f32.xlu0 %v2075_v35  ;;  %5129 = vmatpush1.bf16.msra.mxu0 %v5128_v39 }
0x1199   :  { %v6537_v33 = vadd.f32 %v2034_v12, %v6249_v21  ;;  %5131 = vmatprep.subr.bf16.mxu0 %v5130_v0 }
0x119b   :  { %v2078_v4 = vsel %vm66_vm0, %v6537_v33, 0.0 }
0x119c   :  { %2079 = vadd.xlane.f32.xlu1 %v2078_v4  ;;  %5133 = vmatpush1.bf16.msra.mxu0 %v5132_v44 }
0x119d   :  { %5135 = vmatprep.subr.bf16.mxu0 %v5134_v16 }
0x11a0   :  { %5137 = vmatpush1.bf16.msra.mxu0 %v5136_v11 }
0x121d   :  { %v2071_v58 = vpop.xlane.xlu0 %2070 }
0x121e   :  { %v2081_v15 = vmul.f32 0.015625, %v2071_v58  ;;  %v2121_v58 = vadd.f32 1.0, %v4199_v54 }
0x1220   :  { %v6542_v55 = vsub.f32 %v6516_v45, %v2081_v15 }
0x1221   :  { %v2074_v60 = vpop.xlane.xlu1 %2073 }
0x1222   :  { %v2082_v8 = vmul.f32 0.015625, %v2074_v60  ;;  %v2089_v32 = vmul.f32 %v6542_v55, %v6542_v55 }
0x1224   :  { %v6547_v61 = vsub.f32 %v6524_v38, %v2082_v8  ;;  %v2093_v21 = vsel %vm66_vm0, %v2089_v32, 0.0  ;;  %v4200_v8 = vld [vmem:[%s7402_s2 + $0xe8] sm:$0xff] }
0x1225   :  { %2094 = vadd.xlane.f32.xlu0 %v2093_v21  ;;  %v2077_v63 = vpop.xlane.xlu0 %2076  ;;  %v4195_v21 = vld [vmem:[%s7402_s2 + $0xc0] sm:$0xff] }
0x1226   :  { %v2083_v36 = vmul.f32 0.015625, %v2077_v63  ;;  %v2090_v2 = vmul.f32 %v6547_v61, %v6547_v61 }
0x1228   :  { %v6553_v24 = vsub.f32 %v6532_v47, %v2083_v36  ;;  %v2096_v5 = vsel %vm66_vm0, %v2090_v2, 0.0  ;;  %v2122_v36 = vadd.f32 1.0, %v4200_v8 }
0x1229   :  { %2097 = vadd.xlane.f32.xlu1 %v2096_v5  ;;  %v2080_v7 = vpop.xlane.xlu1 %2079  ;;  %v4201_v5 = vld [vmem:[%s7402_s2 + $0xf0] sm:$0xff] }
0x122a   :  { %v2084_v40 = vmul.f32 0.015625, %v2080_v7  ;;  %v2091_v13 = vmul.f32 %v6553_v24, %v6553_v24 }
0x122c   :  { %v6559_v14 = vsub.f32 %v6537_v33, %v2084_v40  ;;  %v2099_v23 = vsel %vm66_vm0, %v2091_v13, 0.0  ;;  %v4196_v13 = vld [vmem:[%s7402_s2 + $0xc8] sm:$0xff] }
0x122d   :  { %2100 = vadd.xlane.f32.xlu0 %v2099_v23  ;;  %v2123_v23 = vadd.f32 1.0, %v4201_v5 }
0x122e   :  { %v2092_v17 = vmul.f32 %v6559_v14, %v6559_v14 }
0x1230   :  { %v2102_v20 = vsel %vm66_vm0, %v2092_v17, 0.0 }
0x1231   :  { %2103 = vadd.xlane.f32.xlu1 %v2102_v20  ;;  %v4202_v20 = vld [vmem:[%s7402_s2 + $0xf8] sm:$0xff] }
0x1232   :  { %v2124_v57 = vadd.f32 1.0, %v4202_v20 }
0x12b2   :  { %v2095_v49 = vpop.xlane.xlu0 %2094 }
0x12b3   :  { %v2105_v50 = vmul.f32 0.015625, %v2095_v49 }
0x12b5   :  { %v2109_v51 = vadd.f32 1e-06, %v2105_v50 }
0x12b6   :  { %v2098_v28 = vpop.xlane.xlu1 %2097 }
0x12b7   :  { %5542 = vrsqrt.f32 %v2109_v51  ;;  %v2106_v52 = vmul.f32 0.015625, %v2098_v28 }
0x12b9   :  { %v2110_v3 = vadd.f32 1e-06, %v2106_v52 }
0x12ba   :  { %v2101_v41 = vpop.xlane.xlu0 %2100 }
0x12bb   :  { %5544 = vrsqrt.f32 %v2110_v3  ;;  %v2107_v53 = vmul.f32 0.015625, %v2101_v41 }
0x12bd   :  { %v2111_v12 = vadd.f32 1e-06, %v2107_v53 }
0x12be   :  { %v2104_v35 = vpop.xlane.xlu1 %2103 }
0x12bf   :  { %5546 = vrsqrt.f32 %v2111_v12  ;;  %v2108_v4 = vmul.f32 0.015625, %v2104_v35 }
0x12c1   :  { %v5543_v15 = vpop.eup %5542  ;;  %v2112_v60 = vadd.f32 1e-06, %v2108_v4 }
0x12c2   :  { %v2117_v32 = vmul.f32 %v5543_v15, %v6542_v55 }
0x12c3   :  { %5548 = vrsqrt.f32 %v2112_v60 }
0x12c4   :  { %v2125_v63 = vmul.f32 %v2121_v58, %v2117_v32 }
0x12c5   :  { %v5545_v2 = vpop.eup %5544 }
0x12c6   :  { %v2129_v7 = vadd.f32 %v4195_v21, %v2125_v63  ;;  %v2118_v40 = vmul.f32 %v5545_v2, %v6547_v61  ;;  %v4197_v61 = vld [vmem:[%s7402_s2 + $0xd0] sm:$0xff] }
0x12c8   :  { %4236 = vmatmul.mubr.msk.f32.vlgmr.msra.gmra.mrb[32].mxu0 %vm66_vm0, %v2129_v7  ;;  %v2126_v55 = vmul.f32 %v2122_v36, %v2118_v40 }
0x12c9   :  { %v5547_v17 = vpop.eup %5546  ;;  %2245 = vmatprep.mubr.f32.mxu0 %v5650_v10 }
0x12ca   :  { %v2130_v56 = vadd.f32 %v4196_v13, %v2126_v55  ;;  %v2119_v18 = vmul.f32 %v5547_v17, %v6553_v24 }
0x12cc   :  { %4237 = vmatmul.mubr.msk.f32.gmra.mrb[34].mxu0 %vm66_vm0, %v2130_v56  ;;  %v2127_v19 = vmul.f32 %v2123_v23, %v2119_v18 }
0x12cd   :  { %v5549_v22 = vpop.eup %5548  ;;  %2251 = vmatprep.mubr.f32.mxu0 %v5650_v10 }
0x12ce   :  { %v2131_v26 = vadd.f32 %v4197_v61, %v2127_v19  ;;  %v2120_v29 = vmul.f32 %v5549_v22, %v6559_v14 }
0x12d0   :  { %4238 = vmatmul.mubr.msk.f32.gmra.mrb[36].mxu0 %vm66_vm0, %v2131_v26  ;;  %v2128_v24 = vmul.f32 %v2124_v57, %v2120_v29 }
0x12d1   :  { %2257 = vmatprep.mubr.f32.mxu0 %v5650_v10 }
0x12d2   :  { %v2132_v1 = vadd.f32 %v4198_v6, %v2128_v24 }
0x12d4   :  { %4239 = vmatmul.mubr.msk.f32.gmra.mrb[38].mxu0 %vm66_vm0, %v2132_v1 }
0x139b   :  { %v2241_v39 = vpop.f32.mrb[32].mxu0 }
0x139c   :  { %v6652_v14 = vadd.f32 %v2241_v39, %v2156_v27  ;;  %v2243_v31 = vpop.f32.mrb[33].mxu0  ;;  %v6748_v39 = vld [vmem:[%s7404_s3 + $0x8] sm:$0xff] }
0x139d   :  { %v2244_v44 = vadd.f32 %v2243_v31, %v2160_v42 }
0x139e   :  { %4798 = vmatprep.mubr.msk.f32.mxu0 %vm403_vm1, %v6652_v14 }
0x139f   :  { %v2247_v0 = vpop.f32.mrb[34].mxu0 }
0x13a0   :  { %v6657_v43 = vadd.f32 %v2247_v0, %v2156_v27  ;;  %v2249_v25 = vpop.f32.mrb[35].mxu0  ;;  %v6754_v0 = vld [vmem:[%s7404_s3] sm:$0xff] }
0x13a1   :  { %v2250_v34 = vadd.f32 %v2249_v25, %v2160_v42 }
0x13a2   :  { %v6661_v46 = vpack.i.bf16 %v6657_v43, %v6652_v14 }
0x13a3   :  { %v2253_v16 = vpop.f32.mrb[36].mxu0  ;;  %v6663_v48 = vpack.c.bf16 %v2250_v34, %v2244_v44  ;;  %v6665_v9 = vpack.i.bf16 %v2250_v34, %v2244_v44 }
0x13a4   :  { %5382 = vrot.lane.b32.xlu1 %v6661_v46, %s5652_s22  ;;  %5377 = vrot.lane.b32.xlu0 %v6661_v46, %s5651_s30  ;;  %v2255_v11 = vpop.f32.mrb[37].mxu0  ;;  %v6671_v50 = vadd.f32 %v2253_v16, %v2156_v27 }
0x13a5   :  { %v2256_v52 = vadd.f32 %v2255_v11, %v2160_v42 }
0x13a7   :  { %v2259_v49 = vpop.f32.mrb[38].mxu0 }
0x13a8   :  { %v6673_v51 = vadd.f32 %v2259_v49, %v2156_v27  ;;  %5397 = vrot.lane.b32.xlu0 %v6661_v46, %s5654_s24  ;;  %v2261_v28 = vpop.f32.mrb[39].mxu0 }
0x13a9   :  { %v2262_v3 = vadd.f32 %v2261_v28, %v2160_v42 }
0x13aa   :  { %v6679_v41 = vpack.i.bf16 %v6673_v51, %v6671_v50 }
0x13ab   :  { %v5154_v53 = vpack.c.bf16 %v2262_v3, %v2256_v52  ;;  %v6681_v54 = vpack.i.bf16 %v2262_v3, %v2256_v52 }
0x13ac   :  { %2520 = vrot.lane.b32.xlu0 %v6657_v43, %s5653_s23  ;;  %5387 = vrot.lane.b32.xlu1 %v6679_v41, %s5651_s30 }
0x13b0   :  { %2522 = vrot.lane.b32.xlu0 %v6671_v50, %s5653_s23  ;;  %5392 = vrot.lane.b32.xlu1 %v6679_v41, %s5652_s22 }
0x13b4   :  { %2792 = vrot.lane.b32.xlu0 %v6652_v14, %s5655_s25  ;;  %2518 = vrot.lane.b32.xlu1 %v6652_v14, %s5653_s23 }
0x13b8   :  { %2796 = vrot.lane.b32.xlu0 %v6671_v50, %s5655_s25  ;;  %5402 = vrot.lane.b32.xlu1 %v6679_v41, %s5654_s24 }
0x13bc   :  { %2524 = vrot.lane.b32.xlu1 %v6673_v51, %s5653_s23 }
0x13c0   :  { %2794 = vrot.lane.b32.xlu1 %v6657_v43, %s5655_s25 }
0x13c4   :  { %2798 = vrot.lane.b32.xlu1 %v6673_v51, %s5655_s25 }
0x1416   :  { %v5383_v12 = vpop.permute.xlu1 %5382  ;;  %v5378_v35 = vpop.permute.xlu0 %5377 }
0x1417   :  { %v5385_v4 = vunpack.i.h.bf16 %v5383_v12  ;;  %v5384_v58 = vunpack.i.l.bf16 %v5383_v12  ;;  %v5380_v15 = vunpack.i.h.bf16 %v5378_v35  ;;  %v5379_v60 = vunpack.i.l.bf16 %v5378_v35 }
0x1419   :  { %v5158_v8 = vpack.c.bf16 %v5385_v4, %v5384_v58  ;;  %v5138_v32 = vpack.c.bf16 %v5380_v15, %v5379_v60 }
0x141a   :  { %v5398_v2 = vpop.permute.xlu0 %5397 }
0x141b   :  { %5140 = vmatprep.subr.msk.bf16.mxu0 %vm5951_vm2, %v5138_v32  ;;  %5160 = vmatprep.subr.msk.bf16.mxu1 %vm5951_vm2, %v5158_v8  ;;  %v5400_v40 = vunpack.i.h.bf16 %v5398_v2  ;;  %v5399_v13 = vunpack.i.l.bf16 %v5398_v2 }
0x141c   :  { %5143 = vmatpush3.bf16.xpose.msk.msra.mxu0 %vm5951_vm2, %v5138_v32  ;;  %5163 = vmatpush3.bf16.xpose.msk.msra.mxu1 %vm5951_vm2, %v5158_v8  ;;  %v6774_v8 = vld [vmem:[%s7404_s3 + $0x10] sm:$0xff] }
0x141d   :  { %v5178_v56 = vpack.c.bf16 %v5400_v40, %v5399_v13 }
0x141e   :  { %v5388_v21 = vpop.permute.xlu1 %5387  ;;  %v2521_v18 = vpop.permute.xlu0 %2520 }
0x141f   :  { %v5390_v63 = vunpack.i.h.bf16 %v5388_v21  ;;  %v5389_v36 = vunpack.i.l.bf16 %v5388_v21 }
0x1421   :  { %v5144_v5 = vpack.c.bf16 %v5390_v63, %v5389_v36 }
0x1422   :  { %v5393_v7 = vpop.permute.xlu1 %5392  ;;  %v2523_v22 = vpop.permute.xlu0 %2522 }
0x1423   :  { %v5395_v55 = vunpack.i.h.bf16 %v5393_v7  ;;  %v5394_v23 = vunpack.i.l.bf16 %v5393_v7  ;;  %5146 = vmatprep.subr.msk.bf16.mxu0 %vm5951_vm2, %v5144_v5 }
0x1424   :  { %5149 = vmatpush3.bf16.xpose.msk.msra.mxu0 %vm5951_vm2, %v5144_v5 }
0x1425   :  { %v5164_v17 = vpack.c.bf16 %v5395_v55, %v5394_v23  ;;  %5151 = vmatprep.subr.bf16.mxu0 %v6663_v48 }
0x1426   :  { %v2519_v20 = vpop.permute.xlu1 %2518  ;;  %v2793_v6 = vpop.permute.xlu0 %2792 }
0x1427   :  { %5166 = vmatprep.subr.msk.bf16.mxu1 %vm5951_vm2, %v5164_v17  ;;  %4826 = vmatprep.mubr.msk.f32.mxu1 %vm403_vm1, %v2519_v20 }
0x1428   :  { %5169 = vmatpush3.bf16.xpose.msk.msra.mxu1 %vm5951_vm2, %v5164_v17 }
0x1429   :  { %5180 = vmatprep.subr.msk.bf16.mxu1 %vm5951_vm2, %v5178_v56 }
0x142a   :  { %v5403_v61 = vpop.permute.xlu1 %5402  ;;  %v2797_v1 = vpop.permute.xlu0 %2796 }
0x142b   :  { %4799 = vmatmul.mubr.msk.f32.vlgmr.msra.gmra.mrb[40].mxu0 %vm403_vm1, %v6657_v43  ;;  %v5405_v19 = vunpack.i.h.bf16 %v5403_v61  ;;  %v5404_v57 = vunpack.i.l.bf16 %v5403_v61 }
0x142c   :  { %4801 = vmatprep.mubr.msk.f32.mxu0 %vm403_vm1, %v6671_v50  ;;  %5153 = vmatpush3.bf16.msra.mxu0 %v6663_v48 }
0x142d   :  { %5155 = vmatprep.subr.bf16.mxu0 %v5154_v53  ;;  %v5184_v26 = vpack.c.bf16 %v5405_v19, %v5404_v57 }
0x142e   :  { %v2525_v29 = vpop.permute.xlu1 %2524 }
0x142f   :  { %4802 = vmatmul.mubr.msk.f32.gmra.mrb[42].mxu0 %vm403_vm1, %v6673_v51  ;;  %4827 = vmatmul.mubr.msk.f32.vlgmr.msra.gmra.mrb[32].mxu1 %vm403_vm1, %v2521_v18 }
0x1430   :  { %5157 = vmatpush3.bf16.msra.mxu0 %v5154_v53  ;;  %4829 = vmatprep.mubr.msk.f32.mxu1 %vm403_vm1, %v2523_v22  ;;  %v6765_v53 = vld [vmem:[%s7404_s3 + $0x18] sm:$0xff] }
0x1431   :  { %5183 = vmatpush3.bf16.xpose.msk.msra.mxu1 %vm5951_vm2, %v5178_v56 }
0x1432   :  { %5186 = vmatprep.subr.msk.bf16.mxu1 %vm5951_vm2, %v5184_v26  ;;  %v2795_v24 = vpop.permute.xlu1 %2794 }
0x1433   :  { %4830 = vmatmul.mubr.msk.f32.gmra.mrb[34].mxu1 %vm403_vm1, %v2525_v29 }
0x1434   :  { %4854 = vmatprep.mubr.msk.f32.mxu1 %vm403_vm1, %v2793_v6 }
0x1436   :  { %v2799_v37 = vpop.permute.xlu1 %2798 }
0x1439   :  { %5189 = vmatpush3.bf16.xpose.msk.msra.mxu1 %vm5951_vm2, %v5184_v26 }
0x1440   :  { %4855 = vmatmul.mubr.msk.f32.vlgmr.msra.gmra.mrb[36].mxu1 %vm403_vm1, %v2795_v24 }
0x1441   :  { %4857 = vmatprep.mubr.msk.f32.mxu1 %vm403_vm1, %v2797_v1 }
0x1444   :  { %4858 = vmatmul.mubr.msk.f32.gmra.mrb[38].mxu1 %vm403_vm1, %v2799_v37 }
0x14fe   :  { %v4800_v27 = vpop.f32.mrb[40].mxu0 }
0x14ff   :  { %v2364_v31 = vadd.f32 %v6748_v39, %v4800_v27  ;;  %v2358_v42 = vpop.f32.mrb[41].mxu0 }
0x1500   :  { %v2359_v25 = vadd.f32 %v6754_v0, %v2358_v42 }
0x1501   :  { %v2380_v44 = vsel %vm505_vm3, %v2364_v31, -inf }
0x1502   :  { %v4828_v34 = vpop.f32.mrb[32].mxu1  ;;  %2381 = vmax.xlane.f32.xlu1 %v2380_v44  ;;  %v4803_v16 = vpop.f32.mrb[42].mxu0  ;;  %v2377_v48 = vsel %vm505_vm3, %v2359_v25, -inf }
0x1503   :  { %v2622_v11 = vadd.f32 %v6748_v39, %v4828_v34  ;;  %v2368_v49 = vpop.f32.mrb[43].mxu0  ;;  %v2616_v28 = vpop.f32.mrb[33].mxu1  ;;  %2378 = vmax.xlane.f32.xlu0 %v2377_v48  ;;  %v2374_v12 = vadd.f32 %v6765_v53, %v4803_v16 }
0x1504   :  { %v2617_v52 = vadd.f32 %v6754_v0, %v2616_v28  ;;  %v2369_v32 = vadd.f32 %v6774_v8, %v2368_v49 }
0x1505   :  { %v2638_v3 = vsel %vm505_vm3, %v2622_v11, -inf  ;;  %v2386_v21 = vsel %vm505_vm3, %v2374_v12, -inf }
0x1506   :  { %v4831_v35 = vpop.f32.mrb[34].mxu1  ;;  %2639 = vmax.xlane.f32.xlu1 %v2638_v3  ;;  %v2635_v4 = vsel %vm505_vm3, %v2617_v52, -inf  ;;  %v2383_v36 = vsel %vm505_vm3, %v2369_v32, -inf }
0x1507   :  { %v2632_v58 = vadd.f32 %v6765_v53, %v4831_v35  ;;  %v2626_v15 = vpop.f32.mrb[35].mxu1  ;;  %2636 = vmax.xlane.f32.xlu0 %v2635_v4 }
0x1508   :  { %v2627_v63 = vadd.f32 %v6774_v8, %v2626_v15 }
0x1509   :  { %v2644_v60 = vsel %vm505_vm3, %v2632_v58, -inf }
0x150a   :  { %2645 = vmax.xlane.f32.xlu1 %v2644_v60  ;;  %v2641_v2 = vsel %vm505_vm3, %v2627_v63, -inf }
0x150b   :  { %2387 = vmax.xlane.f32.xlu0 %v2386_v21 }
0x150f   :  { %2384 = vmax.xlane.f32.xlu0 %v2383_v36 }
0x1513   :  { %v4856_v5 = vpop.f32.mrb[36].mxu1  ;;  %2642 = vmax.xlane.f32.xlu0 %v2641_v2 }
0x1514   :  { %v6782_v7 = vadd.f32 %v6748_v39, %v4856_v5  ;;  %v2890_v40 = vpop.f32.mrb[37].mxu1 }
0x1515   :  { %v6785_v13 = vadd.f32 %v6754_v0, %v2890_v40 }
0x1516   :  { %v2912_v55 = vsel %vm505_vm3, %v6782_v7, -inf }
0x1517   :  { %v4859_v23 = vpop.f32.mrb[38].mxu1  ;;  %2913 = vmax.xlane.f32.xlu1 %v2912_v55  ;;  %v2909_v17 = vsel %vm505_vm3, %v6785_v13, -inf }
0x1518   :  { %v6792_v20 = vadd.f32 %v6765_v53, %v4859_v23  ;;  %v2900_v56 = vpop.f32.mrb[39].mxu1  ;;  %2910 = vmax.xlane.f32.xlu0 %v2909_v17 }
0x1519   :  { %v6795_v18 = vadd.f32 %v6774_v8, %v2900_v56 }
0x151a   :  { %v2918_v61 = vsel %vm505_vm3, %v6792_v20, -inf }
0x151b   :  { %2919 = vmax.xlane.f32.xlu1 %v2918_v61  ;;  %v2915_v19 = vsel %vm505_vm3, %v6795_v18, -inf }
0x151c   :  { %2916 = vmax.xlane.f32.xlu0 %v2915_v19 }
0x152c   :  { %5412 = vrot.lane.b32.xlu1 %v6681_v54, %s5653_s23 }
0x1532   :  { %5407 = vrot.lane.b32.xlu0 %v6665_v9, %s5653_s23 }
0x158f   :  { %v2382_v57 = vpop.xlane.xlu1 %2381 }
0x1590   :  { %v2390_v22 = vsub.f32 %v2364_v31, %v2382_v57  ;;  %v2379_v26 = vpop.xlane.xlu0 %2378 }
0x1591   :  { %v2389_v29 = vsub.f32 %v2359_v25, %v2379_v26 }
0x1592   :  { %v2395_v6 = vmul.f32 1.442695, %v2390_v22 }
0x1593   :  { %v2393_v24 = vmul.f32 1.442695, %v2389_v29  ;;  %v2640_v1 = vpop.xlane.xlu1 %2639 }
0x1594   :  { %5550 = vpow2.f32 %v2395_v6  ;;  %v2648_v37 = vsub.f32 %v2622_v11, %v2640_v1  ;;  %v2637_v27 = vpop.xlane.xlu0 %2636 }
0x1595   :  { %5552 = vpow2.f32 %v2393_v24  ;;  %v2647_v42 = vsub.f32 %v2617_v52, %v2637_v27 }
0x1596   :  { %v2653_v44 = vmul.f32 1.442695, %v2648_v37 }
0x1597   :  { %v2651_v34 = vmul.f32 1.442695, %v2647_v42  ;;  %v2646_v16 = vpop.xlane.xlu1 %2645 }
0x1598   :  { %5554 = vpow2.f32 %v2653_v44  ;;  %v2650_v48 = vsub.f32 %v2632_v58, %v2646_v16  ;;  %v2388_v49 = vpop.xlane.xlu0 %2387 }
0x1599   :  { %5556 = vpow2.f32 %v2651_v34  ;;  %v2392_v28 = vsub.f32 %v2374_v12, %v2388_v49 }
0x159a   :  { %v2657_v3 = vmul.f32 1.442695, %v2650_v48 }
0x159b   :  { %v2399_v31 = vmul.f32 1.442695, %v2392_v28 }
0x159c   :  { %v2385_v35 = vpop.xlane.xlu0 %2384 }
0x159d   :  { %5558 = vpow2.f32 %v2399_v31  ;;  %v2391_v25 = vsub.f32 %v2369_v32, %v2385_v35 }
0x159e   :  { %v6805_v4 = vpop.eup %5550  ;;  %5560 = vpow2.f32 %v2657_v3 }
0x159f   :  { %v6807_v15 = vpop.eup %5552  ;;  %v2397_v11 = vmul.f32 1.442695, %v2391_v25  ;;  %v2404_v52 = vsel %vm505_vm3, %v6805_v4, 0.0 }
0x15a0   :  { %2405 = vadd.xlane.f32.xlu1 %v2404_v52  ;;  %v2643_v60 = vpop.xlane.xlu0 %2642  ;;  %v2401_v58 = vsel %vm505_vm3, %v6807_v15, 0.0 }
0x15a1   :  { %5562 = vpow2.f32 %v2397_v11  ;;  %v2649_v12 = vsub.f32 %v2627_v63, %v2643_v60  ;;  %2402 = vadd.xlane.f32.xlu0 %v2401_v58 }
0x15a2   :  { %v6813_v21 = vpop.eup %5554 }
0x15a3   :  { %v6815_v32 = vpop.eup %5556  ;;  %v2655_v36 = vmul.f32 1.442695, %v2649_v12  ;;  %v2662_v2 = vsel %vm505_vm3, %v6813_v21, 0.0 }
0x15a4   :  { %v2914_v5 = vpop.xlane.xlu1 %2913  ;;  %2663 = vadd.xlane.f32.xlu1 %v2662_v2  ;;  %v2659_v40 = vsel %vm505_vm3, %v6815_v32, 0.0 }
0x15a5   :  { %5564 = vpow2.f32 %v2655_v36  ;;  %v2922_v55 = vsub.f32 %v6782_v7, %v2914_v5  ;;  %v2911_v23 = vpop.xlane.xlu0 %2910  ;;  %2660 = vadd.xlane.f32.xlu0 %v2659_v40 }
0x15a6   :  { %v2921_v63 = vsub.f32 %v6785_v13, %v2911_v23 }
0x15a7   :  { %v6823_v17 = vpop.eup %5558  ;;  %v2927_v56 = vmul.f32 1.442695, %v2922_v55 }
0x15a8   :  { %v2925_v61 = vmul.f32 1.442695, %v2921_v63  ;;  %v2410_v19 = vsel %vm505_vm3, %v6823_v17, 0.0  ;;  %v6827_v57 = vpop.eup %5560  ;;  %v2920_v48 = vpop.xlane.xlu1 %2919 }
0x15a9   :  { %5566 = vpow2.f32 %v2927_v56  ;;  %v2917_v22 = vpop.xlane.xlu0 %2916  ;;  %2411 = vadd.xlane.f32.xlu1 %v2410_v19  ;;  %v2668_v7 = vsel %vm505_vm3, %v6827_v57, 0.0  ;;  %v2924_v49 = vsub.f32 %v6792_v20, %v2920_v48 }
0x15aa   :  { %5568 = vpow2.f32 %v2925_v61  ;;  %v2923_v3 = vsub.f32 %v6795_v18, %v2917_v22 }
0x15ab   :  { %v6829_v26 = vpop.eup %5562  ;;  %v2931_v28 = vmul.f32 1.442695, %v2924_v49 }
0x15ac   :  { %v2407_v13 = vsel %vm505_vm3, %v6829_v26, 0.0  ;;  %v2929_v31 = vmul.f32 1.442695, %v2923_v3  ;;  %v5413_v20 = vpop.permute.xlu1 %5412 }
0x15ad   :  { %v5408_v29 = vpop.permute.xlu0 %5407  ;;  %2669 = vadd.xlane.f32.xlu1 %v2668_v7  ;;  %2408 = vadd.xlane.f32.xlu0 %v2407_v13  ;;  %5570 = vpow2.f32 %v2931_v28  ;;  %v5414_v2 = vunpack.i.l.bf16 %v5413_v20 }
0x15ae   :  { %v5410_v6 = vunpack.i.h.bf16 %v5408_v29  ;;  %v5409_v24 = vunpack.i.l.bf16 %v5408_v29  ;;  %5572 = vpow2.f32 %v2929_v31 }
0x15af   :  { %v6835_v1 = vpop.eup %5564 }
0x15b0   :  { %v5170_v37 = vpack.c.bf16 %v5410_v6, %v5409_v24  ;;  %v2665_v27 = vsel %vm505_vm3, %v6835_v1, 0.0 }
0x15b1   :  { %2666 = vadd.xlane.f32.xlu0 %v2665_v27 }
0x15b2   :  { %5171 = vmatprep.subr.bf16.mxu0 %v5170_v37 }
0x15b3   :  { %v6839_v42 = vpop.eup %5566 }
0x15b4   :  { %v6841_v44 = vpop.eup %5568  ;;  %v2936_v34 = vsel %vm505_vm3, %v6839_v42, 0.0 }
0x15b5   :  { %2937 = vadd.xlane.f32.xlu1 %v2936_v34  ;;  %v2933_v16 = vsel %vm505_vm3, %v6841_v44, 0.0 }
0x15b6   :  { %2934 = vadd.xlane.f32.xlu0 %v2933_v16 }
0x15b7   :  { %v6857_v35 = vpop.eup %5570 }
0x15b8   :  { %v6861_v25 = vpop.eup %5572 }
0x15c6   :  { %5422 = vrot.lane.b32.xlu1 %v6681_v54, %s5655_s25 }
0x15ca   :  { %5427 = vrot.lane.b32.xlu1 %v6661_v46, %s5656_s4  ;;  %v2942_v46 = vsel %vm505_vm3, %v6857_v35, 0.0 }
0x15cc   :  { %5417 = vrot.lane.b32.xlu0 %v6665_v9, %s5655_s25 }
0x15ce   :  { %5432 = vrot.lane.b32.xlu1 %v6679_v41, %s5656_s4  ;;  %v2939_v41 = vsel %vm505_vm3, %v6861_v25, 0.0 }
0x15eb   :  { %2943 = vadd.xlane.f32.xlu0 %v2942_v46 }
0x15f2   :  { %2940 = vadd.xlane.f32.xlu1 %v2939_v41 }
0x1601   :  { %3062 = vrot.lane.b32.xlu0 %v6652_v14, %s5657_s26  ;;  %v5415_v14 = vunpack.i.h.bf16 %v5413_v20 }
0x1603   :  { %3064 = vrot.lane.b32.xlu1 %v6657_v43, %s5657_s26 }
0x1605   :  { %3066 = vrot.lane.b32.xlu0 %v6671_v50, %s5657_s26 }
0x1607   :  { %3068 = vrot.lane.b32.xlu1 %v6673_v51, %s5657_s26  ;;  %v5174_v51 = vpack.c.bf16 %v5415_v14, %v5414_v2 }
0x162d   :  { %v2406_v18 = vpop.xlane.xlu1 %2405 }
0x162e   :  { %5574 = vrcp.f32 %v2406_v18  ;;  %v2403_v11 = vpop.xlane.xlu0 %2402 }
0x162f   :  { %5576 = vrcp.f32 %v2403_v11 }
0x1631   :  { %v2664_v52 = vpop.xlane.xlu1 %2663 }
0x1632   :  { %v2661_v60 = vpop.xlane.xlu0 %2660 }
0x1633   :  { %5578 = vrcp.f32 %v2661_v60 }
0x1636   :  { %v2412_v12 = vpop.xlane.xlu1 %2411 }
0x1637   :  { %5580 = vrcp.f32 %v2412_v12 }
0x1638   :  { %v5575_v58 = vpop.eup %5574 }
0x1639   :  { %v5577_v36 = vpop.eup %5576  ;;  %v2418_v50 = vmul.f32 %v5575_v58, %v6805_v4 }
0x163a   :  { %v2409_v43 = vpop.xlane.xlu0 %2408  ;;  %v2417_v5 = vmul.f32 %v5577_v36, %v6807_v15  ;;  %v2670_v40 = vpop.xlane.xlu1 %2669 }
0x163b   :  { %5582 = vrcp.f32 %v2409_v43 }
0x163c   :  { %4812 = vmatprep.mubr.msk.f32.mxu0 %vm505_vm3, %v2417_v5  ;;  %5584 = vrcp.f32 %v2664_v52 }
0x163d   :  { %4813 = vmatmul.mubr.msk.f32.vlgmr.msra.gmra.mrb[44].mxu0 %vm505_vm3, %v2418_v50  ;;  %v5579_v15 = vpop.eup %5578 }
0x163e   :  { %5173 = vmatpush3.bf16.msra.mxu0 %v5170_v37  ;;  %v2667_v55 = vpop.xlane.xlu0 %2666  ;;  %v2675_v24 = vmul.f32 %v5579_v15, %v6815_v32 }
0x163f   :  { %5175 = vmatprep.subr.bf16.mxu0 %v5174_v51  ;;  %5586 = vrcp.f32 %v2667_v55 }
0x1640   :  { %5588 = vrcp.f32 %v2670_v40 }
0x1641   :  { %v5581_v4 = vpop.eup %5580 }
0x1642   :  { %v2938_v23 = vpop.xlane.xlu1 %2937  ;;  %5177 = vmatpush3.bf16.msra.mxu0 %v5174_v51  ;;  %v2420_v29 = vmul.f32 %v5581_v4, %v6823_v17 }
0x1643   :  { %v2935_v63 = vpop.xlane.xlu0 %2934 }
0x1644   :  { %5590 = vrcp.f32 %v2935_v63 }
0x1645   :  { %v5583_v56 = vpop.eup %5582  ;;  %5592 = vrcp.f32 %v2938_v23 }
0x1646   :  { %v5423_v61 = vpop.permute.xlu1 %5422  ;;  %v2419_v22 = vmul.f32 %v5583_v56, %v6829_v26  ;;  %v5585_v6 = vpop.eup %5584 }
0x1647   :  { %v5418_v19 = vpop.permute.xlu0 %5417  ;;  %v5425_v27 = vunpack.i.h.bf16 %v5423_v61  ;;  %v5424_v34 = vunpack.i.l.bf16 %v5423_v61  ;;  %v2676_v26 = vmul.f32 %v5585_v6, %v6813_v21 }
0x1648   :  { %v5420_v7 = vunpack.i.h.bf16 %v5418_v19  ;;  %v5419_v13 = vunpack.i.l.bf16 %v5418_v19  ;;  %4815 = vmatprep.mubr.msk.f32.mxu0 %vm505_vm3, %v2419_v22 }
0x1649   :  { %v5587_v37 = vpop.eup %5586  ;;  %4816 = vmatmul.mubr.msk.f32.gmra.mrb[46].mxu0 %vm505_vm3, %v2420_v29  ;;  %v5194_v3 = vpack.c.bf16 %v5425_v27, %v5424_v34 }
0x164a   :  { %v5190_v16 = vpack.c.bf16 %v5420_v7, %v5419_v13  ;;  %v5428_v48 = vpop.permute.xlu1 %5427  ;;  %4840 = vmatprep.mubr.msk.f32.mxu0 %vm505_vm3, %v2675_v24  ;;  %v5589_v49 = vpop.eup %5588  ;;  %v2677_v17 = vmul.f32 %v5587_v37, %v6835_v1 }
0x164b   :  { %v5430_v31 = vunpack.i.h.bf16 %v5428_v48  ;;  %v5429_v46 = vunpack.i.l.bf16 %v5428_v48  ;;  %v2678_v32 = vmul.f32 %v5589_v49, %v6827_v57 }
0x164c   :  { %5191 = vmatprep.subr.bf16.mxu0 %v5190_v16 }
0x164d   :  { %4841 = vmatmul.mubr.msk.f32.vlgmr.msra.gmra.mrb[48].mxu0 %vm505_vm3, %v2676_v26  ;;  %v5198_v21 = vpack.c.bf16 %v5430_v31, %v5429_v46 }
0x164e   :  { %v5591_v28 = vpop.eup %5590  ;;  %5193 = vmatpush3.bf16.msra.mxu0 %v5190_v16  ;;  %4843 = vmatprep.mubr.msk.f32.mxu0 %vm505_vm3, %v2677_v17  ;;  %v5433_v18 = vpop.permute.xlu1 %5432 }
0x164f   :  { %5195 = vmatprep.subr.bf16.mxu0 %v5194_v3  ;;  %v5593_v41 = vpop.eup %5592  ;;  %v2949_v20 = vmul.f32 %v5591_v28, %v6841_v44  ;;  %v5435_v11 = vunpack.i.h.bf16 %v5433_v18  ;;  %v5434_v52 = vunpack.i.l.bf16 %v5433_v18 }
0x1650   :  { %v2950_v1 = vmul.f32 %v5593_v41, %v6839_v42 }
0x1651   :  { %4844 = vmatmul.mubr.msk.f32.gmra.mrb[50].mxu0 %vm505_vm3, %v2678_v32  ;;  %v5204_v57 = vpack.c.bf16 %v5435_v11, %v5434_v52 }
0x1652   :  { %5197 = vmatpush3.bf16.msra.mxu0 %v5194_v3  ;;  %4868 = vmatprep.mubr.msk.f32.mxu0 %vm505_vm3, %v2949_v20 }
0x1653   :  { %5200 = vmatprep.subr.msk.bf16.mxu0 %vm5951_vm2, %v5198_v21 }
0x1655   :  { %4869 = vmatmul.mubr.msk.f32.vlgmr.msra.gmra.mrb[52].mxu0 %vm505_vm3, %v2950_v1 }
0x165b   :  { %5203 = vmatpush3.bf16.xpose.msk.msra.mxu0 %vm5951_vm2, %v5198_v21 }
0x165c   :  { %5206 = vmatprep.subr.msk.bf16.mxu0 %vm5951_vm2, %v5204_v57 }
0x1663   :  { %5209 = vmatpush3.bf16.xpose.msk.msra.mxu0 %vm5951_vm2, %v5204_v57 }
0x1678   :  { %v2944_v44 = vpop.xlane.xlu0 %2943 }
0x1679   :  { %5594 = vrcp.f32 %v2944_v44 }
0x167c   :  { %v3063_v36 = vpop.permute.xlu0 %3062 }
0x167f   :  { %v2941_v42 = vpop.xlane.xlu1 %2940 }
0x1680   :  { %5596 = vrcp.f32 %v2941_v42  ;;  %v3067_v30 = vpop.permute.xlu0 %3066 }
0x1683   :  { %v5595_v60 = vpop.eup %5594  ;;  %v3065_v2 = vpop.permute.xlu1 %3064 }
0x1684   :  { %v2952_v14 = vmul.f32 %v5595_v60, %v6857_v35 }
0x1687   :  { %v3069_v43 = vpop.permute.xlu1 %3068 }
0x168a   :  { %v5597_v58 = vpop.eup %5596 }
0x168b   :  { %v2951_v12 = vmul.f32 %v5597_v58, %v6861_v25 }
0x168d   :  { %4871 = vmatprep.mubr.msk.f32.mxu0 %vm505_vm3, %v2951_v12 }
0x168e   :  { %4872 = vmatmul.mubr.msk.f32.gmra.mrb[54].mxu0 %vm505_vm3, %v2952_v14 }
0x168f   :  { %4882 = vmatprep.mubr.msk.f32.mxu0 %vm403_vm1, %v3063_v36 }
0x1692   :  { %4883 = vmatmul.mubr.msk.f32.vlgmr.msra.gmra.mrb[56].mxu0 %vm403_vm1, %v3065_v2 }
0x1693   :  { %4885 = vmatprep.mubr.msk.f32.mxu0 %vm403_vm1, %v3067_v30 }
0x1696   :  { %4886 = vmatmul.mubr.msk.f32.gmra.mrb[58].mxu0 %vm403_vm1, %v3069_v43 }
0x1697   :  { %3684 = vmatprep.mubr.f32.mxu0 %v5650_v10 }
0x1710   :  { %v6910_v25 = vpop.f32.mrb[44].mxu0 }
0x1711   :  { %v6912_v35 = vpop.f32.mrb[45].mxu0 }
0x171c   :  { %v6914_v5 = vpop.f32.mrb[46].mxu0 }
0x171d   :  { %v6916_v50 = vpop.f32.mrb[47].mxu0 }
0x1720   :  { %v4842_v51 = vpop.f32.mrb[48].mxu0 }
0x1721   :  { %v2773_v40 = vpop.f32.mrb[49].mxu0 }
0x1724   :  { %v4845_v55 = vpop.f32.mrb[50].mxu0 }
0x1725   :  { %v2783_v23 = vpop.f32.mrb[51].mxu0 }
0x1728   :  { %v4870_v63 = vpop.f32.mrb[52].mxu0 }
0x1729   :  { %v3043_v15 = vpop.f32.mrb[53].mxu0 }
0x1761   :  { %v6918_v4 = vpop.f32.mrb[54].mxu0 }
0x1762   :  { %v6920_v56 = vpop.f32.mrb[55].mxu0 }
0x1765   :  { %v4884_v61 = vpop.f32.mrb[56].mxu0 }
0x1766   :  { %v3166_v19 = vadd.f32 %v6748_v39, %v4884_v61  ;;  %v3160_v22 = vpop.f32.mrb[57].mxu0 }
0x1767   :  { %v3161_v7 = vadd.f32 %v6754_v0, %v3160_v22  ;;  %v4289_v22 = vld [vmem:[%s7405_s7 + $0x48] sm:$0xff] }
0x1768   :  { %v3182_v13 = vsel %vm505_vm3, %v3166_v19, -inf }
0x1769   :  { %3183 = vmax.xlane.f32.xlu1 %v3182_v13  ;;  %v4887_v29 = vpop.f32.mrb[58].mxu0  ;;  %v3179_v6 = vsel %vm505_vm3, %v3161_v7, -inf }
0x176a   :  { %v3170_v24 = vpop.f32.mrb[59].mxu0  ;;  %3180 = vmax.xlane.f32.xlu0 %v3179_v6  ;;  %v3176_v27 = vadd.f32 %v6765_v53, %v4887_v29  ;;  %v4291_v29 = vld [vmem:[%s7405_s7 + $0x58] sm:$0xff] }
0x176b   :  { %v3171_v37 = vadd.f32 %v6774_v8, %v3170_v24  ;;  %v4292_v24 = vld [vmem:[%s7405_s7 + $0x60] sm:$0xff] }
0x176c   :  { %v3188_v39 = vsel %vm505_vm3, %v3176_v27, -inf }
0x176d   :  { %v3185_v34 = vsel %vm505_vm3, %v3171_v37, -inf }
0x176e   :  { %3186 = vmax.xlane.f32.xlu0 %v3185_v34  ;;  %v4294_v34 = vld [vmem:[%s7405_s7 + $0x70] sm:$0xff] }
0x1772   :  { %3189 = vmax.xlane.f32.xlu0 %v3188_v39  ;;  %v4295_v39 = vld [vmem:[%s7405_s7 + $0x78] sm:$0xff] }
0x17f6   :  { %v3184_v16 = vpop.xlane.xlu1 %3183 }
0x17f7   :  { %v3192_v0 = vsub.f32 %v3166_v19, %v3184_v16  ;;  %v3181_v48 = vpop.xlane.xlu0 %3180  ;;  %v4288_v19 = vld [vmem:[%s7405_s7 + $0x40] sm:$0xff]  ;;  %v5230_v16 = vpack.c.bf16 %v4295_v39, %v4294_v34 }
0x17f8   :  { %v3191_v26 = vsub.f32 %v3161_v7, %v3181_v48  ;;  %v4290_v7 = vld [vmem:[%s7405_s7 + $0x50] sm:$0xff]  ;;  %v5218_v13 = vpack.c.bf16 %v4289_v22, %v4288_v19 }
0x17f9   :  { %v3197_v49 = vmul.f32 1.442695, %v3192_v0  ;;  %v5222_v6 = vpack.c.bf16 %v4291_v29, %v4290_v7 }
0x17fa   :  { %v3195_v17 = vmul.f32 1.442695, %v3191_v26 }
0x17fb   :  { %5598 = vpow2.f32 %v3197_v49  ;;  %v3187_v28 = vpop.xlane.xlu0 %3186 }
0x17fc   :  { %5600 = vpow2.f32 %v3195_v17  ;;  %v3193_v3 = vsub.f32 %v3171_v37, %v3187_v28  ;;  %v4293_v37 = vld [vmem:[%s7405_s7 + $0x68] sm:$0xff] }
0x17fe   :  { %v3199_v31 = vmul.f32 1.442695, %v3193_v3 }
0x17ff   :  { %v3190_v8 = vpop.xlane.xlu0 %3189 }
0x1800   :  { %5602 = vpow2.f32 %v3199_v31  ;;  %v3194_v53 = vsub.f32 %v3176_v27, %v3190_v8  ;;  %v5226_v27 = vpack.c.bf16 %v4293_v37, %v4292_v24 }
0x1802   :  { %v3201_v46 = vmul.f32 1.442695, %v3194_v53 }
0x1804   :  { %5604 = vpow2.f32 %v3201_v46 }
0x1805   :  { %v5599_v32 = vpop.eup %5598 }
0x1806   :  { %v5601_v41 = vpop.eup %5600  ;;  %v3206_v20 = vsel %vm505_vm3, %v5599_v32, 0.0 }
0x1807   :  { %3207 = vadd.xlane.f32.xlu1 %v3206_v20  ;;  %v3203_v21 = vsel %vm505_vm3, %v5601_v41, 0.0 }
0x1808   :  { %3204 = vadd.xlane.f32.xlu0 %v3203_v21 }
0x180a   :  { %v5603_v1 = vpop.eup %5602 }
0x180b   :  { %v3209_v18 = vsel %vm505_vm3, %v5603_v1, 0.0 }
0x180c   :  { %3210 = vadd.xlane.f32.xlu0 %v3209_v18 }
0x180e   :  { %v5605_v11 = vpop.eup %5604 }
0x180f   :  { %v3212_v52 = vsel %vm505_vm3, %v5605_v11, 0.0 }
0x1810   :  { %3213 = vadd.xlane.f32.xlu1 %v3212_v52 }
0x1821   :  { %5442 = vrot.lane.b32.xlu1 %v6681_v54, %s5657_s26 }
0x1822   :  { %5437 = vrot.lane.b32.xlu0 %v6665_v9, %s5657_s26 }
0x1825   :  { %3336 = vrot.lane.b32.xlu1 %v2773_v40, %s5656_s4 }
0x1826   :  { %3352 = vrot.lane.b32.xlu0 %v3043_v15, %s5654_s24 }
0x1829   :  { %3338 = vrot.lane.b32.xlu1 %v4842_v51, %s5656_s4 }
0x182a   :  { %3340 = vrot.lane.b32.xlu0 %v2783_v23, %s5656_s4 }
0x182d   :  { %3354 = vrot.lane.b32.xlu1 %v4870_v63, %s5654_s24 }
0x1831   :  { %3342 = vrot.lane.b32.xlu1 %v4845_v55, %s5656_s4 }
0x1894   :  { %v3208_v44 = vpop.xlane.xlu1 %3207 }
0x1895   :  { %v3205_v57 = vpop.xlane.xlu0 %3204 }
0x1896   :  { %5606 = vrcp.f32 %v3205_v57 }
0x1897   :  { %5608 = vrcp.f32 %v3208_v44 }
0x1899   :  { %v3211_v42 = vpop.xlane.xlu0 %3210 }
0x189a   :  { %5610 = vrcp.f32 %v3211_v42 }
0x189d   :  { %v3214_v54 = vpop.xlane.xlu1 %3213  ;;  %v5438_v9 = vpop.permute.xlu0 %5437 }
0x189e   :  { %v5440_v60 = vunpack.i.h.bf16 %v5438_v9  ;;  %v5439_v58 = vunpack.i.l.bf16 %v5438_v9  ;;  %5612 = vrcp.f32 %v3214_v54 }
0x18a0   :  { %v5607_v12 = vpop.eup %5606  ;;  %v5210_v36 = vpack.c.bf16 %v5440_v60, %v5439_v58 }
0x18a1   :  { %v5443_v14 = vpop.permute.xlu1 %5442  ;;  %v3219_v2 = vmul.f32 %v5607_v12, %v5601_v41  ;;  %v5609_v40 = vpop.eup %5608  ;;  %v4203_v12 = vld [vmem:[%s7402_s2 + $0x100] sm:$0xff] }
0x18a2   :  { %v5445_v30 = vunpack.i.h.bf16 %v5443_v14  ;;  %v5444_v43 = vunpack.i.l.bf16 %v5443_v14  ;;  %5211 = vmatprep.subr.bf16.mxu1 %v5210_v36  ;;  %v3220_v23 = vmul.f32 %v5609_v40, %v5599_v32  ;;  %v3353_v31 = vpop.permute.xlu0 %3352 }
0x18a3   :  { %5213 = vmatpush3.bf16.msra.mxu1 %v5210_v36  ;;  %4896 = vmatprep.mubr.msk.f32.mxu1 %vm505_vm3, %v3219_v2 }
0x18a4   :  { %v5214_v51 = vpack.c.bf16 %v5445_v30, %v5444_v43  ;;  %v5611_v55 = vpop.eup %5610 }
0x18a5   :  { %v3221_v15 = vmul.f32 %v5611_v55, %v5603_v1  ;;  %v3337_v17 = vpop.permute.xlu1 %3336 }
0x18a6   :  { %5215 = vmatprep.subr.bf16.mxu1 %v5214_v51  ;;  %v3341_v53 = vpop.permute.xlu0 %3340  ;;  %v3380_v46 = vsel %vm403_vm1, %v6912_v35, %v3337_v17 }
0x18a7   :  { %5217 = vmatpush3.bf16.msra.mxu1 %v5214_v51  ;;  %v3384_v41 = vsel %vm505_vm3, %v3380_v46, %v3353_v31  ;;  %v3382_v35 = vsel %vm403_vm1, %v6916_v50, %v3341_v53  ;;  %v4297_v50 = vld [vmem:[%s7406_s8 + $0x1] ss:$0 sm:$0xff] }
0x18a8   :  { %v5613_v63 = vpop.eup %5612  ;;  %5219 = vmatprep.subr.bf16.mxu1 %v5218_v13 }
0x18a9   :  { %v3222_v61 = vmul.f32 %v5613_v63, %v5605_v11  ;;  %v3339_v28 = vpop.permute.xlu1 %3338  ;;  %v4206_v63 = vld [vmem:[%s7402_s2 + $0x118] sm:$0xff] }
0x18aa   :  { %4897 = vmatmul.mubr.msk.f32.vlgmr.msra.gmra.mrb[40].mxu1 %vm505_vm3, %v3220_v23 }
0x18ab   :  { %4899 = vmatprep.mubr.msk.f32.mxu1 %vm505_vm3, %v3221_v15  ;;  %5221 = vmatpush3.bf16.msra.mxu1 %v5218_v13 }
0x18ac   :  { %5223 = vmatprep.subr.bf16.mxu1 %v5222_v6 }
0x18ad   :  { %v3355_v3 = vpop.permute.xlu1 %3354 }
0x18ae   :  { %4900 = vmatmul.mubr.msk.f32.gmra.mrb[42].mxu1 %vm505_vm3, %v3222_v61 }
0x18af   :  { %5225 = vmatpush3.bf16.msra.mxu1 %v5222_v6 }
0x18b0   :  { %5227 = vmatprep.subr.bf16.mxu1 %v5226_v27 }
0x18b1   :  { %v3343_v8 = vpop.permute.xlu1 %3342 }
0x18b3   :  { %5229 = vmatpush3.bf16.msra.mxu1 %v5226_v27 }
0x18b4   :  { %5231 = vmatprep.subr.bf16.mxu1 %v5230_v16 }
0x18b7   :  { %5233 = vmatpush3.bf16.msra.mxu1 %v5230_v16 }
0x197d   :  { %v4898_v0 = vpop.f32.mrb[40].mxu1 }
0x197e   :  { %3370 = vrot.lane.b32.xlu1 %v4898_v0, %s5652_s22  ;;  %v3313_v48 = vpop.f32.mrb[41].mxu1 }
0x197f   :  { %3368 = vrot.lane.b32.xlu0 %v3313_v48, %s5652_s22 }
0x1981   :  { %v4901_v26 = vpop.f32.mrb[42].mxu1 }
0x1982   :  { %3358 = vrot.lane.b32.xlu1 %v6918_v4, %s5654_s24  ;;  %v3323_v49 = vpop.f32.mrb[43].mxu1  ;;  %v3381_v4 = vsel %vm403_vm1, %v6910_v25, %v3339_v28  ;;  %v3383_v25 = vsel %vm403_vm1, %v6914_v5, %v3343_v8  ;;  %v4204_v5 = vld [vmem:[%s7402_s2 + $0x108] sm:$0xff] }
0x1983   :  { %3356 = vrot.lane.b32.xlu0 %v6920_v56, %s5654_s24  ;;  %v3385_v20 = vsel %vm505_vm3, %v3381_v4, %v3355_v3  ;;  %v4303_v4 = vld [vmem:[%s7407_s9 + $0x88] sm:$0xff] }
0x1986   :  { %3374 = vrot.lane.b32.xlu1 %v4901_v26, %s5652_s22 }
0x1987   :  { %3372 = vrot.lane.b32.xlu0 %v3323_v49, %s5652_s22 }
0x19f0   :  { %v3371_v32 = vpop.permute.xlu1 %3370 }
0x19f1   :  { %v3369_v56 = vpop.permute.xlu0 %3368  ;;  %v3389_v1 = vsel %vm1517_vm4, %v3385_v20, %v3371_v32  ;;  %v4304_v20 = vld [vmem:[%s7407_s9 + $0x90] sm:$0xff] }
0x19f2   :  { %v3388_v21 = vsel %vm1517_vm4, %v3384_v41, %v3369_v56  ;;  %v4305_v41 = vld [vmem:[%s7407_s9 + $0x98] sm:$0xff]  ;;  %v4302_v56 = vld [vmem:[%s7407_s9 + $0x80] sm:$0xff] }
0x19f3   :  { %4918 = vmatprep.mubr.msk.f32.mxu1 %vm66_vm0, %v3388_v21  ;;  %v5234_v21 = vpack.c.bf16 %v4305_v41, %v4303_v4 }
0x19f4   :  { %v3359_v18 = vpop.permute.xlu1 %3358  ;;  %4919 = vmatmul.mubr.msk.f32.vlgmr.msra.gmra.mrb[44].mxu1 %vm66_vm0, %v3389_v1  ;;  %v5236_v1 = vpack.c.bf16 %v4304_v20, %v4302_v56  ;;  %v4208_v56 = vld [vmem:[%s7402_s2 + $0x128] sm:$0xff]  ;;  %v4214_v20 = vld [vmem:[%s7402_s2 + $0x158] sm:$0xff] }
0x19f5   :  { %v3357_v11 = vpop.permute.xlu0 %3356  ;;  %v3387_v42 = vsel %vm505_vm3, %v3383_v25, %v3359_v18  ;;  %5235 = vmatprep.subr.bf16.mxu0 %v5234_v21  ;;  %v4307_v18 = vld [vmem:[%s7407_s9 + $0xa8] sm:$0xff]  ;;  %v4308_v25 = vld [vmem:[%s7407_s9 + $0xb0] sm:$0xff] }
0x19f6   :  { %v3386_v57 = vsel %vm505_vm3, %v3382_v35, %v3357_v11  ;;  %v4309_v11 = vld [vmem:[%s7407_s9 + $0xb8] sm:$0xff]  ;;  %5237 = vmatpush1.bf16.msra.mxu0 %v5236_v1 }
0x19f7   :  { %v5238_v35 = vpack.c.bf16 %v4309_v11, %v4307_v18  ;;  %v4209_v18 = vld [vmem:[%s7402_s2 + $0x130] sm:$0xff] }
0x19f8   :  { %v3375_v52 = vpop.permute.xlu1 %3374 }
0x19f9   :  { %v3373_v44 = vpop.permute.xlu0 %3372  ;;  %v3391_v9 = vsel %vm1517_vm4, %v3387_v42, %v3375_v52  ;;  %v4306_v52 = vld [vmem:[%s7407_s9 + $0xa0] sm:$0xff]  ;;  %5239 = vmatprep.subr.bf16.mxu0 %v5238_v35  ;;  %v4313_v42 = vld [vmem:[%s7407_s9 + $0xd8] sm:$0xff]  ;;  %v3569_v35 = vadd.f32 1.0, %v4214_v20 }
0x19fa   :  { %v3390_v54 = vsel %vm1517_vm4, %v3386_v57, %v3373_v44  ;;  %v5240_v57 = vpack.c.bf16 %v4308_v25, %v4306_v52  ;;  %v4311_v44 = vld [vmem:[%s7407_s9 + $0xc8] sm:$0xff] }
0x19fb   :  { %4921 = vmatprep.mubr.msk.f32.mxu1 %vm66_vm0, %v3390_v54  ;;  %v5242_v54 = vpack.c.bf16 %v4313_v42, %v4311_v44  ;;  %v4210_v44 = vld [vmem:[%s7402_s2 + $0x138] sm:$0xff] }
0x19fc   :  { %4922 = vmatmul.mubr.msk.f32.gmra.mrb[46].mxu1 %vm66_vm0, %v3391_v9  ;;  %5241 = vmatpush1.bf16.msra.mxu0 %v5240_v57  ;;  %v4310_v9 = vld [vmem:[%s7407_s9 + $0xc0] sm:$0xff] }
0x19fd   :  { %5243 = vmatprep.subr.bf16.mxu0 %v5242_v54  ;;  %v4341_v54 = vld [vmem:[%s7408_s11 + $0x190] sm:$0xff] }
0x1ac7   :  { %v4920_v60 = vpop.f32.mrb[44].mxu1 }
0x1ac8   :  { %v3493_v58 = vadd.f32 %v4920_v60, %v4297_v50  ;;  %v3487_v36 = vpop.f32.mrb[45].mxu1  ;;  %v4315_v60 = vld [vmem:[%s7407_s9 + $0xe8] sm:$0xff] }
0x1ac9   :  { %v3488_v14 = vadd.f32 %v4297_v50, %v3487_v36  ;;  %v4314_v36 = vld [vmem:[%s7407_s9 + $0xe0] sm:$0xff] }
0x1aca   :  { %v3507_v2 = vmul.f32 %v4204_v5, %v3493_v58  ;;  %v4317_v58 = vld [vmem:[%s7407_s9 + $0xf8] sm:$0xff] }
0x1acb   :  { %v3506_v30 = vmul.f32 %v4203_v12, %v3488_v14  ;;  %v5246_v12 = vpack.c.bf16 %v4317_v58, %v4315_v60  ;;  %v4316_v14 = vld [vmem:[%s7407_s9 + $0xf0] sm:$0xff]  ;;  %v4343_v60 = vld [vmem:[%s7408_s11 + $0x1a0] sm:$0xff]  ;;  %v4344_v58 = vld [vmem:[%s7408_s11 + $0x1a8] sm:$0xff] }
0x1acc   :  { %v7010_v43 = vadd.f32 %v3507_v2, %v6524_v38  ;;  %v4205_v38 = vld [vmem:[%s7402_s2 + $0x110] sm:$0xff]  ;;  %v5248_v2 = vpack.c.bf16 %v4316_v14, %v4314_v36  ;;  %v4327_v36 = vld [vmem:[%s7408_s11 + $0x120] sm:$0xff]  ;;  %v4328_v14 = vld [vmem:[%s7408_s11 + $0x128] sm:$0xff] }
0x1acd   :  { %v7013_v51 = vadd.f32 %v3506_v30, %v6516_v45  ;;  %v4339_v30 = vld [vmem:[%s7408_s11 + $0x180] sm:$0xff] }
0x1ace   :  { %v3517_v40 = vsel %vm66_vm0, %v7010_v43, 0.0 }
0x1acf   :  { %3518 = vadd.xlane.f32.xlu1 %v3517_v40  ;;  %v4923_v55 = vpop.f32.mrb[46].mxu1  ;;  %v3514_v23 = vsel %vm66_vm0, %v7013_v51, 0.0  ;;  %v4340_v40 = vld [vmem:[%s7408_s11 + $0x188] sm:$0xff] }
0x1ad0   :  { %v3503_v15 = vadd.f32 %v4923_v55, %v4297_v50  ;;  %v3497_v61 = vpop.f32.mrb[47].mxu1  ;;  %3515 = vadd.xlane.f32.xlu0 %v3514_v23  ;;  %v4323_v55 = vld [vmem:[%s7408_s11 + $0x100] sm:$0xff]  ;;  %v5250_v23 = vpack.c.bf16 %v4340_v40, %v4339_v30  ;;  %v4345_v30 = vld [vmem:[%s7408_s11 + $0x1b0] sm:$0xff]  ;;  %v4346_v40 = vld [vmem:[%s7408_s11 + $0x1b8] sm:$0xff] }
0x1ad1   :  { %v3498_v45 = vadd.f32 %v4297_v50, %v3497_v61  ;;  %v4312_v50 = vld [vmem:[%s7407_s9 + $0xd0] sm:$0xff] }
0x1ad2   :  { %v3509_v19 = vmul.f32 %v4206_v63, %v3503_v15  ;;  %v5244_v5 = vpack.c.bf16 %v4312_v50, %v4310_v9  ;;  %v4324_v63 = vld [vmem:[%s7408_s11 + $0x108] sm:$0xff]  ;;  %5251 = vmatprep.subr.bf16.mxu1 %v5250_v23  ;;  %v4325_v50 = vld [vmem:[%s7408_s11 + $0x110] sm:$0xff] }
0x1ad3   :  { %v3508_v22 = vmul.f32 %v4205_v38, %v3498_v45  ;;  %v5252_v15 = vpack.c.bf16 %v4324_v63, %v4323_v55  ;;  %v5262_v55 = vpack.c.bf16 %v4346_v40, %v4345_v30  ;;  %v4329_v23 = vld [vmem:[%s7408_s11 + $0x130] sm:$0xff]  ;;  %v4330_v63 = vld [vmem:[%s7408_s11 + $0x138] sm:$0xff] }
0x1ad4   :  { %v7029_v13 = vadd.f32 %v3509_v19, %v6537_v33  ;;  %5245 = vmatpush1.bf16.msra.mxu0 %v5244_v5 }
0x1ad5   :  { %v7026_v7 = vadd.f32 %v3508_v22, %v6532_v47  ;;  %5247 = vmatprep.subr.bf16.mxu0 %v5246_v12  ;;  %5253 = vmatpush3.bf16.msra.mxu1 %v5252_v15  ;;  %v5258_v12 = vpack.c.bf16 %v4344_v58, %v4343_v60  ;;  %v5264_v15 = vpack.c.bf16 %v4330_v63, %v4329_v23 }
0x1ad6   :  { %v3523_v6 = vsel %vm66_vm0, %v7029_v13, 0.0 }
0x1ad7   :  { %v3520_v29 = vsel %vm66_vm0, %v7026_v7, 0.0 }
0x1ad8   :  { %3521 = vadd.xlane.f32.xlu0 %v3520_v29  ;;  %5249 = vmatpush1.bf16.msra.mxu0 %v5248_v2  ;;  %v5260_v2 = vpack.c.bf16 %v4328_v14, %v4327_v36 }
0x1adc   :  { %3524 = vadd.xlane.f32.xlu0 %v3523_v6 }
0x1b5c   :  { %v3519_v24 = vpop.xlane.xlu1 %3518 }
0x1b5d   :  { %v3527_v37 = vmul.f32 0.015625, %v3519_v24  ;;  %v3516_v27 = vpop.xlane.xlu0 %3515 }
0x1b5e   :  { %v3526_v34 = vmul.f32 0.015625, %v3516_v27 }
0x1b5f   :  { %v7036_v39 = vsub.f32 %v7010_v43, %v3527_v37  ;;  %v4211_v37 = vld [vmem:[%s7402_s2 + $0x140] sm:$0xff] }
0x1b60   :  { %v7039_v47 = vsub.f32 %v7013_v51, %v3526_v34 }
0x1b61   :  { %v3535_v33 = vmul.f32 %v7036_v39, %v7036_v39 }
0x1b62   :  { %v3534_v16 = vmul.f32 %v7039_v47, %v7039_v47 }
0x1b63   :  { %v3541_v0 = vsel %vm66_vm0, %v3535_v33, 0.0 }
0x1b64   :  { %3542 = vadd.xlane.f32.xlu1 %v3541_v0  ;;  %v3538_v48 = vsel %vm66_vm0, %v3534_v16, 0.0  ;;  %v4212_v16 = vld [vmem:[%s7402_s2 + $0x148] sm:$0xff] }
0x1b65   :  { %3539 = vadd.xlane.f32.xlu0 %v3538_v48  ;;  %v3522_v26 = vpop.xlane.xlu0 %3521  ;;  %v3566_v48 = vadd.f32 1.0, %v4211_v37 }
0x1b66   :  { %v3528_v49 = vmul.f32 0.015625, %v3522_v26 }
0x1b68   :  { %v7048_v17 = vsub.f32 %v7026_v7, %v3528_v49 }
0x1b69   :  { %v3525_v28 = vpop.xlane.xlu0 %3524 }
0x1b6a   :  { %v3529_v3 = vmul.f32 0.015625, %v3525_v28  ;;  %v3536_v31 = vmul.f32 %v7048_v17, %v7048_v17 }
0x1b6c   :  { %v7053_v8 = vsub.f32 %v7029_v13, %v3529_v3  ;;  %v3544_v53 = vsel %vm66_vm0, %v3536_v31, 0.0  ;;  %v3567_v31 = vadd.f32 1.0, %v4212_v16  ;;  %v4351_v16 = vld [vmem:[%s7408_s11 + $0x1e0] sm:$0xff] }
0x1b6d   :  { %3545 = vadd.xlane.f32.xlu0 %v3544_v53  ;;  %v4207_v53 = vld [vmem:[%s7402_s2 + $0x120] sm:$0xff] }
0x1b6e   :  { %v3537_v46 = vmul.f32 %v7053_v8, %v7053_v8 }
0x1b70   :  { %v3547_v32 = vsel %vm66_vm0, %v3537_v46, 0.0 }
0x1b71   :  { %3548 = vadd.xlane.f32.xlu1 %v3547_v32  ;;  %v4213_v32 = vld [vmem:[%s7402_s2 + $0x150] sm:$0xff] }
0x1bf1   :  { %v3543_v38 = vpop.xlane.xlu1 %3542 }
0x1bf2   :  { %v3551_v61 = vmul.f32 0.015625, %v3543_v38  ;;  %v3540_v45 = vpop.xlane.xlu0 %3539  ;;  %v4347_v38 = vld [vmem:[%s7408_s11 + $0x1c0] sm:$0xff] }
0x1bf3   :  { %v3550_v19 = vmul.f32 0.015625, %v3540_v45 }
0x1bf4   :  { %v3555_v22 = vadd.f32 1e-06, %v3551_v61  ;;  %v4348_v61 = vld [vmem:[%s7408_s11 + $0x1c8] sm:$0xff] }
0x1bf5   :  { %v3554_v29 = vadd.f32 1e-06, %v3550_v19  ;;  %v5266_v45 = vpack.c.bf16 %v4348_v61, %v4347_v38  ;;  %v4331_v19 = vld [vmem:[%s7408_s11 + $0x140] sm:$0xff] }
0x1bf6   :  { %5614 = vrsqrt.f32 %v3555_v22  ;;  %v4332_v22 = vld [vmem:[%s7408_s11 + $0x148] sm:$0xff] }
0x1bf7   :  { %5616 = vrsqrt.f32 %v3554_v29  ;;  %v5268_v29 = vpack.c.bf16 %v4332_v22, %v4331_v19 }
0x1bfa   :  { %v3546_v6 = vpop.xlane.xlu0 %3545 }
0x1bfb   :  { %v3552_v24 = vmul.f32 0.015625, %v3546_v6  ;;  %v4349_v6 = vld [vmem:[%s7408_s11 + $0x1d0] sm:$0xff] }
0x1bfd   :  { %v3556_v27 = vadd.f32 1e-06, %v3552_v24  ;;  %v4350_v24 = vld [vmem:[%s7408_s11 + $0x1d8] sm:$0xff] }
0x1bfe   :  { %v3549_v34 = vpop.xlane.xlu1 %3548  ;;  %v5270_v37 = vpack.c.bf16 %v4350_v24, %v4349_v6 }
0x1bff   :  { %5618 = vrsqrt.f32 %v3556_v27  ;;  %v3553_v33 = vmul.f32 0.015625, %v3549_v34  ;;  %v4333_v27 = vld [vmem:[%s7408_s11 + $0x150] sm:$0xff]  ;;  %v4334_v34 = vld [vmem:[%s7408_s11 + $0x158] sm:$0xff] }
0x1c00   :  { %v5615_v0 = vpop.eup %5614 }
0x1c01   :  { %v5617_v26 = vpop.eup %5616  ;;  %v3557_v49 = vadd.f32 1e-06, %v3553_v33  ;;  %v3563_v3 = vmul.f32 %v5615_v0, %v7036_v39  ;;  %v3568_v39 = vadd.f32 1.0, %v4213_v32  ;;  %v5272_v33 = vpack.c.bf16 %v4334_v34, %v4333_v27  ;;  %v4352_v0 = vld [vmem:[%s7408_s11 + $0x1e8] sm:$0xff]  ;;  %v4338_v32 = vld [vmem:[%s7408_s11 + $0x178] sm:$0xff] }
0x1c02   :  { %v3562_v28 = vmul.f32 %v5617_v26, %v7039_v47  ;;  %v5274_v26 = vpack.c.bf16 %v4352_v0, %v4351_v16 }
0x1c03   :  { %5620 = vrsqrt.f32 %v3557_v49  ;;  %v3571_v41 = vmul.f32 %v3567_v31, %v3563_v3  ;;  %v4336_v49 = vld [vmem:[%s7408_s11 + $0x168] sm:$0xff]  ;;  %v4354_v3 = vld [vmem:[%s7408_s11 + $0x1f8] sm:$0xff] }
0x1c04   :  { %v3570_v46 = vmul.f32 %v3566_v48, %v3562_v28  ;;  %v4335_v48 = vld [vmem:[%s7408_s11 + $0x160] sm:$0xff]  ;;  %v4353_v28 = vld [vmem:[%s7408_s11 + $0x1f0] sm:$0xff] }
0x1c05   :  { %v3575_v21 = vadd.f32 %v4208_v56, %v3571_v41  ;;  %v5276_v31 = vpack.c.bf16 %v4336_v49, %v4335_v48  ;;  %v4318_v41 = vld [vmem:[%s7409_s10 + $0x2] sm:$0x3] }
0x1c06   :  { %v3574_v4 = vadd.f32 %v4207_v53, %v3570_v46  ;;  %v5278_v53 = vpack.c.bf16 %v4354_v3, %v4353_v28  ;;  %v4337_v46 = vld [vmem:[%s7408_s11 + $0x170] sm:$0xff]  ;;  %v3601_v56 = vrot.slane %v4318_v41, %v5914_v59 }
0x1c08   :  { %4319 = vmatmul.mubr.msk.f32.vlgmr.msra.gmra.mrb[60].mxu0 %vm66_vm0, %v3574_v4  ;;  %v5280_v4 = vpack.c.bf16 %v4338_v32, %v4337_v46 }
0x1c09   :  { %v5619_v47 = vpop.eup %5618  ;;  %3690 = vmatprep.mubr.f32.mxu0 %v5650_v10 }
0x1c0a   :  { %v3564_v1 = vmul.f32 %v5619_v47, %v7048_v17 }
0x1c0c   :  { %4320 = vmatmul.mubr.msk.f32.gmra.mrb[62].mxu0 %vm66_vm0, %v3575_v21  ;;  %v3572_v11 = vmul.f32 %v3568_v39, %v3564_v1  ;;  %v3605_v39 = vrot.slane %v4318_v41, %v5920_v62 }
0x1c0d   :  { %v5621_v52 = vpop.eup %5620  ;;  %3696 = vmatprep.mubr.f32.mxu0 %v5650_v10 }
0x1c0e   :  { %v3576_v25 = vadd.f32 %v4209_v18, %v3572_v11  ;;  %v3565_v57 = vmul.f32 %v5621_v52, %v7053_v8  ;;  %v4342_v8 = vld [vmem:[%s7408_s11 + $0x198] sm:$0xff] }
0x1c0f   :  { %v5254_v9 = vpack.c.bf16 %v4342_v8, %v4341_v54 }
0x1c10   :  { %4321 = vmatmul.mubr.msk.f32.gmra.mrb[64].mxu0 %vm66_vm0, %v3576_v25  ;;  %v3573_v17 = vmul.f32 %v3569_v35, %v3565_v57 }
0x1c11   :  { %3702 = vmatprep.mubr.f32.mxu0 %v5650_v10  ;;  %v4326_v10 = vld [vmem:[%s7408_s11 + $0x118] sm:$0xff]  ;;  %5255 = vmatprep.subr.bf16.mxu1 %v5254_v9 }
0x1c12   :  { %v3577_v42 = vadd.f32 %v4210_v44, %v3573_v17  ;;  %v5256_v5 = vpack.c.bf16 %v4326_v10, %v4325_v50 }
0x1c14   :  { %4322 = vmatmul.mubr.msk.f32.gmra.mrb[66].mxu0 %vm66_vm0, %v3577_v42  ;;  %5257 = vmatpush3.bf16.msra.mxu1 %v5256_v5 }
0x1c15   :  { %5259 = vmatprep.subr.bf16.mxu1 %v5258_v12 }
0x1c18   :  { %5261 = vmatpush3.bf16.msra.mxu1 %v5260_v2 }
0x1c19   :  { %5263 = vmatprep.subr.bf16.mxu1 %v5262_v55 }
0x1c1c   :  { %5265 = vmatpush3.bf16.msra.mxu1 %v5264_v15 }
0x1c1d   :  { %5267 = vmatprep.subr.bf16.mxu1 %v5266_v45 }
0x1c20   :  { %5269 = vmatpush3.bf16.msra.mxu1 %v5268_v29 }
0x1c21   :  { %5271 = vmatprep.subr.bf16.mxu1 %v5270_v37 }
0x1c24   :  { %5273 = vmatpush3.bf16.msra.mxu1 %v5272_v33 }
0x1c25   :  { %5275 = vmatprep.subr.bf16.mxu1 %v5274_v26 }
0x1c28   :  { %5277 = vmatpush3.bf16.msra.mxu1 %v5276_v31 }
0x1c29   :  { %5279 = vmatprep.subr.bf16.mxu1 %v5278_v53 }
0x1c2c   :  { %5281 = vmatpush3.bf16.msra.mxu1 %v5280_v4 }
0x1cdb   :  { %v3686_v47 = vpop.f32.mrb[60].mxu0 }
0x1cdc   :  { %v7243_v20 = vadd.f32 %v3686_v47, %v3601_v56  ;;  %v3688_v21 = vpop.f32.mrb[61].mxu0 }
0x1cdd   :  { %v3689_v1 = vadd.f32 %v3688_v21, %v3605_v39 }
0x1cde   :  { %v3717_v18 = vmul.f32 0.044715, %v7243_v20  ;;  %v3709_v21 = vmul.f32 0.5, %v7243_v20 }
0x1cdf   :  { %v3718_v11 = vmul.f32 0.044715, %v3689_v1  ;;  %v3692_v35 = vpop.f32.mrb[62].mxu0 }
0x1ce0   :  { %v3725_v52 = vmul.f32 %v3717_v18, %v7243_v20  ;;  %v7247_v25 = vadd.f32 %v3692_v35, %v3601_v56  ;;  %v3694_v57 = vpop.f32.mrb[63].mxu0 }
0x1ce1   :  { %v3726_v44 = vmul.f32 %v3718_v11, %v3689_v1  ;;  %v7249_v17 = vadd.f32 %v3694_v57, %v3605_v39 }
0x1ce2   :  { %v3733_v59 = vmul.f32 %v3725_v52, %v7243_v20  ;;  %v3719_v62 = vmul.f32 0.044715, %v7247_v25 }
0x1ce3   :  { %v3720_v42 = vmul.f32 0.044715, %v7249_v17  ;;  %v3698_v54 = vpop.f32.mrb[64].mxu0  ;;  %v3734_v8 = vmul.f32 %v3726_v44, %v3689_v1  ;;  %v3712_v44 = vmul.f32 0.5, %v7249_v17 }
0x1ce4   :  { %v3741_v9 = vadd.f32 %v3733_v59, %v7243_v20  ;;  %v3727_v50 = vmul.f32 %v3719_v62, %v7247_v25  ;;  %v7256_v10 = vadd.f32 %v3698_v54, %v3601_v56  ;;  %v3700_v5 = vpop.f32.mrb[65].mxu0  ;;  %v3711_v62 = vmul.f32 0.5, %v7247_v25 }
0x1ce5   :  { %v3728_v60 = vmul.f32 %v3720_v42, %v7249_v17  ;;  %v7259_v58 = vadd.f32 %v3700_v5, %v3605_v39  ;;  %v3742_v12 = vadd.f32 %v3734_v8, %v3689_v1 }
0x1ce6   :  { %v3749_v36 = vmul.f32 0.7978846, %v3741_v9  ;;  %v3721_v14 = vmul.f32 0.044715, %v7256_v10  ;;  %v3735_v2 = vmul.f32 %v3727_v50, %v7247_v25  ;;  %v3713_v5 = vmul.f32 0.5, %v7256_v10 }
0x1ce7   :  { %v3722_v30 = vmul.f32 0.044715, %v7259_v58  ;;  %v3704_v40 = vpop.f32.mrb[66].mxu0  ;;  %v3750_v55 = vmul.f32 0.7978846, %v3742_v12  ;;  %v3736_v23 = vmul.f32 %v3728_v60, %v7249_v17  ;;  %v3714_v20 = vmul.f32 0.5, %v7259_v58 }
0x1ce8   :  { %5622 = vtanh.f32 %v3749_v36  ;;  %v3729_v63 = vmul.f32 %v3721_v14, %v7256_v10  ;;  %v7266_v15 = vadd.f32 %v3704_v40, %v3601_v56  ;;  %v3706_v38 = vpop.f32.mrb[67].mxu0  ;;  %v3743_v61 = vadd.f32 %v3735_v2, %v7247_v25 }
0x1ce9   :  { %v3730_v45 = vmul.f32 %v3722_v30, %v7259_v58  ;;  %v3707_v19 = vadd.f32 %v3706_v38, %v3605_v39  ;;  %5624 = vtanh.f32 %v3750_v55  ;;  %v3744_v22 = vadd.f32 %v3736_v23, %v7249_v17  ;;  %v4215_v38 = vld [vmem:[%s7402_s2 + $0x160] sm:$0xff] }
0x1cea   :  { %v3723_v29 = vmul.f32 0.044715, %v7266_v15  ;;  %v3751_v6 = vmul.f32 0.7978846, %v3743_v61  ;;  %v3737_v24 = vmul.f32 %v3729_v63, %v7256_v10  ;;  %v3710_v39 = vmul.f32 0.5, %v3689_v1 }
0x1ceb   :  { %v3724_v37 = vmul.f32 0.044715, %v3707_v19  ;;  %v3752_v27 = vmul.f32 0.7978846, %v3744_v22  ;;  %v3738_v34 = vmul.f32 %v3730_v45, %v7259_v58  ;;  %v3716_v2 = vmul.f32 0.5, %v3707_v19 }
0x1cec   :  { %v3731_v33 = vmul.f32 %v3723_v29, %v7266_v15  ;;  %5626 = vtanh.f32 %v3751_v6  ;;  %v3745_v16 = vadd.f32 %v3737_v24, %v7256_v10  ;;  %v3715_v30 = vmul.f32 0.5, %v7266_v15  ;;  %v4356_v10 = vld [vmem:[%s7410_s12 + $0x1] ss:$0 sm:$0xff]  ;;  %v4216_v29 = vld [vmem:[%s7402_s2 + $0x168] sm:$0xff] }
0x1ced   :  { %v3732_v0 = vmul.f32 %v3724_v37, %v3707_v19  ;;  %5628 = vtanh.f32 %v3752_v27  ;;  %v3746_v48 = vadd.f32 %v3738_v34, %v7259_v58 }
0x1cee   :  { %v3753_v26 = vmul.f32 0.7978846, %v3745_v16  ;;  %v3739_v49 = vmul.f32 %v3731_v33, %v7266_v15 }
0x1cef   :  { %v3754_v28 = vmul.f32 0.7978846, %v3746_v48  ;;  %v3740_v3 = vmul.f32 %v3732_v0, %v3707_v19  ;;  %v4217_v0 = vld [vmem:[%s7402_s2 + $0x170] sm:$0xff] }
0x1cf0   :  { %5630 = vtanh.f32 %v3753_v26  ;;  %v3747_v31 = vadd.f32 %v3739_v49, %v7266_v15 }
0x1cf1   :  { %5632 = vtanh.f32 %v3754_v28  ;;  %v3748_v53 = vadd.f32 %v3740_v3, %v3707_v19 }
0x1cf2   :  { %v5623_v46 = vpop.eup %5622  ;;  %v3755_v32 = vmul.f32 0.7978846, %v3747_v31 }
0x1cf3   :  { %v5625_v4 = vpop.eup %5624  ;;  %v3765_v41 = vadd.f32 1.0, %v5623_v46  ;;  %v3756_v56 = vmul.f32 0.7978846, %v3748_v53 }
0x1cf4   :  { %v3766_v47 = vadd.f32 1.0, %v5625_v4  ;;  %5634 = vtanh.f32 %v3755_v32 }
0x1cf5   :  { %5636 = vtanh.f32 %v3756_v56  ;;  %v3773_v52 = vmul.f32 %v3765_v41, %v3709_v21 }
0x1cf6   :  { %v5627_v18 = vpop.eup %5626  ;;  %v3774_v11 = vmul.f32 %v3766_v47, %v3710_v39 }
0x1cf7   :  { %v5629_v35 = vpop.eup %5628  ;;  %v3767_v57 = vadd.f32 1.0, %v5627_v18 }
0x1cf8   :  { %3886 = vmatprep.mubr.f32.mxu1 %v3774_v11  ;;  %v3768_v59 = vadd.f32 1.0, %v5629_v35 }
0x1cf9   :  { %3887 = vmatmul.mubr.f32.vlgmr.msra.gmra.mrb[48].mxu1 %v3773_v52  ;;  %v3775_v8 = vmul.f32 %v3767_v57, %v3711_v62 }
0x1cfa   :  { %v5631_v42 = vpop.eup %5630  ;;  %v3776_v54 = vmul.f32 %v3768_v59, %v3712_v44 }
0x1cfb   :  { %v5633_v1 = vpop.eup %5632  ;;  %v3769_v9 = vadd.f32 1.0, %v5631_v42 }
0x1cfc   :  { %3891 = vmatprep.mubr.f32.mxu1 %v3776_v54  ;;  %v3770_v50 = vadd.f32 1.0, %v5633_v1 }
0x1cfd   :  { %3892 = vmatmul.mubr.f32.gmra.mrb[50].mxu1 %v3775_v8  ;;  %v3777_v17 = vmul.f32 %v3769_v9, %v3713_v5  ;;  %v3989_v5 = vld [vmem:[%s7411_s13] sm:$0xff] }
0x1cfe   :  { %v5635_v60 = vpop.eup %5634  ;;  %v3778_v12 = vmul.f32 %v3770_v50, %v3714_v20 }
0x1cff   :  { %v5637_v36 = vpop.eup %5636  ;;  %v3771_v14 = vadd.f32 1.0, %v5635_v60  ;;  %v3990_v60 = vld [vmem:[%s7411_s13 + $0x8] sm:$0xff] }
0x1d00   :  { %3896 = vmatprep.mubr.f32.mxu1 %v3778_v12  ;;  %v3772_v25 = vadd.f32 1.0, %v5637_v36  ;;  %v5282_v12 = vpack.c.bf16 %v3990_v60, %v3989_v5  ;;  %v3991_v36 = vld [vmem:[%s7411_s13 + $0x10] sm:$0xff] }
0x1d01   :  { %3897 = vmatmul.mubr.f32.gmra.mrb[52].mxu1 %v3777_v17  ;;  %v3779_v55 = vmul.f32 %v3771_v14, %v3715_v30  ;;  %v3992_v17 = vld [vmem:[%s7411_s13 + $0x18] sm:$0xff] }
0x1d02   :  { %v3780_v40 = vmul.f32 %v3772_v25, %v3716_v2  ;;  %5283 = vmatprep.subr.bf16.mxu0 %v5282_v12  ;;  %v5286_v14 = vpack.c.bf16 %v3992_v17, %v3991_v36  ;;  %v3993_v2 = vld [vmem:[%s7411_s13 + $0x20] sm:$0xff]  ;;  %v3994_v25 = vld [vmem:[%s7411_s13 + $0x28] sm:$0xff] }
0x1d03   :  { %5285 = vmatpush3.bf16.msra.mxu0 %v5282_v12  ;;  %v5290_v30 = vpack.c.bf16 %v3994_v25, %v3993_v2 }
0x1d04   :  { %3901 = vmatprep.mubr.f32.mxu1 %v3780_v40  ;;  %5287 = vmatprep.subr.bf16.mxu0 %v5286_v14  ;;  %v3995_v40 = vld [vmem:[%s7411_s13 + $0x30] sm:$0xff] }
0x1d05   :  { %3902 = vmatmul.mubr.f32.gmra.mrb[54].mxu1 %v3779_v55  ;;  %v3996_v55 = vld [vmem:[%s7411_s13 + $0x38] sm:$0xff] }
0x1d07   :  { %5289 = vmatpush3.bf16.msra.mxu0 %v5286_v14 }
0x1d08   :  { %5291 = vmatprep.subr.bf16.mxu0 %v5290_v30 }
0x1d0b   :  { %5293 = vmatpush3.bf16.msra.mxu0 %v5290_v30 }
0x1dcc   :  { %v4610_v58 = vpop.f32.mrb[48].mxu1 }
0x1dcd   :  { %v4611_v23 = vpop.f32.mrb[49].mxu1 }
0x1dce   :  { %v4612_v63 = vadd.f32 %v4611_v23, %v4610_v58  ;;  %v5294_v58 = vpack.c.bf16 %v3996_v55, %v3995_v40 }
0x1dd0   :  { %v3889_v61 = vadd.f32 %v4612_v63, %v4356_v10  ;;  %v4613_v45 = vpop.f32.mrb[50].mxu1  ;;  %5295 = vmatprep.subr.bf16.mxu0 %v5294_v58 }
0x1dd1   :  { %v4614_v19 = vpop.f32.mrb[51].mxu1  ;;  %5297 = vmatpush3.bf16.msra.mxu0 %v5294_v58 }
0x1dd2   :  { %v3907_v22 = vmul.f32 %v4215_v38, %v3889_v61  ;;  %v4615_v15 = vadd.f32 %v4614_v19, %v4613_v45 }
0x1dd4   :  { %v3894_v6 = vadd.f32 %v4615_v15, %v4356_v10  ;;  %v4616_v24 = vpop.f32.mrb[52].mxu1  ;;  %v3911_v37 = vadd.f32 %v3907_v22, %v7013_v51  ;;  %v4218_v51 = vld [vmem:[%s7402_s2 + $0x178] sm:$0xff] }
0x1dd5   :  { %v4617_v27 = vpop.f32.mrb[53].mxu1 }
0x1dd6   :  { %v3908_v34 = vmul.f32 %v4216_v29, %v3894_v6  ;;  %v4618_v33 = vadd.f32 %v4617_v27, %v4616_v24  ;;  %v3925_v16 = vsel %vm66_vm0, %v3911_v37, 0.0  ;;  %v4361_v29 = vld [vmem:[%s7402_s2 + $0x1a0] sm:$0xff] }
0x1dd7   :  { %3926 = vadd.xlane.f32.xlu0 %v3925_v16 }
0x1dd8   :  { %v3899_v48 = vadd.f32 %v4618_v33, %v4356_v10  ;;  %v4619_v26 = vpop.f32.mrb[54].mxu1  ;;  %v3912_v49 = vadd.f32 %v3908_v34, %v7010_v43  ;;  %v4362_v34 = vld [vmem:[%s7402_s2 + $0x1a8] sm:$0xff] }
0x1dd9   :  { %v4620_v28 = vpop.f32.mrb[55].mxu1 }
0x1dda   :  { %v3909_v3 = vmul.f32 %v4217_v0, %v3899_v48  ;;  %v4621_v31 = vadd.f32 %v4620_v28, %v4619_v26  ;;  %v3928_v53 = vsel %vm66_vm0, %v3912_v49, 0.0  ;;  %v4357_v0 = vld [vmem:[%s7402_s2 + $0x180] sm:$0xff]  ;;  %v3978_v48 = vadd.f32 1.0, %v4362_v34  ;;  %v4363_v28 = vld [vmem:[%s7402_s2 + $0x1b0] sm:$0xff] }
0x1ddb   :  { %3929 = vadd.xlane.f32.xlu1 %v3928_v53  ;;  %v4358_v53 = vld [vmem:[%s7402_s2 + $0x188] sm:$0xff] }
0x1ddc   :  { %v3904_v46 = vadd.f32 %v4621_v31, %v4356_v10  ;;  %v3913_v32 = vadd.f32 %v3909_v3, %v7026_v7 }
0x1dde   :  { %v3910_v4 = vmul.f32 %v4218_v51, %v3904_v46  ;;  %v3931_v41 = vsel %vm66_vm0, %v3913_v32, 0.0  ;;  %v3979_v46 = vadd.f32 1.0, %v4363_v28 }
0x1ddf   :  { %3932 = vadd.xlane.f32.xlu0 %v3931_v41 }
0x1de0   :  { %v3914_v56 = vadd.f32 %v3910_v4, %v7029_v13  ;;  %v4364_v4 = vld [vmem:[%s7402_s2 + $0x1b8] sm:$0xff] }
0x1de2   :  { %v3934_v43 = vsel %vm66_vm0, %v3914_v56, 0.0 }
0x1de3   :  { %3935 = vadd.xlane.f32.xlu1 %v3934_v43  ;;  %v4359_v43 = vld [vmem:[%s7402_s2 + $0x190] sm:$0xff] }
0x1e64   :  { %v3927_v39 = vpop.xlane.xlu0 %3926 }
0x1e65   :  { %v3937_v47 = vmul.f32 0.015625, %v3927_v39 }
0x1e67   :  { %v3941_v21 = vsub.f32 %v3911_v37, %v3937_v47  ;;  %v3977_v37 = vadd.f32 1.0, %v4361_v29  ;;  %v3980_v47 = vadd.f32 1.0, %v4364_v4 }
0x1e68   :  { %v3930_v18 = vpop.xlane.xlu1 %3929 }
0x1e69   :  { %v3938_v11 = vmul.f32 0.015625, %v3930_v18  ;;  %v3945_v35 = vmul.f32 %v3941_v21, %v3941_v21 }
0x1e6b   :  { %v7308_v52 = vsub.f32 %v3912_v49, %v3938_v11  ;;  %v3949_v57 = vsel %vm66_vm0, %v3945_v35, 0.0  ;;  %v4360_v35 = vld [vmem:[%s7402_s2 + $0x198] sm:$0xff] }
0x1e6c   :  { %3950 = vadd.xlane.f32.xlu0 %v3949_v57  ;;  %v3933_v7 = vpop.xlane.xlu0 %3932 }
0x1e6d   :  { %v3939_v44 = vmul.f32 0.015625, %v3933_v7  ;;  %v3946_v59 = vmul.f32 %v7308_v52, %v7308_v52  ;;  %v4365_v7 = vld [vmem:[%s7412_s14] ss:$0 sm:$0xff] }
0x1e6f   :  { %v7313_v13 = vsub.f32 %v3913_v32, %v3939_v44  ;;  %v3952_v62 = vsel %vm66_vm0, %v3946_v59, 0.0 }
0x1e70   :  { %3953 = vadd.xlane.f32.xlu1 %v3952_v62  ;;  %v3936_v42 = vpop.xlane.xlu1 %3935 }
0x1e71   :  { %v3940_v54 = vmul.f32 0.015625, %v3936_v42  ;;  %v3947_v1 = vmul.f32 %v7313_v13, %v7313_v13 }
0x1e73   :  { %v7318_v8 = vsub.f32 %v3914_v56, %v3940_v54  ;;  %v3955_v9 = vsel %vm66_vm0, %v3947_v1, 0.0 }
0x1e74   :  { %3956 = vadd.xlane.f32.xlu0 %v3955_v9 }
0x1e75   :  { %v3948_v20 = vmul.f32 %v7318_v8, %v7318_v8 }
0x1e77   :  { %v3958_v50 = vsel %vm66_vm0, %v3948_v20, 0.0 }
0x1e78   :  { %3959 = vadd.xlane.f32.xlu1 %v3958_v50 }
0x1ef9   :  { %v3951_v10 = vpop.xlane.xlu0 %3950 }
0x1efa   :  { %v3961_v23 = vmul.f32 0.015625, %v3951_v10 }
0x1efc   :  { %v3965_v63 = vadd.f32 1e-06, %v3961_v23 }
0x1efd   :  { %v3954_v38 = vpop.xlane.xlu1 %3953 }
0x1efe   :  { %5638 = vrsqrt.f32 %v3965_v63  ;;  %v3962_v61 = vmul.f32 0.015625, %v3954_v38 }
0x1f00   :  { %v3966_v45 = vadd.f32 1e-06, %v3962_v61 }
0x1f01   :  { %v3957_v19 = vpop.xlane.xlu0 %3956 }
0x1f02   :  { %5640 = vrsqrt.f32 %v3966_v45  ;;  %v3963_v22 = vmul.f32 0.015625, %v3957_v19 }
0x1f04   :  { %v3967_v15 = vadd.f32 1e-06, %v3963_v22 }
0x1f05   :  { %v3960_v6 = vpop.xlane.xlu1 %3959 }
0x1f06   :  { %5642 = vrsqrt.f32 %v3967_v15  ;;  %v3964_v24 = vmul.f32 0.015625, %v3960_v6 }
0x1f08   :  { %v5639_v27 = vpop.eup %5638  ;;  %v3968_v33 = vadd.f32 1e-06, %v3964_v24 }
0x1f09   :  { %v3973_v16 = vmul.f32 %v5639_v27, %v3941_v21 }
0x1f0a   :  { %5644 = vrsqrt.f32 %v3968_v33 }
0x1f0b   :  { %v3981_v26 = vmul.f32 %v3977_v37, %v3973_v16 }
0x1f0c   :  { %v5641_v49 = vpop.eup %5640 }
0x1f0d   :  { %v3974_v3 = vmul.f32 %v5641_v49, %v7308_v52  ;;  %v3985_v31 = vadd.f32 %v4357_v0, %v3981_v26 }
0x1f0f   :  { %v3982_v51 = vmul.f32 %v3978_v48, %v3974_v3  ;;  %4940 = vmatprep.mubr.msk.f32.mxu0 %vm66_vm0, %v3985_v31 }
0x1f10   :  { %v5643_v32 = vpop.eup %5642 }
0x1f11   :  { %v3986_v41 = vadd.f32 %v4358_v53, %v3982_v51  ;;  %v3975_v56 = vmul.f32 %v5643_v32, %v7313_v13 }
0x1f13   :  { %4941 = vmatmul.mubr.msk.f32.vlgmr.msra.gmra.mrb[68].mxu0 %vm66_vm0, %v3986_v41  ;;  %v3983_v39 = vmul.f32 %v3979_v46, %v3975_v56 }
0x1f14   :  { %v5645_v21 = vpop.eup %5644 }
0x1f15   :  { %v3987_v18 = vadd.f32 %v4359_v43, %v3983_v39  ;;  %v3976_v11 = vmul.f32 %v5645_v21, %v7318_v8 }
0x1f17   :  { %4943 = vmatprep.mubr.msk.f32.mxu0 %vm66_vm0, %v3987_v18  ;;  %v3984_v52 = vmul.f32 %v3980_v47, %v3976_v11 }
0x1f19   :  { %v3988_v57 = vadd.f32 %v4360_v35, %v3984_v52 }
0x1f1b   :  { %4944 = vmatmul.mubr.msk.f32.gmra.mrb[70].mxu0 %vm66_vm0, %v3988_v57 }
0x1fe6   :  { %v4942_v44 = vpop.f32.mrb[68].mxu0 }
0x1fe7   :  { %v4088_v59 = vadd.f32 %v4942_v44, %v4365_v7  ;;  %v4082_v13 = vpop.f32.mrb[69].mxu0 }
0x1fe8   :  { %v4083_v62 = vadd.f32 %v4365_v7, %v4082_v13 }
0x1fe9   :  { %4102 = vst.msk [vmem:[%s7413_s15 + $0x8] sm:$0xff] %vm66_vm0, %v4088_v59 }
0x1fea   :  { %4101 = vst.msk [vmem:[%s7413_s15] sm:$0xff] %vm66_vm0, %v4083_v62 }
0x1fee   :  { %v4945_v42 = vpop.f32.mrb[70].mxu0 }
0x1fef   :  { %v4098_v54 = vadd.f32 %v4945_v42, %v4365_v7  ;;  %v4092_v1 = vpop.f32.mrb[71].mxu0 }
0x1ff0   :  { %v4093_v8 = vadd.f32 %v4365_v7, %v4092_v1 }
0x1ff1   :  { %4104 = vst.msk [vmem:[%s7413_s15 + $0x18] sm:$0xff] %vm66_vm0, %v4098_v54 }
0x1ff2   :  { %4103 = vst.msk [vmem:[%s7413_s15 + $0x10] sm:$0xff] %vm66_vm0, %v4093_v8 }

</bundles_post_ra>
